<compile_context>
chip_gen: v7x
topology: tpu7x:2x2x1
jax: 0.10.0
libtpu: 0.0.40
codegen_flags: <defaults>
</compile_context>

<pallas_src>
import functools

import jax
import jax.numpy as jnp
from jax import lax
from jax.experimental import pallas as pl
from jax.experimental.pallas import tpu as pltpu


# --------------------------- fused U-Net kernel ----------------------------- #
def _fused_unet_kernel(x_ref,
                       e1w, e1b, e2w, e2b, e3w, e3b,
                       m1w, m1b, m2w, m2b,
                       up_ref,
                       d1w, d1b, d2w, d2b, d3w, d3b, d4w, d4b,
                       o_ref, *, B, L):
    """Whole BasicUNet forward, VMEM resident.

    Activations are (C, B*Lseg) f32 values: channels -> sublanes, batch folded
    into the lane axis.  MXU matmuls use bf16 inputs with f32 accumulation.
    """

    def conv3(a, w_ref, b_ref, Lseg, relu=True):
        # a: (C_in, n) f32 with n = B * Lseg; w_ref: (C_out, 3*C_in) bf16,
        # rows ordered (tap k, c_in) with k=0 -> left neighbour (PyTorch order).
        C_in, n = a.shape
        z = jnp.zeros((C_in, 1), jnp.float32)
        shift_r = jnp.concatenate([z, a[:, : n - 1]], axis=1)   # global a[:, l-1]
        shift_l = jnp.concatenate([a[:, 1:], z], axis=1)        # global a[:, l+1]
        # zero across batch seams so each folded segment sees its own padding
        pos = lax.broadcasted_iota(jnp.int32, (C_in, n), 1) % Lseg
        left = jnp.where(pos == 0, 0.0, shift_r)
        right = jnp.where(pos == Lseg - 1, 0.0, shift_l)
        # fused-tap contraction: one (C_out, 3*C_in) @ (3*C_in, n) matmul
        taps = jnp.concatenate([left, a, right], axis=0)
        out = jnp.dot(w_ref[...], taps.astype(jnp.bfloat16),
                      preferred_element_type=jnp.float32)
        out = out + b_ref[...]
        return jnp.maximum(out, 0.0) if relu else out

    def conv1(a, w_ref, b_ref, relu=True):
        out = jnp.dot(w_ref[...], a.astype(jnp.bfloat16),
                      preferred_element_type=jnp.float32)
        out = out + b_ref[...]
        return jnp.maximum(out, 0.0) if relu else out

    def maxpool2(a):
        # a: (C, n) f32 -> (C, n//2); Lseg is even so batch segments stay aligned.
        C, n = a.shape
        z = jnp.zeros((C, 1), jnp.float32)
        nxt = jnp.concatenate([a[:, 1:], z], axis=1)
        m = jnp.maximum(a, nxt)                       # m[:, 2j] = pooled value j
        # compact the even lanes with a tiny 0/1 selection matmul
        row = lax.broadcasted_iota(jnp.int32, (n, n // 2), 0)
        col = lax.broadcasted_iota(jnp.int32, (n, n // 2), 1)
        sel = jnp.where(row == 2 * col, 1.0, 0.0).astype(jnp.bfloat16)
        return jnp.dot(m.astype(jnp.bfloat16), sel,
                       preferred_element_type=jnp.float32)

    Lh = L // 2

    # encoder
    h = conv3(x_ref[...], e1w, e1b, L)
    h = conv3(h, e2w, e2b, L)
    h = conv3(h, e3w, e3b, L)
    h = maxpool2(h)
    # middle
    h = conv3(h, m1w, m1b, Lh)
    h = conv3(h, m2w, m2b, Lh)
    # decoder: linear upsample (align_corners=True) via block-diagonal matrix
    h = jnp.dot(h.astype(jnp.bfloat16), up_ref[...],
                preferred_element_type=jnp.float32)
    h = conv3(h, d1w, d1b, L)
    h = conv3(h, d2w, d2b, L)
    h = conv1(h, d3w, d3b)
    h = conv1(h, d4w, d4b, relu=False)
    o_ref[...] = h


# ------------------------- host-side weight plumbing ------------------------ #
def _fuse_conv3_w(w, c_in_pad=None):
    """(C_out, C_in, 3) -> (C_out, 3*C_in) bf16, rows ordered (tap, c_in)."""
    C_out, C_in, K = w.shape
    if c_in_pad is not None and c_in_pad > C_in:
        w = jnp.pad(w, ((0, 0), (0, c_in_pad - C_in), (0, 0)))
    return jnp.transpose(w, (0, 2, 1)).reshape(C_out, -1).astype(jnp.bfloat16)


def _conv1_w(w, c_out_pad=None):
    """(C_out, C_in, 1) -> (C_out, C_in) bf16, optional zero-padded C_out."""
    w2 = w[:, :, 0]
    if c_out_pad is not None and c_out_pad > w2.shape[0]:
        w2 = jnp.pad(w2, ((0, c_out_pad - w2.shape[0]), (0, 0)))
    return w2.astype(jnp.bfloat16)


def _bias(b, pad_to=None):
    if pad_to is not None and pad_to > b.shape[0]:
        b = jnp.pad(b, (0, pad_to - b.shape[0]))
    return b.reshape(-1, 1).astype(jnp.float32)


def _upsample_matrix_f32(L_in, L_out):
    """PyTorch Upsample(mode='linear', align_corners=True) as an (L_in, L_out) matrix."""
    pos = jnp.arange(L_out, dtype=jnp.float32) * ((L_in - 1) / (L_out - 1))
    i0 = jnp.clip(jnp.floor(pos).astype(jnp.int32), 0, L_in - 1)
    i1 = jnp.clip(i0 + 1, 0, L_in - 1)
    frac = pos - i0.astype(jnp.float32)
    cols = jnp.arange(L_out)
    m = jnp.zeros((L_in, L_out), jnp.float32)
    m = m.at[i0, cols].add(1.0 - frac)
    m = m.at[i1, cols].add(frac)
    return m


def _upsample_matrix_folded(L_in, L_out, B):
    """Block-diagonal version for the batch-folded (C, B*L) lane layout."""
    m = _upsample_matrix_f32(L_in, L_out)
    return jnp.kron(jnp.eye(B, dtype=jnp.float32), m).astype(jnp.bfloat16)


# ------------------------------- BasicUNet ---------------------------------- #
def init_params(key):
    """PyTorch Conv1d default-style init (uniform +-1/sqrt(fan_in))."""
    specs = {
        "e1": (128, 3, 3), "e2": (128, 128, 3), "e3": (64, 128, 3),
        "m1": (256, 64, 3), "m2": (256, 256, 3),
        "d1": (128, 256, 3), "d2": (128, 128, 3),
        "d3": (64, 128, 1), "d4": (3, 64, 1),
    }
    params = {}
    for name, (co, ci, k) in specs.items():
        key, kw, kb = jax.random.split(key, 3)
        bound = 1.0 / float(ci * k) ** 0.5
        params[name + "_w"] = jax.random.uniform(kw, (co, ci, k), jnp.float32,
                                                 -bound, bound)
        params[name + "_b"] = jax.random.uniform(kb, (co,), jnp.float32,
                                                 -bound, bound)
    return params


def basic_unet(x, p):
    B, C_in, L = x.shape
    assert C_in == 3 and L % 2 == 0
    CP = 8                      # pad first-layer channels 3 -> 8 (sublane aligned)
    N = B * L

    # fold batch into the lane axis: (C, B*L)
    x2d = jnp.transpose(jnp.pad(x, ((0, 0), (0, CP - C_in), (0, 0))),
                        (1, 0, 2)).reshape(CP, N).astype(jnp.float32)
    up = _upsample_matrix_folded(L // 2, L, B)

    args = (
        x2d,
        _fuse_conv3_w(p["e1_w"], c_in_pad=CP), _bias(p["e1_b"]),
        _fuse_conv3_w(p["e2_w"]), _bias(p["e2_b"]),
        _fuse_conv3_w(p["e3_w"]), _bias(p["e3_b"]),
        _fuse_conv3_w(p["m1_w"]), _bias(p["m1_b"]),
        _fuse_conv3_w(p["m2_w"]), _bias(p["m2_b"]),
        up,
        _fuse_conv3_w(p["d1_w"]), _bias(p["d1_b"]),
        _fuse_conv3_w(p["d2_w"]), _bias(p["d2_b"]),
        _conv1_w(p["d3_w"]), _bias(p["d3_b"]),
        _conv1_w(p["d4_w"], c_out_pad=CP), _bias(p["d4_b"], pad_to=CP),
    )
    vmem = pl.BlockSpec(memory_space=pltpu.MemorySpace.VMEM)
    y2d = pl.pallas_call(
        functools.partial(_fused_unet_kernel, B=B, L=L),
        out_shape=jax.ShapeDtypeStruct((CP, N), jnp.float32),
        in_specs=[vmem] * len(args),
        out_specs=vmem,
    )(*args)
    # unfold lanes back to (B, 3, L)
    return jnp.transpose(y2d.reshape(CP, B, L), (1, 0, 2))[:, :3, :]


# ------------------------- pure-JAX f32 reference --------------------------- #
def basic_unet_reference(x, p):
    def conv(h, w, b, relu):
        pad = (w.shape[2] - 1) // 2
        out = lax.conv_general_dilated(
            h, w, window_strides=(1,), padding=[(pad, pad)],
            dimension_numbers=("NCH", "OIH", "NCH"))
        out = out + b[None, :, None]
        return jnp.maximum(out, 0.0) if relu else out

    h = conv(x, p["e1_w"], p["e1_b"], True)
    h = conv(h, p["e2_w"], p["e2_b"], True)
    h = conv(h, p["e3_w"], p["e3_b"], True)
    h = lax.reduce_window(h, -jnp.inf, lax.max, (1, 1, 2), (1, 1, 2), "VALID")
    h = conv(h, p["m1_w"], p["m1_b"], True)
    h = conv(h, p["m2_w"], p["m2_b"], True)
    m = _upsample_matrix_f32(h.shape[-1], 2 * h.shape[-1])
    h = jnp.einsum("bcl,lm->bcm", h, m)
    h = conv(h, p["d1_w"], p["d1_b"], True)
    h = conv(h, p["d2_w"], p["d2_b"], True)
    h = conv(h, p["d3_w"], p["d3_b"], True)
    h = conv(h, p["d4_w"], p["d4_b"], False)
    return h


if __name__ == "__main__":
    key = jax.random.PRNGKey(0)
    kx, kp = jax.random.split(key)
    B, L = 2, 64                       # B*L = 128 -> full-width lanes
    x = jax.random.normal(kx, (B, 3, L), jnp.float32)
    params = init_params(kp)

    out = jax.jit(basic_unet)(x, params)
    out = jax.block_until_ready(out)

    assert out.shape == (B, 3, L), out.shape
    assert bool(jnp.all(jnp.isfinite(out)))

    # loose correctness check vs f32 reference (kernel matmuls run in bf16)
    ref = basic_unet_reference(x, params)
    err = float(jnp.max(jnp.abs(out - ref)))
    scale = float(jnp.max(jnp.abs(ref))) + 1e-6
    assert err <= 0.1 * scale, (err, scale)

    print("KERNEL_OK")
</pallas_src>

<mosaic_0001>
module attributes {stable_mosaic.version = 11 : i64} {
  func.func private @main(%arg0: i32) attributes {dimension_semantics = [#tpu.dimension_semantics<core_parallel>], iteration_bounds = array<i64: 2>, tpu.core_type = #tpu.core_type<sc_scalar_subcore>, window_params = []} {
    return
  }
}

module attributes {stable_mosaic.version = 11 : i64} {
  func.func private @main(%arg0: i32) attributes {dimension_semantics = [#tpu.dimension_semantics<core_parallel>], iteration_bounds = array<i64: 2>, tpu.core_type = #tpu.core_type<sc_scalar_subcore>, window_params = []} {
    return
  }
}

module attributes {stable_mosaic.version = 11 : i64} {
  func.func @_fused_unet_kernel(%arg0: memref<8x128xf32, #tpu.memory_space<vmem>>, %arg1: memref<128x24xbf16, #tpu.memory_space<vmem>>, %arg2: memref<128x1xf32, #tpu.memory_space<vmem>>, %arg3: memref<128x384xbf16, #tpu.memory_space<vmem>>, %arg4: memref<128x1xf32, #tpu.memory_space<vmem>>, %arg5: memref<64x384xbf16, #tpu.memory_space<vmem>>, %arg6: memref<64x1xf32, #tpu.memory_space<vmem>>, %arg7: memref<256x192xbf16, #tpu.memory_space<vmem>>, %arg8: memref<256x1xf32, #tpu.memory_space<vmem>>, %arg9: memref<256x768xbf16, #tpu.memory_space<vmem>>, %arg10: memref<256x1xf32, #tpu.memory_space<vmem>>, %arg11: memref<64x128xbf16, #tpu.memory_space<vmem>>, %arg12: memref<128x768xbf16, #tpu.memory_space<vmem>>, %arg13: memref<128x1xf32, #tpu.memory_space<vmem>>, %arg14: memref<128x384xbf16, #tpu.memory_space<vmem>>, %arg15: memref<128x1xf32, #tpu.memory_space<vmem>>, %arg16: memref<64x128xbf16, #tpu.memory_space<vmem>>, %arg17: memref<64x1xf32, #tpu.memory_space<vmem>>, %arg18: memref<8x64xbf16, #tpu.memory_space<vmem>>, %arg19: memref<8x1xf32, #tpu.memory_space<vmem>>, %arg20: memref<8x128xf32, #tpu.memory_space<vmem>>) attributes {dimension_semantics = [], scalar_prefetch = 0 : i64, scratch_operands = 0 : i64, tpu.core_type = #tpu.core_type<tc>} {
    %c0 = arith.constant 0 : index
    %c0_0 = arith.constant 0 : index
    %0 = vector.load %arg0[%c0, %c0_0] : memref<8x128xf32, #tpu.memory_space<vmem>>, vector<8x128xf32>
    %cst = arith.constant 0.000000e+00 : f32
    %1 = vector.broadcast %cst : f32 to vector<8x1xf32>
    %2 = vector.extract_strided_slice %0 {offsets = [0, 0], sizes = [8, 127], strides = [1, 1]} : vector<8x128xf32> to vector<8x127xf32>
    %3 = tpu.concatenate %1, %2 in 1 : vector<8x1xf32>, vector<8x127xf32> -> vector<8x128xf32>
    %4 = vector.extract_strided_slice %0 {offsets = [0, 1], sizes = [8, 127], strides = [1, 1]} : vector<8x128xf32> to vector<8x127xf32>
    %5 = tpu.concatenate %4, %1 in 1 : vector<8x127xf32>, vector<8x1xf32> -> vector<8x128xf32>
    %6 = tpu.iota {dimensions = array<i32: 1>} : vector<8x128xi32>
    %c64_i32 = arith.constant 64 : i32
    %c0_i32 = arith.constant 0 : i32
    %7 = arith.cmpi eq, %c64_i32, %c0_i32 : i32
    %c1_i32 = arith.constant 1 : i32
    %8 = arith.select %7, %c1_i32, %c64_i32 : i32
    %9 = vector.broadcast %8 : i32 to vector<8x128xi32>
    %10 = arith.remsi %6, %9 : vector<8x128xi32>
    %c0_i32_1 = arith.constant 0 : i32
    %11 = vector.broadcast %c0_i32_1 : i32 to vector<8x128xi32>
    %12 = arith.cmpi ne, %10, %11 : vector<8x128xi32>
    %c0_i32_2 = arith.constant 0 : i32
    %13 = vector.broadcast %c0_i32_2 : i32 to vector<8x128xi32>
    %14 = arith.cmpi slt, %10, %13 : vector<8x128xi32>
    %c0_i32_3 = arith.constant 0 : i32
    %15 = arith.cmpi slt, %8, %c0_i32_3 : i32
    %16 = vector.broadcast %15 : i1 to vector<8x128xi1>
    %17 = vector.broadcast %16 : vector<8x128xi1> to vector<8x128xi1>
    %18 = arith.xori %14, %17 : vector<8x128xi1>
    %19 = arith.andi %18, %12 : vector<8x128xi1>
    %20 = vector.broadcast %8 : i32 to vector<8x128xi32>
    %21 = arith.addi %10, %20 : vector<8x128xi32>
    %22 = arith.select %19, %21, %10 : vector<8x128xi1>, vector<8x128xi32>
    %c0_i32_4 = arith.constant 0 : i32
    %23 = vector.broadcast %c0_i32_4 : i32 to vector<8x128xi32>
    %24 = arith.cmpi eq, %22, %23 : vector<8x128xi32>
    %cst_5 = arith.constant 0.000000e+00 : f32
    %25 = vector.broadcast %cst_5 : f32 to vector<8x128xf32>
    %26 = arith.select %24, %25, %3 : vector<8x128xi1>, vector<8x128xf32>
    %c63_i32 = arith.constant 63 : i32
    %27 = vector.broadcast %c63_i32 : i32 to vector<8x128xi32>
    %28 = arith.cmpi eq, %22, %27 : vector<8x128xi32>
    %cst_6 = arith.constant 0.000000e+00 : f32
    %29 = vector.broadcast %cst_6 : f32 to vector<8x128xf32>
    %30 = arith.select %28, %29, %5 : vector<8x128xi1>, vector<8x128xf32>
    %31 = tpu.concatenate %26, %0, %30 in 0 : vector<8x128xf32>, vector<8x128xf32>, vector<8x128xf32> -> vector<24x128xf32>
    %c0_7 = arith.constant 0 : index
    %c0_8 = arith.constant 0 : index
    %32 = vector.load %arg1[%c0_7, %c0_8] : memref<128x24xbf16, #tpu.memory_space<vmem>>, vector<128x24xbf16>
    %33 = arith.truncf %31 : vector<24x128xf32> to vector<24x128xbf16>
    %cst_9 = arith.constant dense<0.000000e+00> : vector<128x128xf32>
    %34 = tpu.matmul %32, %33, %cst_9 {dimension_numbers = #tpu.dot_dimension_numbers<[1], [0], [0], [1], [0, 0, 1, 1], [], []>} : vector<128x24xbf16>, vector<24x128xbf16>, vector<128x128xf32> -> vector<128x128xf32>
    %c0_10 = arith.constant 0 : index
    %c0_11 = arith.constant 0 : index
    %35 = vector.load %arg2[%c0_10, %c0_11] : memref<128x1xf32, #tpu.memory_space<vmem>>, vector<128x1xf32>
    %36 = vector.broadcast %35 : vector<128x1xf32> to vector<128x128xf32>
    %37 = arith.addf %34, %36 : vector<128x128xf32>
    %cst_12 = arith.constant 0.000000e+00 : f32
    %38 = vector.broadcast %cst_12 : f32 to vector<128x128xf32>
    %39 = arith.maximumf %37, %38 : vector<128x128xf32>
    %cst_13 = arith.constant 0.000000e+00 : f32
    %40 = vector.broadcast %cst_13 : f32 to vector<128x1xf32>
    %41 = vector.extract_strided_slice %39 {offsets = [0, 0], sizes = [128, 127], strides = [1, 1]} : vector<128x128xf32> to vector<128x127xf32>
    %42 = tpu.concatenate %40, %41 in 1 : vector<128x1xf32>, vector<128x127xf32> -> vector<128x128xf32>
    %43 = vector.extract_strided_slice %39 {offsets = [0, 1], sizes = [128, 127], strides = [1, 1]} : vector<128x128xf32> to vector<128x127xf32>
    %44 = tpu.concatenate %43, %40 in 1 : vector<128x127xf32>, vector<128x1xf32> -> vector<128x128xf32>
    %45 = tpu.iota {dimensions = array<i32: 1>} : vector<128x128xi32>
    %c64_i32_14 = arith.constant 64 : i32
    %c0_i32_15 = arith.constant 0 : i32
    %46 = arith.cmpi eq, %c64_i32_14, %c0_i32_15 : i32
    %c1_i32_16 = arith.constant 1 : i32
    %47 = arith.select %46, %c1_i32_16, %c64_i32_14 : i32
    %48 = vector.broadcast %47 : i32 to vector<128x128xi32>
    %49 = arith.remsi %45, %48 : vector<128x128xi32>
    %c0_i32_17 = arith.constant 0 : i32
    %50 = vector.broadcast %c0_i32_17 : i32 to vector<128x128xi32>
    %51 = arith.cmpi ne, %49, %50 : vector<128x128xi32>
    %c0_i32_18 = arith.constant 0 : i32
    %52 = vector.broadcast %c0_i32_18 : i32 to vector<128x128xi32>
    %53 = arith.cmpi slt, %49, %52 : vector<128x128xi32>
    %c0_i32_19 = arith.constant 0 : i32
    %54 = arith.cmpi slt, %47, %c0_i32_19 : i32
    %55 = vector.broadcast %54 : i1 to vector<128x128xi1>
    %56 = vector.broadcast %55 : vector<128x128xi1> to vector<128x128xi1>
    %57 = arith.xori %53, %56 : vector<128x128xi1>
    %58 = arith.andi %57, %51 : vector<128x128xi1>
    %59 = vector.broadcast %47 : i32 to vector<128x128xi32>
    %60 = arith.addi %49, %59 : vector<128x128xi32>
    %61 = arith.select %58, %60, %49 : vector<128x128xi1>, vector<128x128xi32>
    %c0_i32_20 = arith.constant 0 : i32
    %62 = vector.broadcast %c0_i32_20 : i32 to vector<128x128xi32>
    %63 = arith.cmpi eq, %61, %62 : vector<128x128xi32>
    %cst_21 = arith.constant 0.000000e+00 : f32
    %64 = vector.broadcast %cst_21 : f32 to vector<128x128xf32>
    %65 = arith.select %63, %64, %42 : vector<128x128xi1>, vector<128x128xf32>
    %c63_i32_22 = arith.constant 63 : i32
    %66 = vector.broadcast %c63_i32_22 : i32 to vector<128x128xi32>
    %67 = arith.cmpi eq, %61, %66 : vector<128x128xi32>
    %cst_23 = arith.constant 0.000000e+00 : f32
    %68 = vector.broadcast %cst_23 : f32 to vector<128x128xf32>
    %69 = arith.select %67, %68, %44 : vector<128x128xi1>, vector<128x128xf32>
    %70 = tpu.concatenate %65, %39, %69 in 0 : vector<128x128xf32>, vector<128x128xf32>, vector<128x128xf32> -> vector<384x128xf32>
    %c0_24 = arith.constant 0 : index
    %c0_25 = arith.constant 0 : index
    %71 = vector.load %arg3[%c0_24, %c0_25] : memref<128x384xbf16, #tpu.memory_space<vmem>>, vector<128x384xbf16>
    %72 = arith.truncf %70 : vector<384x128xf32> to vector<384x128xbf16>
    %cst_26 = arith.constant dense<0.000000e+00> : vector<128x128xf32>
    %73 = tpu.matmul %71, %72, %cst_26 {dimension_numbers = #tpu.dot_dimension_numbers<[1], [0], [0], [1], [0, 0, 1, 1], [], []>} : vector<128x384xbf16>, vector<384x128xbf16>, vector<128x128xf32> -> vector<128x128xf32>
    %c0_27 = arith.constant 0 : index
    %c0_28 = arith.constant 0 : index
    %74 = vector.load %arg4[%c0_27, %c0_28] : memref<128x1xf32, #tpu.memory_space<vmem>>, vector<128x1xf32>
    %75 = vector.broadcast %74 : vector<128x1xf32> to vector<128x128xf32>
    %76 = arith.addf %73, %75 : vector<128x128xf32>
    %cst_29 = arith.constant 0.000000e+00 : f32
    %77 = vector.broadcast %cst_29 : f32 to vector<128x128xf32>
    %78 = arith.maximumf %76, %77 : vector<128x128xf32>
    %cst_30 = arith.constant 0.000000e+00 : f32
    %79 = vector.broadcast %cst_30 : f32 to vector<128x1xf32>
    %80 = vector.extract_strided_slice %78 {offsets = [0, 0], sizes = [128, 127], strides = [1, 1]} : vector<128x128xf32> to vector<128x127xf32>
    %81 = tpu.concatenate %79, %80 in 1 : vector<128x1xf32>, vector<128x127xf32> -> vector<128x128xf32>
    %82 = vector.extract_strided_slice %78 {offsets = [0, 1], sizes = [128, 127], strides = [1, 1]} : vector<128x128xf32> to vector<128x127xf32>
    %83 = tpu.concatenate %82, %79 in 1 : vector<128x127xf32>, vector<128x1xf32> -> vector<128x128xf32>
    %84 = tpu.iota {dimensions = array<i32: 1>} : vector<128x128xi32>
    %c64_i32_31 = arith.constant 64 : i32
    %c0_i32_32 = arith.constant 0 : i32
    %85 = arith.cmpi eq, %c64_i32_31, %c0_i32_32 : i32
    %c1_i32_33 = arith.constant 1 : i32
    %86 = arith.select %85, %c1_i32_33, %c64_i32_31 : i32
    %87 = vector.broadcast %86 : i32 to vector<128x128xi32>
    %88 = arith.remsi %84, %87 : vector<128x128xi32>
    %c0_i32_34 = arith.constant 0 : i32
    %89 = vector.broadcast %c0_i32_34 : i32 to vector<128x128xi32>
    %90 = arith.cmpi ne, %88, %89 : vector<128x128xi32>
    %c0_i32_35 = arith.constant 0 : i32
    %91 = vector.broadcast %c0_i32_35 : i32 to vector<128x128xi32>
    %92 = arith.cmpi slt, %88, %91 : vector<128x128xi32>
    %c0_i32_36 = arith.constant 0 : i32
    %93 = arith.cmpi slt, %86, %c0_i32_36 : i32
    %94 = vector.broadcast %93 : i1 to vector<128x128xi1>
    %95 = vector.broadcast %94 : vector<128x128xi1> to vector<128x128xi1>
    %96 = arith.xori %92, %95 : vector<128x128xi1>
    %97 = arith.andi %96, %90 : vector<128x128xi1>
    %98 = vector.broadcast %86 : i32 to vector<128x128xi32>
    %99 = arith.addi %88, %98 : vector<128x128xi32>
    %100 = arith.select %97, %99, %88 : vector<128x128xi1>, vector<128x128xi32>
    %c0_i32_37 = arith.constant 0 : i32
    %101 = vector.broadcast %c0_i32_37 : i32 to vector<128x128xi32>
    %102 = arith.cmpi eq, %100, %101 : vector<128x128xi32>
    %cst_38 = arith.constant 0.000000e+00 : f32
    %103 = vector.broadcast %cst_38 : f32 to vector<128x128xf32>
    %104 = arith.select %102, %103, %81 : vector<128x128xi1>, vector<128x128xf32>
    %c63_i32_39 = arith.constant 63 : i32
    %105 = vector.broadcast %c63_i32_39 : i32 to vector<128x128xi32>
    %106 = arith.cmpi eq, %100, %105 : vector<128x128xi32>
    %cst_40 = arith.constant 0.000000e+00 : f32
    %107 = vector.broadcast %cst_40 : f32 to vector<128x128xf32>
    %108 = arith.select %106, %107, %83 : vector<128x128xi1>, vector<128x128xf32>
    %109 = tpu.concatenate %104, %78, %108 in 0 : vector<128x128xf32>, vector<128x128xf32>, vector<128x128xf32> -> vector<384x128xf32>
    %c0_41 = arith.constant 0 : index
    %c0_42 = arith.constant 0 : index
    %110 = vector.load %arg5[%c0_41, %c0_42] : memref<64x384xbf16, #tpu.memory_space<vmem>>, vector<64x384xbf16>
    %111 = arith.truncf %109 : vector<384x128xf32> to vector<384x128xbf16>
    %cst_43 = arith.constant dense<0.000000e+00> : vector<64x128xf32>
    %112 = tpu.matmul %110, %111, %cst_43 {dimension_numbers = #tpu.dot_dimension_numbers<[1], [0], [0], [1], [0, 0, 1, 1], [], []>} : vector<64x384xbf16>, vector<384x128xbf16>, vector<64x128xf32> -> vector<64x128xf32>
    %c0_44 = arith.constant 0 : index
    %c0_45 = arith.constant 0 : index
    %113 = vector.load %arg6[%c0_44, %c0_45] : memref<64x1xf32, #tpu.memory_space<vmem>>, vector<64x1xf32>
    %114 = vector.broadcast %113 : vector<64x1xf32> to vector<64x128xf32>
    %115 = arith.addf %112, %114 : vector<64x128xf32>
    %cst_46 = arith.constant 0.000000e+00 : f32
    %116 = vector.broadcast %cst_46 : f32 to vector<64x128xf32>
    %117 = arith.maximumf %115, %116 : vector<64x128xf32>
    %cst_47 = arith.constant 0.000000e+00 : f32
    %118 = vector.broadcast %cst_47 : f32 to vector<64x1xf32>
    %119 = vector.extract_strided_slice %117 {offsets = [0, 1], sizes = [64, 127], strides = [1, 1]} : vector<64x128xf32> to vector<64x127xf32>
    %120 = tpu.concatenate %119, %118 in 1 : vector<64x127xf32>, vector<64x1xf32> -> vector<64x128xf32>
    %121 = arith.maximumf %117, %120 : vector<64x128xf32>
    %122 = tpu.iota {dimensions = array<i32: 0>} : vector<128x64xi32>
    %123 = tpu.iota {dimensions = array<i32: 1>} : vector<128x64xi32>
    %c2_i32 = arith.constant 2 : i32
    %124 = vector.broadcast %c2_i32 : i32 to vector<128x64xi32>
    %125 = arith.muli %124, %123 : vector<128x64xi32>
    %126 = arith.cmpi eq, %122, %125 : vector<128x64xi32>
    %cst_48 = arith.constant 1.000000e+00 : f32
    %cst_49 = arith.constant 0.000000e+00 : f32
    %127 = vector.broadcast %cst_48 : f32 to vector<128x64xf32>
    %128 = vector.broadcast %cst_49 : f32 to vector<128x64xf32>
    %129 = arith.select %126, %127, %128 : vector<128x64xi1>, vector<128x64xf32>
    %130 = arith.truncf %129 : vector<128x64xf32> to vector<128x64xbf16>
    %131 = arith.truncf %121 : vector<64x128xf32> to vector<64x128xbf16>
    %cst_50 = arith.constant dense<0.000000e+00> : vector<64x64xf32>
    %132 = tpu.matmul %131, %130, %cst_50 {dimension_numbers = #tpu.dot_dimension_numbers<[1], [0], [0], [1], [0, 0, 1, 1], [], []>} : vector<64x128xbf16>, vector<128x64xbf16>, vector<64x64xf32> -> vector<64x64xf32>
    %cst_51 = arith.constant 0.000000e+00 : f32
    %133 = vector.broadcast %cst_51 : f32 to vector<64x1xf32>
    %134 = vector.extract_strided_slice %132 {offsets = [0, 0], sizes = [64, 63], strides = [1, 1]} : vector<64x64xf32> to vector<64x63xf32>
    %135 = tpu.concatenate %133, %134 in 1 : vector<64x1xf32>, vector<64x63xf32> -> vector<64x64xf32>
    %136 = vector.extract_strided_slice %132 {offsets = [0, 1], sizes = [64, 63], strides = [1, 1]} : vector<64x64xf32> to vector<64x63xf32>
    %137 = tpu.concatenate %136, %133 in 1 : vector<64x63xf32>, vector<64x1xf32> -> vector<64x64xf32>
    %138 = tpu.iota {dimensions = array<i32: 1>} : vector<64x64xi32>
    %c32_i32 = arith.constant 32 : i32
    %c0_i32_52 = arith.constant 0 : i32
    %139 = arith.cmpi eq, %c32_i32, %c0_i32_52 : i32
    %c1_i32_53 = arith.constant 1 : i32
    %140 = arith.select %139, %c1_i32_53, %c32_i32 : i32
    %141 = vector.broadcast %140 : i32 to vector<64x64xi32>
    %142 = arith.remsi %138, %141 : vector<64x64xi32>
    %c0_i32_54 = arith.constant 0 : i32
    %143 = vector.broadcast %c0_i32_54 : i32 to vector<64x64xi32>
    %144 = arith.cmpi ne, %142, %143 : vector<64x64xi32>
    %c0_i32_55 = arith.constant 0 : i32
    %145 = vector.broadcast %c0_i32_55 : i32 to vector<64x64xi32>
    %146 = arith.cmpi slt, %142, %145 : vector<64x64xi32>
    %c0_i32_56 = arith.constant 0 : i32
    %147 = arith.cmpi slt, %140, %c0_i32_56 : i32
    %148 = vector.broadcast %147 : i1 to vector<64x64xi1>
    %149 = vector.broadcast %148 : vector<64x64xi1> to vector<64x64xi1>
    %150 = arith.xori %146, %149 : vector<64x64xi1>
    %151 = arith.andi %150, %144 : vector<64x64xi1>
    %152 = vector.broadcast %140 : i32 to vector<64x64xi32>
    %153 = arith.addi %142, %152 : vector<64x64xi32>
    %154 = arith.select %151, %153, %142 : vector<64x64xi1>, vector<64x64xi32>
    %c0_i32_57 = arith.constant 0 : i32
    %155 = vector.broadcast %c0_i32_57 : i32 to vector<64x64xi32>
    %156 = arith.cmpi eq, %154, %155 : vector<64x64xi32>
    %cst_58 = arith.constant 0.000000e+00 : f32
    %157 = vector.broadcast %cst_58 : f32 to vector<64x64xf32>
    %158 = arith.select %156, %157, %135 : vector<64x64xi1>, vector<64x64xf32>
    %c31_i32 = arith.constant 31 : i32
    %159 = vector.broadcast %c31_i32 : i32 to vector<64x64xi32>
    %160 = arith.cmpi eq, %154, %159 : vector<64x64xi32>
    %cst_59 = arith.constant 0.000000e+00 : f32
    %161 = vector.broadcast %cst_59 : f32 to vector<64x64xf32>
    %162 = arith.select %160, %161, %137 : vector<64x64xi1>, vector<64x64xf32>
    %163 = tpu.concatenate %158, %132, %162 in 0 : vector<64x64xf32>, vector<64x64xf32>, vector<64x64xf32> -> vector<192x64xf32>
    %c0_60 = arith.constant 0 : index
    %c0_61 = arith.constant 0 : index
    %164 = vector.load %arg7[%c0_60, %c0_61] : memref<256x192xbf16, #tpu.memory_space<vmem>>, vector<256x192xbf16>
    %165 = arith.truncf %163 : vector<192x64xf32> to vector<192x64xbf16>
    %cst_62 = arith.constant dense<0.000000e+00> : vector<256x64xf32>
    %166 = tpu.matmul %164, %165, %cst_62 {dimension_numbers = #tpu.dot_dimension_numbers<[1], [0], [0], [1], [0, 0, 1, 1], [], []>} : vector<256x192xbf16>, vector<192x64xbf16>, vector<256x64xf32> -> vector<256x64xf32>
    %c0_63 = arith.constant 0 : index
    %c0_64 = arith.constant 0 : index
    %167 = vector.load %arg8[%c0_63, %c0_64] : memref<256x1xf32, #tpu.memory_space<vmem>>, vector<256x1xf32>
    %168 = vector.broadcast %167 : vector<256x1xf32> to vector<256x64xf32>
    %169 = arith.addf %166, %168 : vector<256x64xf32>
    %cst_65 = arith.constant 0.000000e+00 : f32
    %170 = vector.broadcast %cst_65 : f32 to vector<256x64xf32>
    %171 = arith.maximumf %169, %170 : vector<256x64xf32>
    %cst_66 = arith.constant 0.000000e+00 : f32
    %172 = vector.broadcast %cst_66 : f32 to vector<256x1xf32>
    %173 = vector.extract_strided_slice %171 {offsets = [0, 0], sizes = [256, 63], strides = [1, 1]} : vector<256x64xf32> to vector<256x63xf32>
    %174 = tpu.concatenate %172, %173 in 1 : vector<256x1xf32>, vector<256x63xf32> -> vector<256x64xf32>
    %175 = vector.extract_strided_slice %171 {offsets = [0, 1], sizes = [256, 63], strides = [1, 1]} : vector<256x64xf32> to vector<256x63xf32>
    %176 = tpu.concatenate %175, %172 in 1 : vector<256x63xf32>, vector<256x1xf32> -> vector<256x64xf32>
    %177 = tpu.iota {dimensions = array<i32: 1>} : vector<256x64xi32>
    %c32_i32_67 = arith.constant 32 : i32
    %c0_i32_68 = arith.constant 0 : i32
    %178 = arith.cmpi eq, %c32_i32_67, %c0_i32_68 : i32
    %c1_i32_69 = arith.constant 1 : i32
    %179 = arith.select %178, %c1_i32_69, %c32_i32_67 : i32
    %180 = vector.broadcast %179 : i32 to vector<256x64xi32>
    %181 = arith.remsi %177, %180 : vector<256x64xi32>
    %c0_i32_70 = arith.constant 0 : i32
    %182 = vector.broadcast %c0_i32_70 : i32 to vector<256x64xi32>
    %183 = arith.cmpi ne, %181, %182 : vector<256x64xi32>
    %c0_i32_71 = arith.constant 0 : i32
    %184 = vector.broadcast %c0_i32_71 : i32 to vector<256x64xi32>
    %185 = arith.cmpi slt, %181, %184 : vector<256x64xi32>
    %c0_i32_72 = arith.constant 0 : i32
    %186 = arith.cmpi slt, %179, %c0_i32_72 : i32
    %187 = vector.broadcast %186 : i1 to vector<256x64xi1>
    %188 = vector.broadcast %187 : vector<256x64xi1> to vector<256x64xi1>
    %189 = arith.xori %185, %188 : vector<256x64xi1>
    %190 = arith.andi %189, %183 : vector<256x64xi1>
    %191 = vector.broadcast %179 : i32 to vector<256x64xi32>
    %192 = arith.addi %181, %191 : vector<256x64xi32>
    %193 = arith.select %190, %192, %181 : vector<256x64xi1>, vector<256x64xi32>
    %c0_i32_73 = arith.constant 0 : i32
    %194 = vector.broadcast %c0_i32_73 : i32 to vector<256x64xi32>
    %195 = arith.cmpi eq, %193, %194 : vector<256x64xi32>
    %cst_74 = arith.constant 0.000000e+00 : f32
    %196 = vector.broadcast %cst_74 : f32 to vector<256x64xf32>
    %197 = arith.select %195, %196, %174 : vector<256x64xi1>, vector<256x64xf32>
    %c31_i32_75 = arith.constant 31 : i32
    %198 = vector.broadcast %c31_i32_75 : i32 to vector<256x64xi32>
    %199 = arith.cmpi eq, %193, %198 : vector<256x64xi32>
    %cst_76 = arith.constant 0.000000e+00 : f32
    %200 = vector.broadcast %cst_76 : f32 to vector<256x64xf32>
    %201 = arith.select %199, %200, %176 : vector<256x64xi1>, vector<256x64xf32>
    %202 = tpu.concatenate %197, %171, %201 in 0 : vector<256x64xf32>, vector<256x64xf32>, vector<256x64xf32> -> vector<768x64xf32>
    %c0_77 = arith.constant 0 : index
    %c0_78 = arith.constant 0 : index
    %203 = vector.load %arg9[%c0_77, %c0_78] : memref<256x768xbf16, #tpu.memory_space<vmem>>, vector<256x768xbf16>
    %204 = arith.truncf %202 : vector<768x64xf32> to vector<768x64xbf16>
    %cst_79 = arith.constant dense<0.000000e+00> : vector<256x64xf32>
    %205 = tpu.matmul %203, %204, %cst_79 {dimension_numbers = #tpu.dot_dimension_numbers<[1], [0], [0], [1], [0, 0, 1, 1], [], []>} : vector<256x768xbf16>, vector<768x64xbf16>, vector<256x64xf32> -> vector<256x64xf32>
    %c0_80 = arith.constant 0 : index
    %c0_81 = arith.constant 0 : index
    %206 = vector.load %arg10[%c0_80, %c0_81] : memref<256x1xf32, #tpu.memory_space<vmem>>, vector<256x1xf32>
    %207 = vector.broadcast %206 : vector<256x1xf32> to vector<256x64xf32>
    %208 = arith.addf %205, %207 : vector<256x64xf32>
    %cst_82 = arith.constant 0.000000e+00 : f32
    %209 = vector.broadcast %cst_82 : f32 to vector<256x64xf32>
    %210 = arith.maximumf %208, %209 : vector<256x64xf32>
    %211 = arith.truncf %210 : vector<256x64xf32> to vector<256x64xbf16>
    %c0_83 = arith.constant 0 : index
    %c0_84 = arith.constant 0 : index
    %212 = vector.load %arg11[%c0_83, %c0_84] : memref<64x128xbf16, #tpu.memory_space<vmem>>, vector<64x128xbf16>
    %cst_85 = arith.constant dense<0.000000e+00> : vector<256x128xf32>
    %213 = tpu.matmul %211, %212, %cst_85 {dimension_numbers = #tpu.dot_dimension_numbers<[1], [0], [0], [1], [0, 0, 1, 1], [], []>} : vector<256x64xbf16>, vector<64x128xbf16>, vector<256x128xf32> -> vector<256x128xf32>
    %cst_86 = arith.constant 0.000000e+00 : f32
    %214 = vector.broadcast %cst_86 : f32 to vector<256x1xf32>
    %215 = vector.extract_strided_slice %213 {offsets = [0, 0], sizes = [256, 127], strides = [1, 1]} : vector<256x128xf32> to vector<256x127xf32>
    %216 = tpu.concatenate %214, %215 in 1 : vector<256x1xf32>, vector<256x127xf32> -> vector<256x128xf32>
    %217 = vector.extract_strided_slice %213 {offsets = [0, 1], sizes = [256, 127], strides = [1, 1]} : vector<256x128xf32> to vector<256x127xf32>
    %218 = tpu.concatenate %217, %214 in 1 : vector<256x127xf32>, vector<256x1xf32> -> vector<256x128xf32>
    %219 = tpu.iota {dimensions = array<i32: 1>} : vector<256x128xi32>
    %c64_i32_87 = arith.constant 64 : i32
    %c0_i32_88 = arith.constant 0 : i32
    %220 = arith.cmpi eq, %c64_i32_87, %c0_i32_88 : i32
    %c1_i32_89 = arith.constant 1 : i32
    %221 = arith.select %220, %c1_i32_89, %c64_i32_87 : i32
    %222 = vector.broadcast %221 : i32 to vector<256x128xi32>
    %223 = arith.remsi %219, %222 : vector<256x128xi32>
    %c0_i32_90 = arith.constant 0 : i32
    %224 = vector.broadcast %c0_i32_90 : i32 to vector<256x128xi32>
    %225 = arith.cmpi ne, %223, %224 : vector<256x128xi32>
    %c0_i32_91 = arith.constant 0 : i32
    %226 = vector.broadcast %c0_i32_91 : i32 to vector<256x128xi32>
    %227 = arith.cmpi slt, %223, %226 : vector<256x128xi32>
    %c0_i32_92 = arith.constant 0 : i32
    %228 = arith.cmpi slt, %221, %c0_i32_92 : i32
    %229 = vector.broadcast %228 : i1 to vector<256x128xi1>
    %230 = vector.broadcast %229 : vector<256x128xi1> to vector<256x128xi1>
    %231 = arith.xori %227, %230 : vector<256x128xi1>
    %232 = arith.andi %231, %225 : vector<256x128xi1>
    %233 = vector.broadcast %221 : i32 to vector<256x128xi32>
    %234 = arith.addi %223, %233 : vector<256x128xi32>
    %235 = arith.select %232, %234, %223 : vector<256x128xi1>, vector<256x128xi32>
    %c0_i32_93 = arith.constant 0 : i32
    %236 = vector.broadcast %c0_i32_93 : i32 to vector<256x128xi32>
    %237 = arith.cmpi eq, %235, %236 : vector<256x128xi32>
    %cst_94 = arith.constant 0.000000e+00 : f32
    %238 = vector.broadcast %cst_94 : f32 to vector<256x128xf32>
    %239 = arith.select %237, %238, %216 : vector<256x128xi1>, vector<256x128xf32>
    %c63_i32_95 = arith.constant 63 : i32
    %240 = vector.broadcast %c63_i32_95 : i32 to vector<256x128xi32>
    %241 = arith.cmpi eq, %235, %240 : vector<256x128xi32>
    %cst_96 = arith.constant 0.000000e+00 : f32
    %242 = vector.broadcast %cst_96 : f32 to vector<256x128xf32>
    %243 = arith.select %241, %242, %218 : vector<256x128xi1>, vector<256x128xf32>
    %244 = tpu.concatenate %239, %213, %243 in 0 : vector<256x128xf32>, vector<256x128xf32>, vector<256x128xf32> -> vector<768x128xf32>
    %c0_97 = arith.constant 0 : index
    %c0_98 = arith.constant 0 : index
    %245 = vector.load %arg12[%c0_97, %c0_98] : memref<128x768xbf16, #tpu.memory_space<vmem>>, vector<128x768xbf16>
    %246 = arith.truncf %244 : vector<768x128xf32> to vector<768x128xbf16>
    %cst_99 = arith.constant dense<0.000000e+00> : vector<128x128xf32>
    %247 = tpu.matmul %245, %246, %cst_99 {dimension_numbers = #tpu.dot_dimension_numbers<[1], [0], [0], [1], [0, 0, 1, 1], [], []>} : vector<128x768xbf16>, vector<768x128xbf16>, vector<128x128xf32> -> vector<128x128xf32>
    %c0_100 = arith.constant 0 : index
    %c0_101 = arith.constant 0 : index
    %248 = vector.load %arg13[%c0_100, %c0_101] : memref<128x1xf32, #tpu.memory_space<vmem>>, vector<128x1xf32>
    %249 = vector.broadcast %248 : vector<128x1xf32> to vector<128x128xf32>
    %250 = arith.addf %247, %249 : vector<128x128xf32>
    %cst_102 = arith.constant 0.000000e+00 : f32
    %251 = vector.broadcast %cst_102 : f32 to vector<128x128xf32>
    %252 = arith.maximumf %250, %251 : vector<128x128xf32>
    %cst_103 = arith.constant 0.000000e+00 : f32
    %253 = vector.broadcast %cst_103 : f32 to vector<128x1xf32>
    %254 = vector.extract_strided_slice %252 {offsets = [0, 0], sizes = [128, 127], strides = [1, 1]} : vector<128x128xf32> to vector<128x127xf32>
    %255 = tpu.concatenate %253, %254 in 1 : vector<128x1xf32>, vector<128x127xf32> -> vector<128x128xf32>
    %256 = vector.extract_strided_slice %252 {offsets = [0, 1], sizes = [128, 127], strides = [1, 1]} : vector<128x128xf32> to vector<128x127xf32>
    %257 = tpu.concatenate %256, %253 in 1 : vector<128x127xf32>, vector<128x1xf32> -> vector<128x128xf32>
    %258 = tpu.iota {dimensions = array<i32: 1>} : vector<128x128xi32>
    %c64_i32_104 = arith.constant 64 : i32
    %c0_i32_105 = arith.constant 0 : i32
    %259 = arith.cmpi eq, %c64_i32_104, %c0_i32_105 : i32
    %c1_i32_106 = arith.constant 1 : i32
    %260 = arith.select %259, %c1_i32_106, %c64_i32_104 : i32
    %261 = vector.broadcast %260 : i32 to vector<128x128xi32>
    %262 = arith.remsi %258, %261 : vector<128x128xi32>
    %c0_i32_107 = arith.constant 0 : i32
    %263 = vector.broadcast %c0_i32_107 : i32 to vector<128x128xi32>
    %264 = arith.cmpi ne, %262, %263 : vector<128x128xi32>
    %c0_i32_108 = arith.constant 0 : i32
    %265 = vector.broadcast %c0_i32_108 : i32 to vector<128x128xi32>
    %266 = arith.cmpi slt, %262, %265 : vector<128x128xi32>
    %c0_i32_109 = arith.constant 0 : i32
    %267 = arith.cmpi slt, %260, %c0_i32_109 : i32
    %268 = vector.broadcast %267 : i1 to vector<128x128xi1>
    %269 = vector.broadcast %268 : vector<128x128xi1> to vector<128x128xi1>
    %270 = arith.xori %266, %269 : vector<128x128xi1>
    %271 = arith.andi %270, %264 : vector<128x128xi1>
    %272 = vector.broadcast %260 : i32 to vector<128x128xi32>
    %273 = arith.addi %262, %272 : vector<128x128xi32>
    %274 = arith.select %271, %273, %262 : vector<128x128xi1>, vector<128x128xi32>
    %c0_i32_110 = arith.constant 0 : i32
    %275 = vector.broadcast %c0_i32_110 : i32 to vector<128x128xi32>
    %276 = arith.cmpi eq, %274, %275 : vector<128x128xi32>
    %cst_111 = arith.constant 0.000000e+00 : f32
    %277 = vector.broadcast %cst_111 : f32 to vector<128x128xf32>
    %278 = arith.select %276, %277, %255 : vector<128x128xi1>, vector<128x128xf32>
    %c63_i32_112 = arith.constant 63 : i32
    %279 = vector.broadcast %c63_i32_112 : i32 to vector<128x128xi32>
    %280 = arith.cmpi eq, %274, %279 : vector<128x128xi32>
    %cst_113 = arith.constant 0.000000e+00 : f32
    %281 = vector.broadcast %cst_113 : f32 to vector<128x128xf32>
    %282 = arith.select %280, %281, %257 : vector<128x128xi1>, vector<128x128xf32>
    %283 = tpu.concatenate %278, %252, %282 in 0 : vector<128x128xf32>, vector<128x128xf32>, vector<128x128xf32> -> vector<384x128xf32>
    %c0_114 = arith.constant 0 : index
    %c0_115 = arith.constant 0 : index
    %284 = vector.load %arg14[%c0_114, %c0_115] : memref<128x384xbf16, #tpu.memory_space<vmem>>, vector<128x384xbf16>
    %285 = arith.truncf %283 : vector<384x128xf32> to vector<384x128xbf16>
    %cst_116 = arith.constant dense<0.000000e+00> : vector<128x128xf32>
    %286 = tpu.matmul %284, %285, %cst_116 {dimension_numbers = #tpu.dot_dimension_numbers<[1], [0], [0], [1], [0, 0, 1, 1], [], []>} : vector<128x384xbf16>, vector<384x128xbf16>, vector<128x128xf32> -> vector<128x128xf32>
    %c0_117 = arith.constant 0 : index
    %c0_118 = arith.constant 0 : index
    %287 = vector.load %arg15[%c0_117, %c0_118] : memref<128x1xf32, #tpu.memory_space<vmem>>, vector<128x1xf32>
    %288 = vector.broadcast %287 : vector<128x1xf32> to vector<128x128xf32>
    %289 = arith.addf %286, %288 : vector<128x128xf32>
    %cst_119 = arith.constant 0.000000e+00 : f32
    %290 = vector.broadcast %cst_119 : f32 to vector<128x128xf32>
    %291 = arith.maximumf %289, %290 : vector<128x128xf32>
    %c0_120 = arith.constant 0 : index
    %c0_121 = arith.constant 0 : index
    %292 = vector.load %arg16[%c0_120, %c0_121] : memref<64x128xbf16, #tpu.memory_space<vmem>>, vector<64x128xbf16>
    %293 = arith.truncf %291 : vector<128x128xf32> to vector<128x128xbf16>
    %cst_122 = arith.constant dense<0.000000e+00> : vector<64x128xf32>
    %294 = tpu.matmul %292, %293, %cst_122 {dimension_numbers = #tpu.dot_dimension_numbers<[1], [0], [0], [1], [0, 0, 1, 1], [], []>} : vector<64x128xbf16>, vector<128x128xbf16>, vector<64x128xf32> -> vector<64x128xf32>
    %c0_123 = arith.constant 0 : index
    %c0_124 = arith.constant 0 : index
    %295 = vector.load %arg17[%c0_123, %c0_124] : memref<64x1xf32, #tpu.memory_space<vmem>>, vector<64x1xf32>
    %296 = vector.broadcast %295 : vector<64x1xf32> to vector<64x128xf32>
    %297 = arith.addf %294, %296 : vector<64x128xf32>
    %cst_125 = arith.constant 0.000000e+00 : f32
    %298 = vector.broadcast %cst_125 : f32 to vector<64x128xf32>
    %299 = arith.maximumf %297, %298 : vector<64x128xf32>
    %c0_126 = arith.constant 0 : index
    %c0_127 = arith.constant 0 : index
    %300 = vector.load %arg18[%c0_126, %c0_127] : memref<8x64xbf16, #tpu.memory_space<vmem>>, vector<8x64xbf16>
    %301 = arith.truncf %299 : vector<64x128xf32> to vector<64x128xbf16>
    %cst_128 = arith.constant dense<0.000000e+00> : vector<8x128xf32>
    %302 = tpu.matmul %300, %301, %cst_128 {dimension_numbers = #tpu.dot_dimension_numbers<[1], [0], [0], [1], [0, 0, 1, 1], [], []>} : vector<8x64xbf16>, vector<64x128xbf16>, vector<8x128xf32> -> vector<8x128xf32>
    %c0_129 = arith.constant 0 : index
    %c0_130 = arith.constant 0 : index
    %303 = vector.load %arg19[%c0_129, %c0_130] : memref<8x1xf32, #tpu.memory_space<vmem>>, vector<8x1xf32>
    %304 = vector.broadcast %303 : vector<8x1xf32> to vector<8x128xf32>
    %305 = arith.addf %302, %304 : vector<8x128xf32>
    %c0_131 = arith.constant 0 : index
    %c0_132 = arith.constant 0 : index
    %306 = vector.load %arg20[%c0_131, %c0_132] : memref<8x128xf32, #tpu.memory_space<vmem>>, vector<8x128xf32>
    tpu.vector_store %arg20[%c0_131, %c0_132], %305 {strides = array<i32>} : memref<8x128xf32, #tpu.memory_space<vmem>>, vector<8x128xf32>,
    return
  }
}

</mosaic_0001>

<bundles_post_ra>
// kernel: basic_unet.1
= control target key start
LH: loop header
LB: loop body
LE: loop exit
PB: predicated region body
PF: predicated region fallthrough
CT: control target
= control target key end

     0   :  { %s9254_s24 = smov 1   ;;  %vm250_vm0 = vcmask 195584   ;;  %s9255_s26 = smov 127   ;;  %v9256_v2 = vmov 0   ;;  %v78_v19 = vlaneseq  ;;  %vm71_vm1 = vcmask 7168   ;;  %s12008_s0 = inlined_call_operand.vmem [shape: f32[8,128], index: 0, kind: input, shape index: {}]   ;;  %s12009_s1 = inlined_call_operand.vmem [shape: bf16[128,24], index: 1, kind: input, shape index: {}]   ;;  %s12010_s2 = inlined_call_operand.vmem [shape: f32[128,1], index: 2, kind: input, shape index: {}]   ;;  %s12011_s3 = inlined_call_operand.vmem [shape: bf16[128,384], index: 3, kind: input, shape index: {}]   ;;  %s12012_s4 = inlined_call_operand.vmem [shape: f32[128,1], index: 4, kind: input, shape index: {}]   ;;  %s12013_s5 = inlined_call_operand.vmem [shape: bf16[64,384], index: 5, kind: input, shape index: {}]   ;;  %s12014_s6 = inlined_call_operand.vmem [shape: f32[64,1], index: 6, kind: input, shape index: {}]   ;;  %s12015_s8 = inlined_call_operand.vmem [shape: f32[256,1], index: 8, kind: input, shape index: {}]   ;;  %s12016_s7 = inlined_call_operand.vmem [shape: bf16[256,192], index: 7, kind: input, shape index: {}]   ;;  %s12017_s10 = inlined_call_operand.vmem [shape: f32[256,1], index: 10, kind: input, shape index: {}]   ;;  %s12018_s9 = inlined_call_operand.vmem [shape: bf16[256,768], index: 9, kind: input, shape index: {}]   ;;  %s12019_s11 = inlined_call_operand.vmem [shape: bf16[64,128], index: 11, kind: input, shape index: {}]   ;;  %s12020_s13 = inlined_call_operand.vmem [shape: f32[128,1], index: 13, kind: input, shape index: {}]   ;;  %s12021_s12 = inlined_call_operand.vmem [shape: bf16[128,768], index: 12, kind: input, shape index: {}]   ;;  %s12022_s14 = inlined_call_operand.vmem [shape: bf16[128,384], index: 14, kind: input, shape index: {}]   ;;  %s12023_s15 = inlined_call_operand.vmem [shape: f32[128,1], index: 15, kind: input, shape index: {}]   ;;  %s12024_s17 = inlined_call_operand.vmem [shape: f32[64,1], index: 17, kind: input, shape index: {}]   ;;  %s12025_s19 = inlined_call_operand.vmem [shape: f32[8,1], index: 19, kind: input, shape index: {}]   ;;  %s12026_s16 = inlined_call_operand.vmem [shape: bf16[64,128], index: 16, kind: input, shape index: {}]   ;;  %s12027_s18 = inlined_call_operand.vmem [shape: bf16[8,64], index: 18, kind: input, shape index: {}]   ;;  %s12028_s20 = inlined_call_operand.vmem [shape: f32[8,128], index: 20, kind: output, shape index: {}]  }
   0x1   :  { %12037 = sst [smem:[#allocation19_spill]] %s12008_s0  ;;  %8272 = vset.pattern.permute.xlu1 %v9256_v2  ;;  %8273 = vset.pattern.permute.xlu0 %v9256_v2  ;;  %vm9257_vm3 = vmmov 1   ;;  %vm76_vm5 = vcmask 1039360   ;;  %vm275_vm7 = vcmask 1043456  }
   0x2   :  { %12038 = sst [smem:[#allocation20_spill]] %s12009_s1  ;;  %s12042_s23 = sld [smem:[#allocation19_spill]]  ;;  %v9426_v20 = vand.u32 127, %v78_v19 }
   0x3   :  { %12039 = sst [smem:[#allocation21_spill]] %s12010_s2 }
   0x4   :  { %12040 = sst [smem:[#allocation22_spill]] %s12011_s3  ;;  %s12043_s3 = sld [smem:[#allocation20_spill]]  ;;  %v84_v21 = vand.u32 63, %v9426_v20 }
   0x5   :  { %12041 = sst [smem:[#allocation23_spill]] %s12012_s4  ;;  %s12044_s4 = sld [smem:[#allocation21_spill]] }
   0x6   :  { %vm9429_vm2 = vcmp.ne.s32.totalorder %v84_v21, 0  ;;  %vm9436_vm6 = vcmp.eq.s32.totalorder %v84_v21, 63  ;;  %s12049_s28 = sld [smem:[#allocation22_spill]]  ;;  %s12050_s0 = sld [smem:[#allocation23_spill]] }
   0x7   :  { %vm6350_vm4 = vmpackc.low %vm9257_vm3, %vm9429_vm2 }
   0x8   :  { %v66_v0 = vld [vmem:[%s12042_s23] sm:$0xff]  ;;  %vm9566_vm8 = vmpackc.low %vm9429_vm2, %vm9429_vm2 }
   0x9   :  { %68 = vrot.lane.b32.xlu0 %v66_v0, %s9254_s24  ;;  %vm6425_vm9 = vmneg %vm9436_vm6 }
   0xa   :  { %v8894_v1 = vld [vmem:[%s12043_s3] sm:$0xff]   ;;  %v8895_v32 = vld [vmem:[%s12043_s3 + $0x8] sm:$0xff]   ;;  %v8896_v33 = vld [vmem:[%s12043_s3 + $0x10] sm:$0xff]  }
   0xb   :  { %8060 = vmatprep.mubr.msk.bf16.mxu0 %vm250_vm0, %v8894_v1  ;;  %v114_v3 = vld [vmem:[%s12044_s4] sm:$0xff]  ;;  %v116_v4 = vld [vmem:[%s12044_s4 + $0x10] sm:$0xff]  ;;  %v115_v5 = vld [vmem:[%s12044_s4 + $0x8] sm:$0xff] }
   0xc   :  { %132 = vperm.xlu1 %8272, %v114_v3   ;;  %v119_v6 = vld [vmem:[%s12044_s4 + $0x28] sm:$0xff]  ;;  %v117_v7 = vld [vmem:[%s12044_s4 + $0x18] sm:$0xff]  ;;  %v118_v9 = vld [vmem:[%s12044_s4 + $0x20] sm:$0xff] }
   0xd   :  { %73 = vrot.lane.b32.xlu0 %v66_v0, %s9255_s26  ;;  %v121_v8 = vld [vmem:[%s12044_s4 + $0x38] sm:$0xff]  ;;  %v123_v10 = vld [vmem:[%s12044_s4 + $0x48] sm:$0xff]  ;;  %v120_v11 = vld [vmem:[%s12044_s4 + $0x30] sm:$0xff] }
   0xe   :  { %v125_v12 = vld [vmem:[%s12044_s4 + $0x58] sm:$0xff]  ;;  %v122_v13 = vld [vmem:[%s12044_s4 + $0x40] sm:$0xff]  ;;  %v127_v14 = vld [vmem:[%s12044_s4 + $0x68] sm:$0xff] }
   0xf   :  { %v124_v15 = vld [vmem:[%s12044_s4 + $0x50] sm:$0xff]  ;;  %v129_v16 = vld [vmem:[%s12044_s4 + $0x78] sm:$0xff]  ;;  %v126_v17 = vld [vmem:[%s12044_s4 + $0x60] sm:$0xff] }
  0x10   :  { %137 = vperm.xlu1 %8272, %v115_v5   ;;  %v128_v18 = vld [vmem:[%s12044_s4 + $0x70] sm:$0xff]  ;;  %v8897_v34 = vld [vmem:[%s12043_s3 + $0x18] sm:$0xff]   ;;  %v8898_v35 = vld [vmem:[%s12043_s3 + $0x20] sm:$0xff]  }
  0x11   :  { %142 = vperm.xlu0 %8273, %v116_v4   ;;  %v8899_v36 = vld [vmem:[%s12043_s3 + $0x28] sm:$0xff]   ;;  %v8900_v37 = vld [vmem:[%s12043_s3 + $0x30] sm:$0xff]   ;;  %v8901_v38 = vld [vmem:[%s12043_s3 + $0x38] sm:$0xff]  }
  0x12   :  { %vm9608_vm10 = vmpackc.low %vm6425_vm9, %vm6425_vm9 }
  0x14   :  { %147 = vperm.xlu1 %8272, %v117_v7  }
  0x15   :  { %157 = vperm.xlu0 %8273, %v119_v6  }
  0x18   :  { %152 = vperm.xlu1 %8272, %v118_v9  }
  0x19   :  { %167 = vperm.xlu0 %8273, %v121_v8  }
  0x1c   :  { %162 = vperm.xlu1 %8272, %v120_v11  }
  0x1d   :  { %177 = vperm.xlu0 %8273, %v123_v10  }
  0x20   :  { %172 = vperm.xlu1 %8272, %v122_v13  }
  0x21   :  { %187 = vperm.xlu0 %8273, %v125_v12  }
  0x24   :  { %182 = vperm.xlu1 %8272, %v124_v15  }
  0x25   :  { %197 = vperm.xlu0 %8273, %v127_v14  }
  0x28   :  { %192 = vperm.xlu1 %8272, %v126_v17  }
  0x29   :  { %207 = vperm.xlu0 %8273, %v129_v16  }
  0x2c   :  { %202 = vperm.xlu1 %8272, %v128_v18  }
  0x7b   :  { %v69_v23 = vpop.permute.xlu0 %68 }
  0x7c   :  { %v72_v24 = vsel %vm71_vm1, 0.0, %v69_v23 }
  0x7d   :  { %v6351_v25 = vpack.c.bf16 %v66_v0, %v72_v24 }
  0x7f   :  { %8056 = vmatprep.subr.msk.bf16.mxu0 %vm6350_vm4, %v6351_v25  ;;  %v74_v27 = vpop.permute.xlu0 %73 }
  0x80   :  { %v77_v28 = vsel %vm76_vm5, %v74_v27, 0.0  ;;  %8057 = vmatpush3.bf16.msk.msra.mxu0 %vm6350_vm4, %v6351_v25 }
  0x81   :  { %v95_v29 = vsel %vm9436_vm6, 0.0, %v77_v28 }
  0x82   :  { %v113_v30 = vpack.c.bf16 %v95_v29, %v95_v29 }
  0x84   :  { %8264 = vmatprep.subr.msk.bf16.mxu0 %vm275_vm7, %v113_v30  ;;  %v277_v31 = vsel %vm275_vm7, %v113_v30, 0 }
  0x85   :  { %8059 = vmatpush3.bf16.msra.mxu0 %v277_v31 }
  0x88   :  { %8061 = vmatmul.mubr.msk.bf16.vlgmr.msra.gmra.mrb[0].mxu0 %vm250_vm0, %v8895_v32 }
  0x89   :  { %8064 = vmatprep.mubr.msk.bf16.mxu0 %vm250_vm0, %v8896_v33 }
  0x8b   :  { %v133_v39 = vpop.permute.xlu1 %132 }
  0x8f   :  { %v138_v40 = vpop.permute.xlu1 %137 }
  0x90   :  { %8065 = vmatmul.mubr.msk.bf16.gmra.mrb[4].mxu0 %vm250_vm0, %v8897_v34  ;;  %v143_v42 = vpop.permute.xlu0 %142 }
  0x91   :  { %8068 = vmatprep.mubr.msk.bf16.mxu0 %vm250_vm0, %v8898_v35 }
  0x93   :  { %v148_v41 = vpop.permute.xlu1 %147 }
  0x94   :  { %v158_v44 = vpop.permute.xlu0 %157 }
  0x97   :  { %v153_v43 = vpop.permute.xlu1 %152 }
  0x98   :  { %8069 = vmatmul.mubr.msk.bf16.gmra.mrb[8].mxu0 %vm250_vm0, %v8899_v36  ;;  %v168_v49 = vpop.permute.xlu0 %167 }
  0x99   :  { %8072 = vmatprep.mubr.msk.bf16.mxu0 %vm250_vm0, %v8900_v37 }
  0x9b   :  { %v163_v45 = vpop.permute.xlu1 %162 }
  0x9c   :  { %v178_v62 = vpop.permute.xlu0 %177 }
  0x9f   :  { %v173_v57 = vpop.permute.xlu1 %172 }
  0xa0   :  { %8073 = vmatmul.mubr.msk.bf16.gmra.mrb[12].mxu0 %vm250_vm0, %v8901_v38  ;;  %v188_v13 = vpop.permute.xlu0 %187 }
  0xa3   :  { %v183_v9 = vpop.permute.xlu1 %182 }
  0xa4   :  { %v198_v32 = vpop.permute.xlu0 %197 }
  0xa7   :  { %v193_v27 = vpop.permute.xlu1 %192 }
 0x15b   :  { %v8062_v46 = vpop.f32.mrb[0].mxu0 }
 0x15c   :  { %v322_v47 = vadd.f32 %v8062_v46, %v143_v42  ;;  %v313_v48 = vpop.f32.mrb[1].mxu0  ;;  %v208_v46 = vpop.permute.xlu0 %207 }
 0x15d   :  { %v314_v50 = vadd.f32 %v313_v48, %v133_v39  ;;  %v8063_v51 = vpop.f32.mrb[2].mxu0 }
 0x15e   :  { %v325_v52 = vadd.f32 %v8063_v51, %v148_v41  ;;  %v316_v53 = vpop.f32.mrb[3].mxu0  ;;  %v378_v55 = vmax.f32 %v322_v47, 0.0 }
 0x15f   :  { %v317_v54 = vadd.f32 %v316_v53, %v138_v40  ;;  %v376_v58 = vmax.f32 %v314_v50, 0.0  ;;  %v203_v40 = vpop.permute.xlu1 %202 }
 0x160   :  { %v379_v56 = vmax.f32 %v325_v52, 0.0 }
 0x161   :  { %v377_v59 = vmax.f32 %v317_v54, 0.0 }
 0x162   :  { %v9471_v60 = vpack.i.bf16 %v379_v56, %v378_v55  ;;  %v9473_v61 = vpack.c.bf16 %v379_v56, %v378_v55  ;;  %v8904_v56 = vld [vmem:[%s12049_s28 + $0x4] ss:$12 sps:$4 sm:$0xff]  }
 0x163   :  { %v8066_v63 = vpop.f32.mrb[4].mxu0  ;;  %v9475_v0 = vpack.i.bf16 %v377_v59, %v376_v58  ;;  %v608_v1 = vpack.c.bf16 %v377_v59, %v376_v58  ;;  %880 = vmatprep.mubr.bf16.mxu1 %v8904_v56 }
 0x164   :  { %v338_v3 = vadd.f32 %v8066_v63, %v163_v45  ;;  %v329_v4 = vpop.f32.mrb[5].mxu0  ;;  %8280 = vrot.lane.b32.xlu0 %v9471_v60, %s9254_s24  ;;  %v625_v63 = vld [vmem:[%s12050_s0 + $0x8] sm:$0xff] }
 0x165   :  { %v330_v5 = vadd.f32 %v329_v4, %v153_v43  ;;  %v8067_v6 = vpop.f32.mrb[6].mxu0  ;;  %8275 = vrot.lane.b32.xlu1 %v9475_v0, %s9254_s24  ;;  %7267 = vmatprep.subr.bf16.mxu1 %v608_v1  ;;  %v626_v1 = vld [vmem:[%s12050_s0 + $0x10] sm:$0xff]  ;;  %v628_v4 = vld [vmem:[%s12050_s0 + $0x20] sm:$0xff] }
 0x166   :  { %v341_v7 = vadd.f32 %v8067_v6, %v168_v49  ;;  %v332_v8 = vpop.f32.mrb[7].mxu0  ;;  %v382_v11 = vmax.f32 %v338_v3, 0.0  ;;  %v629_v3 = vld [vmem:[%s12050_s0 + $0x28] sm:$0xff]  ;;  %v631_v6 = vld [vmem:[%s12050_s0 + $0x38] sm:$0xff] }
 0x167   :  { %v333_v10 = vadd.f32 %v332_v8, %v158_v44  ;;  %v380_v14 = vmax.f32 %v330_v5, 0.0  ;;  %v8914_v5 = vld [vmem:[%s12049_s28 + $0x8] ss:$12 sps:$4 sm:$0xff]  }
 0x168   :  { %v383_v12 = vmax.f32 %v341_v7, 0.0  ;;  %8092 = vmatprep.mubr.bf16.mxu0 %v8914_v5  ;;  %v630_v7 = vld [vmem:[%s12050_s0 + $0x30] sm:$0xff]  ;;  %v633_v8 = vld [vmem:[%s12050_s0 + $0x48] sm:$0xff] }
 0x169   :  { %v381_v15 = vmax.f32 %v333_v10, 0.0  ;;  %v635_v10 = vld [vmem:[%s12050_s0 + $0x58] sm:$0xff] }
 0x16a   :  { %v8289_v16 = vpack.i.bf16 %v383_v12, %v382_v11  ;;  %v9481_v17 = vpack.c.bf16 %v383_v12, %v382_v11  ;;  %v634_v11 = vld [vmem:[%s12050_s0 + $0x50] sm:$0xff]  ;;  %v637_v12 = vld [vmem:[%s12050_s0 + $0x68] sm:$0xff] }
 0x16b   :  { %v8070_v18 = vpop.f32.mrb[8].mxu0  ;;  %v8284_v21 = vpack.i.bf16 %v381_v15, %v380_v14  ;;  %v9483_v23 = vpack.c.bf16 %v381_v15, %v380_v14  ;;  %v639_v14 = vld [vmem:[%s12050_s0 + $0x78] sm:$0xff]  ;;  %v638_v15 = vld [vmem:[%s12050_s0 + $0x70] sm:$0xff] }
 0x16c   :  { %v354_v24 = vadd.f32 %v8070_v18, %v183_v9  ;;  %v345_v25 = vpop.f32.mrb[9].mxu0  ;;  %8290 = vrot.lane.b32.xlu0 %v8289_v16, %s9254_s24  ;;  %v632_v9 = vld [vmem:[%s12050_s0 + $0x40] sm:$0xff] }
 0x16d   :  { %v346_v28 = vadd.f32 %v345_v25, %v173_v57  ;;  %v8071_v29 = vpop.f32.mrb[10].mxu0  ;;  %8285 = vrot.lane.b32.xlu1 %v8284_v21, %s9254_s24 }
 0x16e   :  { %v357_v30 = vadd.f32 %v8071_v29, %v188_v13  ;;  %v348_v31 = vpop.f32.mrb[11].mxu0  ;;  %v386_v34 = vmax.f32 %v354_v24, 0.0  ;;  %v636_v13 = vld [vmem:[%s12050_s0 + $0x60] sm:$0xff] }
 0x16f   :  { %v349_v33 = vadd.f32 %v348_v31, %v178_v62  ;;  %v384_v36 = vmax.f32 %v346_v28, 0.0  ;;  %v12051_v28 = vmov 0 }
 0x170   :  { %v387_v35 = vmax.f32 %v357_v30, 0.0  ;;  %v12052_v28 = vsel %vm9566_vm8, 4294967295, %v12051_v28 }
 0x171   :  { %v385_v37 = vmax.f32 %v349_v33, 0.0  ;;  %12053 = vst [vmem:[#allocation2_spill] sm:$0xff] %v12052_v28 }
 0x172   :  { %v8299_v38 = vpack.i.bf16 %v387_v35, %v386_v34  ;;  %v9487_v39 = vpack.c.bf16 %v387_v35, %v386_v34 }
 0x173   :  { %v8074_v41 = vpop.f32.mrb[12].mxu0  ;;  %v8294_v42 = vpack.i.bf16 %v385_v37, %v384_v36  ;;  %v9489_v43 = vpack.c.bf16 %v385_v37, %v384_v36 }
 0x174   :  { %v370_v44 = vadd.f32 %v8074_v41, %v203_v40  ;;  %v361_v45 = vpop.f32.mrb[13].mxu0  ;;  %8300 = vrot.lane.b32.xlu0 %v8299_v38, %s9254_s24 }
 0x175   :  { %v362_v47 = vadd.f32 %v361_v45, %v193_v27  ;;  %v8075_v48 = vpop.f32.mrb[14].mxu0  ;;  %8295 = vrot.lane.b32.xlu1 %v8294_v42, %s9254_s24 }
 0x176   :  { %v373_v49 = vadd.f32 %v8075_v48, %v208_v46  ;;  %v364_v50 = vpop.f32.mrb[15].mxu0  ;;  %v390_v52 = vmax.f32 %v370_v44, 0.0 }
 0x177   :  { %v365_v51 = vadd.f32 %v364_v50, %v198_v32  ;;  %v388_v54 = vmax.f32 %v362_v47, 0.0 }
 0x178   :  { %v391_v53 = vmax.f32 %v373_v49, 0.0 }
 0x179   :  { %v389_v55 = vmax.f32 %v365_v51, 0.0 }
 0x17a   :  { %v8309_v57 = vpack.i.bf16 %v391_v53, %v390_v52  ;;  %v9496_v58 = vpack.c.bf16 %v391_v53, %v390_v52 }
 0x17b   :  { %v8304_v59 = vpack.i.bf16 %v389_v55, %v388_v54  ;;  %v9498_v62 = vpack.c.bf16 %v389_v55, %v388_v54 }
 0x17c   :  { %8310 = vrot.lane.b32.xlu0 %v8309_v57, %s9254_s24 }
 0x17d   :  { %8305 = vrot.lane.b32.xlu1 %v8304_v59, %s9254_s24 }
 0x180   :  { %8320 = vrot.lane.b32.xlu0 %v9471_v60, %s9255_s26  ;;  %v624_v60 = vld [vmem:[%s12050_s0] sm:$0xff] }
 0x181   :  { %8315 = vrot.lane.b32.xlu1 %v9475_v0, %s9255_s26  ;;  %v627_v0 = vld [vmem:[%s12050_s0 + $0x18] sm:$0xff] }
 0x184   :  { %8330 = vrot.lane.b32.xlu0 %v8289_v16, %s9255_s26 }
 0x185   :  { %8325 = vrot.lane.b32.xlu1 %v8284_v21, %s9255_s26 }
 0x188   :  { %8340 = vrot.lane.b32.xlu0 %v8299_v38, %s9255_s26 }
 0x189   :  { %8335 = vrot.lane.b32.xlu1 %v8294_v42, %s9255_s26 }
 0x18c   :  { %8350 = vrot.lane.b32.xlu0 %v8309_v57, %s9255_s26 }
 0x18d   :  { %8345 = vrot.lane.b32.xlu1 %v8304_v59, %s9255_s26 }
 0x190   :  { %647 = vperm.xlu0 %8273, %v625_v63  }
 0x191   :  { %642 = vperm.xlu1 %8272, %v624_v60  }
 0x194   :  { %657 = vperm.xlu0 %8273, %v627_v0  }
 0x195   :  { %652 = vperm.xlu1 %8272, %v626_v1  }
 0x198   :  { %667 = vperm.xlu0 %8273, %v629_v3  }
 0x199   :  { %662 = vperm.xlu1 %8272, %v628_v4  }
 0x19c   :  { %677 = vperm.xlu0 %8273, %v631_v6  }
 0x19d   :  { %672 = vperm.xlu1 %8272, %v630_v7  }
 0x1a0   :  { %687 = vperm.xlu0 %8273, %v633_v8  }
 0x1a1   :  { %682 = vperm.xlu1 %8272, %v632_v9  }
 0x1a4   :  { %697 = vperm.xlu0 %8273, %v635_v10  }
 0x1a5   :  { %692 = vperm.xlu1 %8272, %v634_v11  }
 0x1a8   :  { %707 = vperm.xlu0 %8273, %v637_v12   ;;  %v12054_v12 = vmov 0 }
 0x1a9   :  { %702 = vperm.xlu1 %8272, %v636_v13   ;;  %v12055_v12 = vsel %vm9608_vm10, 4294967295, %v12054_v12 }
 0x1aa   :  { %12056 = vst [vmem:[#allocation3_spill] sm:$0xff] %v12055_v12 }
 0x1ac   :  { %717 = vperm.xlu0 %8273, %v639_v14  }
 0x1ad   :  { %712 = vperm.xlu1 %8272, %v638_v15  }
 0x1d6   :  { %v8281_v16 = vpop.permute.xlu0 %8280 }
 0x1d7   :  { %v8276_v18 = vpop.permute.xlu1 %8275  ;;  %v8283_v21 = vunpack.i.h.bf16 %v8281_v16  ;;  %v8282_v24 = vunpack.i.l.bf16 %v8281_v16 }
 0x1d8   :  { %v8278_v25 = vunpack.i.h.bf16 %v8276_v18  ;;  %v8277_v27 = vunpack.i.l.bf16 %v8276_v18 }
 0x1d9   :  { %v459_v32 = vsel %vm71_vm1, 0.0, %v8283_v21  ;;  %v458_v33 = vsel %vm71_vm1, 0.0, %v8282_v24 }
 0x1da   :  { %v456_v29 = vsel %vm71_vm1, 0.0, %v8277_v27  ;;  %v457_v30 = vsel %vm71_vm1, 0.0, %v8278_v25  ;;  %v6393_v34 = vpack.c.bf16 %v459_v32, %v458_v33  ;;  %v8902_v27 = vld [vmem:[%s12049_s28] ss:$12 sps:$4 sm:$0xff]  }
 0x1db   :  { %v6388_v31 = vpack.c.bf16 %v457_v30, %v456_v29 }
 0x1dd   :  { %7268 = vmatpush3.bf16.msk.msra.mxu1 %vm9566_vm8, %v6388_v31 }
 0x1de   :  { %7269 = vmatprep.subr.bf16.mxu1 %v9473_v61  ;;  %v8291_v22 = vpop.permute.xlu0 %8290 }
 0x1df   :  { %v8286_v35 = vpop.permute.xlu1 %8285  ;;  %v8293_v36 = vunpack.i.h.bf16 %v8291_v22  ;;  %v8292_v37 = vunpack.i.l.bf16 %v8291_v22 }
 0x1e0   :  { %v8288_v38 = vunpack.i.h.bf16 %v8286_v35  ;;  %v8287_v40 = vunpack.i.l.bf16 %v8286_v35 }
 0x1e1   :  { %7270 = vmatpush3.bf16.msk.msra.mxu1 %vm9566_vm8, %v6393_v34  ;;  %v463_v45 = vsel %vm71_vm1, 0.0, %v8293_v36  ;;  %v462_v61 = vsel %vm71_vm1, 0.0, %v8292_v37 }
 0x1e2   :  { %v461_v41 = vsel %vm71_vm1, 0.0, %v8288_v38  ;;  %v460_v42 = vsel %vm71_vm1, 0.0, %v8287_v40  ;;  %7271 = vmatprep.subr.bf16.mxu1 %v9483_v23  ;;  %v6403_v47 = vpack.c.bf16 %v463_v45, %v462_v61 }
 0x1e3   :  { %v6398_v44 = vpack.c.bf16 %v461_v41, %v460_v42  ;;  %v8907_v41 = vld [vmem:[%s12049_s28 + $0x18] ss:$12 sps:$4 sm:$0xff]  }
 0x1e5   :  { %7272 = vmatpush3.bf16.msk.msra.mxu1 %vm9566_vm8, %v6398_v44  ;;  %v8908_v44 = vld [vmem:[%s12049_s28 + $0x34] ss:$12 sps:$4 sm:$0xff]  }
 0x1e6   :  { %v8301_v46 = vpop.permute.xlu0 %8300  ;;  %7273 = vmatprep.subr.bf16.mxu1 %v9481_v17 }
 0x1e7   :  { %v8296_v48 = vpop.permute.xlu1 %8295  ;;  %v8303_v49 = vunpack.i.h.bf16 %v8301_v46  ;;  %v8302_v50 = vunpack.i.l.bf16 %v8301_v46 }
 0x1e8   :  { %v8298_v51 = vunpack.i.h.bf16 %v8296_v48  ;;  %v8297_v52 = vunpack.i.l.bf16 %v8296_v48 }
 0x1e9   :  { %7274 = vmatpush3.bf16.msk.msra.mxu1 %vm9566_vm8, %v6403_v47  ;;  %v467_v55 = vsel %vm71_vm1, 0.0, %v8303_v49  ;;  %v466_v17 = vsel %vm71_vm1, 0.0, %v8302_v50 }
 0x1ea   :  { %v465_v23 = vsel %vm71_vm1, 0.0, %v8298_v51  ;;  %v464_v53 = vsel %vm71_vm1, 0.0, %v8297_v52  ;;  %7275 = vmatprep.subr.bf16.mxu1 %v9489_v43  ;;  %v6413_v57 = vpack.c.bf16 %v467_v55, %v466_v17  ;;  %v8911_v17 = vld [vmem:[%s12049_s28 + $0x4c] ss:$12 sps:$4 sm:$0xff]  }
 0x1eb   :  { %v6408_v54 = vpack.c.bf16 %v465_v23, %v464_v53 }
 0x1ed   :  { %7276 = vmatpush3.bf16.msk.msra.mxu1 %vm9566_vm8, %v6408_v54  ;;  %v8910_v54 = vld [vmem:[%s12049_s28 + $0x30] ss:$12 sps:$4 sm:$0xff]  }
 0x1ee   :  { %v8311_v56 = vpop.permute.xlu0 %8310  ;;  %7277 = vmatprep.subr.bf16.mxu1 %v9487_v39 }
 0x1ef   :  { %v8306_v59 = vpop.permute.xlu1 %8305  ;;  %v8313_v63 = vunpack.i.h.bf16 %v8311_v56  ;;  %v8312_v60 = vunpack.i.l.bf16 %v8311_v56 }
 0x1f0   :  { %v8308_v0 = vunpack.i.h.bf16 %v8306_v59  ;;  %v8307_v1 = vunpack.i.l.bf16 %v8306_v59 }
 0x1f1   :  { %7278 = vmatpush3.bf16.msk.msra.mxu1 %vm9566_vm8, %v6413_v57  ;;  %v471_v8 = vsel %vm71_vm1, 0.0, %v8313_v63  ;;  %v470_v9 = vsel %vm71_vm1, 0.0, %v8312_v60 }
 0x1f2   :  { %v469_v43 = vsel %vm71_vm1, 0.0, %v8308_v0  ;;  %v468_v3 = vsel %vm71_vm1, 0.0, %v8307_v1  ;;  %v8321_v4 = vpop.permute.xlu0 %8320  ;;  %7279 = vmatprep.subr.bf16.mxu1 %v9498_v62  ;;  %v6423_v15 = vpack.c.bf16 %v471_v8, %v470_v9  ;;  %v8920_v8 = vld [vmem:[%s12049_s28 + $0x50] ss:$12 sps:$4 sm:$0xff]   ;;  %v8924_v9 = vld [vmem:[%s12049_s28 + $0x68] ss:$12 sps:$4 sm:$0xff]  }
 0x1f3   :  { %v6418_v39 = vpack.c.bf16 %v469_v43, %v468_v3  ;;  %v8323_v5 = vunpack.i.h.bf16 %v8321_v4  ;;  %v8322_v6 = vunpack.i.l.bf16 %v8321_v4  ;;  %v8316_v7 = vpop.permute.xlu1 %8315  ;;  %v8913_v43 = vld [vmem:[%s12049_s28 + $0x48] ss:$12 sps:$4 sm:$0xff]   ;;  %v8916_v4 = vld [vmem:[%s12049_s28 + $0x64] ss:$12 sps:$4 sm:$0xff]  }
 0x1f4   :  { %v8318_v10 = vunpack.i.h.bf16 %v8316_v7  ;;  %v8317_v11 = vunpack.i.l.bf16 %v8316_v7  ;;  %v8921_v7 = vld [vmem:[%s12049_s28 + $0x7c] ss:$12 sps:$4 sm:$0xff]  }
 0x1f5   :  { %7280 = vmatpush3.bf16.msk.msra.mxu1 %vm9566_vm8, %v6418_v39  ;;  %v523_v26 = vsel %vm76_vm5, %v8323_v5, 0.0  ;;  %v522_v62 = vsel %vm76_vm5, %v8322_v6, 0.0  ;;  %v8915_v39 = vld [vmem:[%s12049_s28 + $0x20] ss:$12 sps:$4 sm:$0xff]   ;;  %v8919_v5 = vld [vmem:[%s12049_s28 + $0x38] ss:$12 sps:$4 sm:$0xff]  }
 0x1f6   :  { %v521_v13 = vsel %vm76_vm5, %v8318_v10, 0.0  ;;  %v520_v14 = vsel %vm76_vm5, %v8317_v11, 0.0  ;;  %7281 = vmatprep.subr.bf16.mxu1 %v9496_v58  ;;  %v8331_v18 = vpop.permute.xlu0 %8330  ;;  %v6433_v29 = vpack.c.bf16 %v523_v26, %v522_v62  ;;  %v8905_v58 = vld [vmem:[%s12049_s28 + $0x1c] ss:$12 sps:$4 sm:$0xff]   ;;  %v8918_v6 = vld [vmem:[%s12049_s28 + $0x60] ss:$12 sps:$4 sm:$0xff]  }
 0x1f7   :  { %v6428_v16 = vpack.c.bf16 %v521_v13, %v520_v14  ;;  %v8326_v21 = vpop.permute.xlu1 %8325  ;;  %v8333_v30 = vunpack.i.h.bf16 %v8331_v18  ;;  %v8332_v31 = vunpack.i.l.bf16 %v8331_v18  ;;  %v8923_v10 = vld [vmem:[%s12049_s28 + $0x78] ss:$12 sps:$4 sm:$0xff]   ;;  %v8926_v11 = vld [vmem:[%s12049_s28 + $0x94] ss:$12 sps:$4 sm:$0xff]   ;;  %v8928_v13 = vld [vmem:[%s12049_s28 + $0x90] ss:$12 sps:$4 sm:$0xff]  }
 0x1f8   :  { %v8328_v24 = vunpack.i.h.bf16 %v8326_v21  ;;  %v8327_v25 = vunpack.i.l.bf16 %v8326_v21  ;;  %v8925_v26 = vld [vmem:[%s12049_s28 + $0x80] ss:$12 sps:$4 sm:$0xff]   ;;  %v8929_v62 = vld [vmem:[%s12049_s28 + $0x98] ss:$12 sps:$4 sm:$0xff]  }
 0x1f9   :  { %7282 = vmatpush3.bf16.msk.msra.mxu1 %vm9566_vm8, %v6423_v15  ;;  %8076 = vmatprep.subr.msk.bf16.mxu0 %vm9608_vm10, %v6428_v16  ;;  %v527_v35 = vsel %vm76_vm5, %v8333_v30, 0.0  ;;  %v526_v36 = vsel %vm76_vm5, %v8332_v31, 0.0  ;;  %v8931_v14 = vld [vmem:[%s12049_s28 + $0xac] ss:$12 sps:$4 sm:$0xff]   ;;  %v8930_v15 = vld [vmem:[%s12049_s28 + $0xb0] ss:$12 sps:$4 sm:$0xff]  }
 0x1fa   :  { %v525_v32 = vsel %vm76_vm5, %v8328_v24, 0.0  ;;  %v524_v33 = vsel %vm76_vm5, %v8327_v25, 0.0  ;;  %8077 = vmatpush3.bf16.msk.msra.mxu0 %vm9608_vm10, %v6428_v16  ;;  %v8341_v40 = vpop.permute.xlu0 %8340  ;;  %v6443_v42 = vpack.c.bf16 %v527_v35, %v526_v36  ;;  %v8933_v16 = vld [vmem:[%s12049_s28 + $0xa8] ss:$12 sps:$4 sm:$0xff]  }
 0x1fb   :  { %v8336_v22 = vpop.permute.xlu1 %8335  ;;  %8078 = vmatprep.subr.msk.bf16.mxu0 %vm9608_vm10, %v6433_v29  ;;  %v6438_v34 = vpack.c.bf16 %v525_v32, %v524_v33  ;;  %v8343_v45 = vunpack.i.h.bf16 %v8341_v40  ;;  %v8342_v61 = vunpack.i.l.bf16 %v8341_v40 }
 0x1fc   :  { %881 = vmatmul.mubr.bf16.vlgmr.msra.gmra.mrb[0].mxu1 %v8902_v27  ;;  %v8338_v37 = vunpack.i.h.bf16 %v8336_v22  ;;  %v8337_v38 = vunpack.i.l.bf16 %v8336_v22 }
 0x1fd   :  { %888 = vmatprep.mubr.bf16.mxu1 %v8905_v58  ;;  %v531_v50 = vsel %vm76_vm5, %v8343_v45, 0.0  ;;  %v530_v51 = vsel %vm76_vm5, %v8342_v61, 0.0 }
 0x1fe   :  { %8079 = vmatpush3.bf16.msk.msra.mxu0 %vm9608_vm10, %v6433_v29  ;;  %v529_v46 = vsel %vm76_vm5, %v8338_v37, 0.0  ;;  %v528_v47 = vsel %vm76_vm5, %v8337_v38, 0.0  ;;  %v8351_v53 = vpop.permute.xlu0 %8350  ;;  %v6453_v55 = vpack.c.bf16 %v531_v50, %v530_v51 }
 0x1ff   :  { %8080 = vmatprep.subr.msk.bf16.mxu0 %vm9608_vm10, %v6438_v34  ;;  %v8346_v48 = vpop.permute.xlu1 %8345  ;;  %v6448_v49 = vpack.c.bf16 %v529_v46, %v528_v47  ;;  %v8353_v56 = vunpack.i.h.bf16 %v8351_v53  ;;  %v8352_v57 = vunpack.i.l.bf16 %v8351_v53 }
 0x200   :  { %v8348_v52 = vunpack.i.h.bf16 %v8346_v48  ;;  %v8347_v23 = vunpack.i.l.bf16 %v8346_v48 }
 0x201   :  { %v535_v0 = vsel %vm76_vm5, %v8353_v56, 0.0  ;;  %v534_v1 = vsel %vm76_vm5, %v8352_v57, 0.0 }
 0x202   :  { %8081 = vmatpush3.bf16.msk.msra.mxu0 %vm9608_vm10, %v6438_v34  ;;  %v533_v59 = vsel %vm76_vm5, %v8348_v52, 0.0  ;;  %v532_v63 = vsel %vm76_vm5, %v8347_v23, 0.0  ;;  %v6463_v3 = vpack.c.bf16 %v535_v0, %v534_v1 }
 0x203   :  { %8082 = vmatprep.subr.msk.bf16.mxu0 %vm9608_vm10, %v6443_v42  ;;  %v6458_v60 = vpack.c.bf16 %v533_v59, %v532_v63 }
 0x204   :  { %889 = vmatmul.mubr.bf16.gmra.mrb[4].mxu1 %v8907_v41 }
 0x205   :  { %896 = vmatprep.mubr.bf16.mxu1 %v8908_v44 }
 0x206   :  { %8083 = vmatpush3.bf16.msk.msra.mxu0 %vm9608_vm10, %v6443_v42 }
 0x207   :  { %8084 = vmatprep.subr.msk.bf16.mxu0 %vm9608_vm10, %v6448_v49 }
 0x20a   :  { %8085 = vmatpush3.bf16.msk.msra.mxu0 %vm9608_vm10, %v6448_v49 }
 0x20b   :  { %8086 = vmatprep.subr.msk.bf16.mxu0 %vm9608_vm10, %v6453_v55 }
 0x20c   :  { %897 = vmatmul.mubr.bf16.gmra.mrb[8].mxu1 %v8910_v54 }
 0x20d   :  { %904 = vmatprep.mubr.bf16.mxu1 %v8911_v17 }
 0x20e   :  { %8087 = vmatpush3.bf16.msk.msra.mxu0 %vm9608_vm10, %v6453_v55 }
 0x20f   :  { %8088 = vmatprep.subr.msk.bf16.mxu0 %vm9608_vm10, %v6458_v60  ;;  %v648_v35 = vpop.permute.xlu0 %647 }
 0x210   :  { %v643_v34 = vpop.permute.xlu1 %642 }
 0x212   :  { %8089 = vmatpush3.bf16.msk.msra.mxu0 %vm9608_vm10, %v6458_v60 }
 0x213   :  { %8090 = vmatprep.subr.msk.bf16.mxu0 %vm9608_vm10, %v6463_v3  ;;  %v658_v45 = vpop.permute.xlu0 %657 }
 0x214   :  { %905 = vmatmul.mubr.bf16.gmra.mrb[12].mxu1 %v8913_v43  ;;  %v653_v41 = vpop.permute.xlu1 %652 }
 0x215   :  { %912 = vmatprep.mubr.bf16.mxu1 %v8916_v4 }
 0x216   :  { %8091 = vmatpush3.bf16.msk.msra.mxu0 %vm9608_vm10, %v6463_v3 }
 0x217   :  { %v668_v50 = vpop.permute.xlu0 %667 }
 0x218   :  { %v663_v46 = vpop.permute.xlu1 %662 }
 0x219   :  { %8093 = vmatmul.mubr.bf16.vlgmr.msra.gmra.mrb[16].mxu0 %v8915_v39 }
 0x21a   :  { %8096 = vmatprep.mubr.bf16.mxu0 %v8919_v5 }
 0x21b   :  { %v678_v3 = vpop.permute.xlu0 %677 }
 0x21c   :  { %913 = vmatmul.mubr.bf16.gmra.mrb[16].mxu1 %v8918_v6  ;;  %v673_v57 = vpop.permute.xlu1 %672 }
 0x21d   :  { %920 = vmatprep.mubr.bf16.mxu1 %v8921_v7 }
 0x221   :  { %8097 = vmatmul.mubr.bf16.gmra.mrb[20].mxu0 %v8920_v8 }
 0x222   :  { %8100 = vmatprep.mubr.bf16.mxu0 %v8924_v9 }
 0x224   :  { %921 = vmatmul.mubr.bf16.gmra.mrb[20].mxu1 %v8923_v10 }
 0x225   :  { %928 = vmatprep.mubr.bf16.mxu1 %v8926_v11 }
 0x229   :  { %8101 = vmatmul.mubr.bf16.gmra.mrb[24].mxu0 %v8925_v26 }
 0x22a   :  { %8104 = vmatprep.mubr.bf16.mxu0 %v8929_v62 }
 0x22c   :  { %929 = vmatmul.mubr.bf16.gmra.mrb[24].mxu1 %v8928_v13 }
 0x22d   :  { %936 = vmatprep.mubr.bf16.mxu1 %v8931_v14 }
 0x231   :  { %8105 = vmatmul.mubr.bf16.gmra.mrb[28].mxu0 %v8930_v15  ;;  %v683_v15 = vpop.permute.xlu1 %682 }
 0x234   :  { %937 = vmatmul.mubr.bf16.gmra.mrb[28].mxu1 %v8933_v16 }
 0x2cf   :  { %v7283_v18 = vpop.f32.mrb[0].mxu1 }
 0x2d0   :  { %v7284_v21 = vpop.f32.mrb[1].mxu1 }
 0x2d1   :  { %v7285_v24 = vadd.f32 %v7284_v21, %v7283_v18  ;;  %v7286_v25 = vpop.f32.mrb[2].mxu1 }
 0x2d2   :  { %v7287_v27 = vpop.f32.mrb[3].mxu1 }
 0x2d3   :  { %v7288_v29 = vadd.f32 %v7287_v27, %v7286_v25  ;;  %v883_v54 = vadd.f32 %v7285_v24, %v643_v34 }
 0x2d5   :  { %v886_v60 = vadd.f32 %v7288_v29, %v648_v35 }
 0x2d7   :  { %v7289_v58 = vpop.f32.mrb[4].mxu1 }
 0x2d8   :  { %v7290_v30 = vpop.f32.mrb[5].mxu1 }
 0x2d9   :  { %v7291_v31 = vadd.f32 %v7290_v30, %v7289_v58  ;;  %v7292_v32 = vpop.f32.mrb[6].mxu1  ;;  %v688_v58 = vpop.permute.xlu0 %687 }
 0x2da   :  { %v7293_v33 = vpop.f32.mrb[7].mxu1 }
 0x2db   :  { %v7294_v22 = vadd.f32 %v7293_v33, %v7292_v32  ;;  %v891_v52 = vadd.f32 %v7291_v31, %v653_v41 }
 0x2dd   :  { %v894_v55 = vadd.f32 %v7294_v22, %v658_v45 }
 0x2df   :  { %v7295_v36 = vpop.f32.mrb[8].mxu1 }
 0x2e0   :  { %v7296_v37 = vpop.f32.mrb[9].mxu1 }
 0x2e1   :  { %v7297_v38 = vadd.f32 %v7296_v37, %v7295_v36  ;;  %v7298_v40 = vpop.f32.mrb[10].mxu1 }
 0x2e2   :  { %v7299_v42 = vpop.f32.mrb[11].mxu1 }
 0x2e3   :  { %v7300_v44 = vadd.f32 %v7299_v42, %v7298_v40  ;;  %v899_v9 = vadd.f32 %v7297_v38, %v663_v46  ;;  %v693_v42 = vpop.permute.xlu1 %692 }
 0x2e5   :  { %v902_v30 = vadd.f32 %v7300_v44, %v668_v50  ;;  %v698_v50 = vpop.permute.xlu0 %697 }
 0x2e7   :  { %v7301_v61 = vpop.f32.mrb[12].mxu1 }
 0x2e8   :  { %v7302_v47 = vpop.f32.mrb[13].mxu1 }
 0x2e9   :  { %v7303_v48 = vadd.f32 %v7302_v47, %v7301_v61  ;;  %v7304_v49 = vpop.f32.mrb[14].mxu1 }
 0x2ea   :  { %v7305_v51 = vpop.f32.mrb[15].mxu1 }
 0x2eb   :  { %v7306_v23 = vadd.f32 %v7305_v51, %v7304_v49  ;;  %v907_v62 = vadd.f32 %v7303_v48, %v673_v57 }
 0x2ec   :  { %v8094_v53 = vpop.f32.mrb[16].mxu0 }
 0x2ed   :  { %v988_v17 = vadd.f32 %v8094_v53, %v891_v52  ;;  %v979_v56 = vpop.f32.mrb[17].mxu0  ;;  %v910_v25 = vadd.f32 %v7306_v23, %v678_v3 }
 0x2ee   :  { %v980_v59 = vadd.f32 %v979_v56, %v883_v54  ;;  %v8095_v63 = vpop.f32.mrb[18].mxu0 }
 0x2ef   :  { %v991_v0 = vadd.f32 %v8095_v63, %v894_v55  ;;  %v7307_v1 = vpop.f32.mrb[16].mxu1  ;;  %v982_v43 = vpop.f32.mrb[19].mxu0  ;;  %v1044_v5 = vmax.f32 %v988_v17, 0.0 }
 0x2f0   :  { %v983_v4 = vadd.f32 %v982_v43, %v886_v60  ;;  %v7308_v39 = vpop.f32.mrb[17].mxu1  ;;  %v1042_v10 = vmax.f32 %v980_v59, 0.0 }
 0x2f1   :  { %v1045_v6 = vmax.f32 %v991_v0, 0.0  ;;  %v7309_v7 = vadd.f32 %v7308_v39, %v7307_v1  ;;  %v7310_v8 = vpop.f32.mrb[18].mxu1 }
 0x2f2   :  { %v1043_v11 = vmax.f32 %v983_v4, 0.0  ;;  %v7311_v26 = vpop.f32.mrb[19].mxu1 }
 0x2f3   :  { %v7312_v13 = vadd.f32 %v7311_v26, %v7310_v8  ;;  %v9729_v14 = vpack.i.bf16 %v1045_v6, %v1044_v5  ;;  %v9731_v24 = vpack.c.bf16 %v1045_v6, %v1044_v5  ;;  %v915_v47 = vadd.f32 %v7309_v7, %v683_v15  ;;  %v703_v6 = vpop.permute.xlu1 %702 }
 0x2f4   :  { %v8098_v16 = vpop.f32.mrb[20].mxu0  ;;  %v8354_v18 = vpack.i.bf16 %v1043_v11, %v1042_v10  ;;  %v1258_v21 = vpack.c.bf16 %v1043_v11, %v1042_v10 }
 0x2f5   :  { %v1004_v27 = vadd.f32 %v8098_v16, %v907_v62  ;;  %v995_v29 = vpop.f32.mrb[21].mxu0  ;;  %8360 = vrot.lane.b32.xlu0 %v9729_v14, %s9254_s24  ;;  %v918_v59 = vadd.f32 %v7312_v13, %v688_v58  ;;  %v708_v62 = vpop.permute.xlu0 %707 }
 0x2f6   :  { %v996_v31 = vadd.f32 %v995_v29, %v899_v9  ;;  %v8099_v32 = vpop.f32.mrb[22].mxu0  ;;  %8355 = vrot.lane.b32.xlu1 %v8354_v18, %s9254_s24  ;;  %7347 = vmatprep.subr.bf16.mxu0 %v1258_v21 }
 0x2f7   :  { %v1007_v33 = vadd.f32 %v8099_v32, %v910_v25  ;;  %v7313_v22 = vpop.f32.mrb[20].mxu1  ;;  %v998_v34 = vpop.f32.mrb[23].mxu0  ;;  %v1048_v37 = vmax.f32 %v1004_v27, 0.0 }
 0x2f8   :  { %v999_v35 = vadd.f32 %v998_v34, %v902_v30  ;;  %v7314_v36 = vpop.f32.mrb[21].mxu1  ;;  %v1046_v45 = vmax.f32 %v996_v31, 0.0  ;;  %v713_v34 = vpop.permute.xlu1 %712 }
 0x2f9   :  { %v1049_v38 = vmax.f32 %v1007_v33, 0.0  ;;  %v7315_v40 = vadd.f32 %v7314_v36, %v7313_v22  ;;  %v7316_v41 = vpop.f32.mrb[22].mxu1 }
 0x2fa   :  { %v1047_v61 = vmax.f32 %v999_v35, 0.0  ;;  %v7317_v46 = vpop.f32.mrb[23].mxu1 }
 0x2fb   :  { %v7318_v44 = vadd.f32 %v7317_v46, %v7316_v41  ;;  %v923_v48 = vadd.f32 %v7315_v40, %v693_v42  ;;  %v8369_v49 = vpack.i.bf16 %v1049_v38, %v1048_v37  ;;  %v9738_v53 = vpack.c.bf16 %v1049_v38, %v1048_v37  ;;  %v718_v40 = vpop.permute.xlu0 %717  ;;  %v8936_v46 = vld [vmem:[%s12013_s5 + $0x4] ss:$12 sps:$4 sm:$0xff]  }
 0x2fc   :  { %v8102_v51 = vpop.f32.mrb[24].mxu0  ;;  %v8364_v52 = vpack.i.bf16 %v1047_v61, %v1046_v45  ;;  %v9736_v23 = vpack.c.bf16 %v1047_v61, %v1046_v45  ;;  %1418 = vmatprep.mubr.bf16.mxu0 %v8936_v46 }
 0x2fd   :  { %v1020_v54 = vadd.f32 %v8102_v51, %v923_v48  ;;  %v1011_v55 = vpop.f32.mrb[25].mxu0  ;;  %8370 = vrot.lane.b32.xlu0 %v8369_v49, %s9254_s24  ;;  %v926_v17 = vadd.f32 %v7318_v44, %v698_v50 }
 0x2fe   :  { %v1012_v56 = vadd.f32 %v1011_v55, %v915_v47  ;;  %v8103_v57 = vpop.f32.mrb[26].mxu0  ;;  %8365 = vrot.lane.b32.xlu1 %v8364_v52, %s9254_s24  ;;  %v1274_v55 = vld [vmem:[%s12014_s6] sm:$0xff] }
 0x2ff   :  { %v1023_v63 = vadd.f32 %v8103_v57, %v926_v17  ;;  %v7319_v60 = vpop.f32.mrb[24].mxu1  ;;  %v1014_v0 = vpop.f32.mrb[27].mxu0  ;;  %v1052_v3 = vmax.f32 %v1020_v54, 0.0  ;;  %v1279_v54 = vld [vmem:[%s12014_s6 + $0x28] sm:$0xff]  ;;  %v1276_v57 = vld [vmem:[%s12014_s6 + $0x10] sm:$0xff] }
 0x300   :  { %v1015_v1 = vadd.f32 %v1014_v0, %v918_v59  ;;  %v7320_v43 = vpop.f32.mrb[25].mxu1  ;;  %v1050_v7 = vmax.f32 %v1012_v56, 0.0  ;;  %v8942_v17 = vld [vmem:[%s12013_s5 + $0x8] ss:$12 sps:$4 sm:$0xff]   ;;  %v1281_v56 = vld [vmem:[%s12014_s6 + $0x38] sm:$0xff]  ;;  %v1278_v59 = vld [vmem:[%s12014_s6 + $0x20] sm:$0xff] }
 0x301   :  { %v1053_v4 = vmax.f32 %v1023_v63, 0.0  ;;  %v7321_v39 = vadd.f32 %v7320_v43, %v7319_v60  ;;  %v7322_v5 = vpop.f32.mrb[26].mxu1  ;;  %8375 = vrot.lane.b32.xlu0 %v8354_v18, %s9255_s26  ;;  %8124 = vmatprep.mubr.bf16.mxu1 %v8942_v17  ;;  %v1280_v63 = vld [vmem:[%s12014_s6 + $0x30] sm:$0xff] }
 0x302   :  { %v1051_v8 = vmax.f32 %v1015_v1, 0.0  ;;  %v7323_v9 = vpop.f32.mrb[27].mxu1 }
 0x303   :  { %v7324_v10 = vadd.f32 %v7323_v9, %v7322_v5  ;;  %v931_v11 = vadd.f32 %v7321_v39, %v703_v6  ;;  %v8394_v26 = vpack.i.bf16 %v1053_v4, %v1052_v3  ;;  %v9745_v21 = vpack.c.bf16 %v1053_v4, %v1052_v3 }
 0x304   :  { %v8106_v13 = vpop.f32.mrb[28].mxu0  ;;  %v8389_v15 = vpack.i.bf16 %v1051_v8, %v1050_v7  ;;  %v9743_v16 = vpack.c.bf16 %v1051_v8, %v1050_v7 }
 0x305   :  { %v1027_v25 = vpop.f32.mrb[29].mxu0  ;;  %8380 = vrot.lane.b32.xlu0 %v9729_v14, %s9255_s26  ;;  %v934_v27 = vadd.f32 %v7324_v10, %v708_v62 }
 0x306   :  { %v1028_v18 = vadd.f32 %v1027_v25, %v931_v11  ;;  %v8107_v29 = vpop.f32.mrb[30].mxu0  ;;  %8390 = vrot.lane.b32.xlu1 %v8389_v15, %s9254_s24 }
 0x307   :  { %v7325_v58 = vpop.f32.mrb[28].mxu1  ;;  %v1030_v30 = vpop.f32.mrb[31].mxu0 }
 0x308   :  { %v1031_v31 = vadd.f32 %v1030_v30, %v934_v27  ;;  %v7326_v32 = vpop.f32.mrb[29].mxu1  ;;  %v1054_v35 = vmax.f32 %v1028_v18, 0.0 }
 0x309   :  { %v7327_v33 = vadd.f32 %v7326_v32, %v7325_v58  ;;  %v7328_v22 = vpop.f32.mrb[30].mxu1  ;;  %8385 = vrot.lane.b32.xlu0 %v8364_v52, %s9255_s26  ;;  %v1277_v52 = vld [vmem:[%s12014_s6 + $0x18] sm:$0xff] }
 0x30a   :  { %v1055_v36 = vmax.f32 %v1031_v31, 0.0  ;;  %v7329_v37 = vpop.f32.mrb[31].mxu1  ;;  %8395 = vrot.lane.b32.xlu1 %v8394_v26, %s9254_s24 }
 0x30b   :  { %v939_v14 = vadd.f32 %v7327_v33, %v713_v34  ;;  %v7330_v38 = vadd.f32 %v7329_v37, %v7328_v22 }
 0x30c   :  { %v8399_v41 = vpack.i.bf16 %v1055_v36, %v1054_v35  ;;  %v9752_v42 = vpack.c.bf16 %v1055_v36, %v1054_v35 }
 0x30d   :  { %v1036_v45 = vadd.f32 %v8106_v13, %v939_v14  ;;  %v942_v61 = vadd.f32 %v7330_v38, %v718_v40  ;;  %8410 = vrot.lane.b32.xlu0 %v8369_v49, %s9255_s26  ;;  %v1275_v49 = vld [vmem:[%s12014_s6 + $0x8] sm:$0xff] }
 0x30e   :  { %8400 = vrot.lane.b32.xlu1 %v8399_v41, %s9254_s24 }
 0x30f   :  { %v1039_v47 = vadd.f32 %v8107_v29, %v942_v61  ;;  %v1056_v44 = vmax.f32 %v1036_v45, 0.0 }
 0x311   :  { %v1057_v48 = vmax.f32 %v1039_v47, 0.0  ;;  %8420 = vrot.lane.b32.xlu0 %v8394_v26, %s9255_s26 }
 0x313   :  { %v8429_v50 = vpack.i.bf16 %v1057_v48, %v1056_v44  ;;  %v9760_v51 = vpack.c.bf16 %v1057_v48, %v1056_v44 }
 0x315   :  { %8430 = vrot.lane.b32.xlu0 %v8429_v50, %s9255_s26  ;;  %8405 = vrot.lane.b32.xlu1 %v8429_v50, %s9254_s24 }
 0x319   :  { %1289 = vperm.xlu0 %8273, %v1275_v49   ;;  %8415 = vrot.lane.b32.xlu1 %v8389_v15, %s9255_s26 }
 0x31d   :  { %1299 = vperm.xlu0 %8273, %v1277_v52   ;;  %8425 = vrot.lane.b32.xlu1 %v8399_v41, %s9255_s26 }
 0x321   :  { %1309 = vperm.xlu0 %8273, %v1279_v54   ;;  %1284 = vperm.xlu1 %8272, %v1274_v55  }
 0x325   :  { %1319 = vperm.xlu0 %8273, %v1281_v56   ;;  %1294 = vperm.xlu1 %8272, %v1276_v57  }
 0x329   :  { %1304 = vperm.xlu1 %8272, %v1278_v59  }
 0x32d   :  { %1314 = vperm.xlu1 %8272, %v1280_v63  }
 0x367   :  { %v8361_v60 = vpop.permute.xlu0 %8360 }
 0x368   :  { %v8356_v0 = vpop.permute.xlu1 %8355  ;;  %v8363_v1 = vunpack.i.h.bf16 %v8361_v60  ;;  %v8362_v43 = vunpack.i.l.bf16 %v8361_v60 }
 0x369   :  { %v8358_v3 = vunpack.i.h.bf16 %v8356_v0  ;;  %v8357_v4 = vunpack.i.l.bf16 %v8356_v0 }
 0x36a   :  { %v1125_v7 = vsel %vm71_vm1, 0.0, %v8363_v1  ;;  %v1124_v8 = vsel %vm71_vm1, 0.0, %v8362_v43 }
 0x36b   :  { %v1123_v39 = vsel %vm71_vm1, 0.0, %v8358_v3  ;;  %v1122_v5 = vsel %vm71_vm1, 0.0, %v8357_v4  ;;  %v6485_v10 = vpack.c.bf16 %v1125_v7, %v1124_v8 }
 0x36c   :  { %v6480_v6 = vpack.c.bf16 %v1123_v39, %v1122_v5 }
 0x36e   :  { %7348 = vmatpush3.bf16.msk.msra.mxu0 %vm9566_vm8, %v6480_v6 }
 0x36f   :  { %v8371_v9 = vpop.permute.xlu0 %8370  ;;  %7349 = vmatprep.subr.bf16.mxu0 %v9731_v24 }
 0x370   :  { %v8366_v11 = vpop.permute.xlu1 %8365  ;;  %v8373_v26 = vunpack.i.h.bf16 %v8371_v9  ;;  %v8372_v62 = vunpack.i.l.bf16 %v8371_v9 }
 0x371   :  { %v8368_v13 = vunpack.i.h.bf16 %v8366_v11  ;;  %v8367_v15 = vunpack.i.l.bf16 %v8366_v11 }
 0x372   :  { %7350 = vmatpush3.bf16.msk.msra.mxu0 %vm9566_vm8, %v6485_v10  ;;  %v1129_v24 = vsel %vm71_vm1, 0.0, %v8373_v26  ;;  %v1128_v31 = vsel %vm71_vm1, 0.0, %v8372_v62 }
 0x373   :  { %v1127_v25 = vsel %vm71_vm1, 0.0, %v8368_v13  ;;  %v1126_v27 = vsel %vm71_vm1, 0.0, %v8367_v15  ;;  %v8376_v18 = vpop.permute.xlu0 %8375  ;;  %7351 = vmatprep.subr.bf16.mxu0 %v9736_v23  ;;  %v6495_v35 = vpack.c.bf16 %v1129_v24, %v1128_v31 }
 0x374   :  { %v6490_v29 = vpack.c.bf16 %v1127_v25, %v1126_v27  ;;  %v8378_v58 = vunpack.i.h.bf16 %v8376_v18  ;;  %v8377_v30 = vunpack.i.l.bf16 %v8376_v18  ;;  %v8934_v18 = vld [vmem:[%s12013_s5] ss:$12 sps:$4 sm:$0xff]  }
 0x376   :  { %v1187_v32 = vsel %vm76_vm5, %v8378_v58, 0.0  ;;  %v1186_v33 = vsel %vm76_vm5, %v8377_v30, 0.0  ;;  %7352 = vmatpush3.bf16.msk.msra.mxu0 %vm9566_vm8, %v6490_v29 }
 0x377   :  { %v6520_v22 = vpack.c.bf16 %v1187_v32, %v1186_v33  ;;  %v8381_v34 = vpop.permute.xlu0 %8380  ;;  %7353 = vmatprep.subr.bf16.mxu0 %v9738_v53 }
 0x378   :  { %v8383_v23 = vunpack.i.h.bf16 %v8381_v34  ;;  %v8382_v36 = vunpack.i.l.bf16 %v8381_v34  ;;  %v8391_v37 = vpop.permute.xlu1 %8390 }
 0x379   :  { %v8393_v14 = vunpack.i.h.bf16 %v8391_v37  ;;  %v8392_v38 = vunpack.i.l.bf16 %v8391_v37  ;;  %8108 = vmatprep.subr.msk.bf16.mxu1 %vm9608_vm10, %v6520_v22 }
 0x37a   :  { %v1189_v40 = vsel %vm76_vm5, %v8383_v23, 0.0  ;;  %v1188_v41 = vsel %vm76_vm5, %v8382_v36, 0.0  ;;  %7354 = vmatpush3.bf16.msk.msra.mxu0 %vm9566_vm8, %v6495_v35  ;;  %8109 = vmatpush3.bf16.msk.msra.mxu1 %vm9608_vm10, %v6520_v22 }
 0x37b   :  { %v6525_v53 = vpack.c.bf16 %v1189_v40, %v1188_v41  ;;  %v1131_v45 = vsel %vm71_vm1, 0.0, %v8393_v14  ;;  %v1130_v61 = vsel %vm71_vm1, 0.0, %v8392_v38  ;;  %v8386_v46 = vpop.permute.xlu0 %8385  ;;  %7355 = vmatprep.subr.bf16.mxu0 %v9743_v16  ;;  %v8939_v38 = vld [vmem:[%s12013_s5 + $0x18] ss:$12 sps:$4 sm:$0xff]   ;;  %v8940_v41 = vld [vmem:[%s12013_s5 + $0x34] ss:$12 sps:$4 sm:$0xff]  }
 0x37c   :  { %v6500_v47 = vpack.c.bf16 %v1131_v45, %v1130_v61  ;;  %v8388_v44 = vunpack.i.h.bf16 %v8386_v46  ;;  %v8387_v48 = vunpack.i.l.bf16 %v8386_v46  ;;  %v8396_v50 = vpop.permute.xlu1 %8395  ;;  %v8943_v46 = vld [vmem:[%s12013_s5 + $0x30] ss:$12 sps:$4 sm:$0xff]  }
 0x37d   :  { %v8398_v49 = vunpack.i.h.bf16 %v8396_v50  ;;  %v8397_v52 = vunpack.i.l.bf16 %v8396_v50  ;;  %8110 = vmatprep.subr.msk.bf16.mxu1 %vm9608_vm10, %v6525_v53  ;;  %v8947_v50 = vld [vmem:[%s12013_s5 + $0x48] ss:$12 sps:$4 sm:$0xff]  }
 0x37e   :  { %v1191_v54 = vsel %vm76_vm5, %v8388_v44, 0.0  ;;  %v1190_v55 = vsel %vm76_vm5, %v8387_v48, 0.0  ;;  %7356 = vmatpush3.bf16.msk.msra.mxu0 %vm9566_vm8, %v6500_v47  ;;  %8111 = vmatpush3.bf16.msk.msra.mxu1 %vm9608_vm10, %v6525_v53  ;;  %v8944_v47 = vld [vmem:[%s12013_s5 + $0x20] ss:$12 sps:$4 sm:$0xff]   ;;  %v8948_v48 = vld [vmem:[%s12013_s5 + $0x38] ss:$12 sps:$4 sm:$0xff]  }
 0x37f   :  { %v6530_v16 = vpack.c.bf16 %v1191_v54, %v1190_v55  ;;  %v1133_v17 = vsel %vm71_vm1, 0.0, %v8398_v49  ;;  %v1132_v56 = vsel %vm71_vm1, 0.0, %v8397_v52  ;;  %v8411_v57 = vpop.permute.xlu0 %8410  ;;  %7357 = vmatprep.subr.bf16.mxu0 %v9745_v21  ;;  %v8945_v44 = vld [vmem:[%s12013_s5 + $0x4c] ss:$12 sps:$4 sm:$0xff]   ;;  %v8949_v49 = vld [vmem:[%s12013_s5 + $0x50] ss:$12 sps:$4 sm:$0xff]  }
 0x380   :  { %v6505_v59 = vpack.c.bf16 %v1133_v17, %v1132_v56  ;;  %v8413_v63 = vunpack.i.h.bf16 %v8411_v57  ;;  %v8412_v60 = vunpack.i.l.bf16 %v8411_v57  ;;  %v8401_v0 = vpop.permute.xlu1 %8400  ;;  %v9912_v52 = vshrl.u32 %v78_v19, 7 }
 0x381   :  { %v8403_v1 = vunpack.i.h.bf16 %v8401_v0  ;;  %v8402_v43 = vunpack.i.l.bf16 %v8401_v0  ;;  %8112 = vmatprep.subr.msk.bf16.mxu1 %vm9608_vm10, %v6530_v16  ;;  %v9915_v54 = vmul.u32 2, %v9426_v20  ;;  %v9258_v19 = vmov 1.0|1.0  }
 0x382   :  { %v1193_v3 = vsel %vm76_vm5, %v8413_v63, 0.0  ;;  %v1192_v4 = vsel %vm76_vm5, %v8412_v60, 0.0  ;;  %7358 = vmatpush3.bf16.msk.msra.mxu0 %vm9566_vm8, %v6505_v59  ;;  %8113 = vmatpush3.bf16.msk.msra.mxu1 %vm9608_vm10, %v6530_v16  ;;  %v1574_v55 = vadd.s32 8, %v9912_v52  ;;  %v1575_v16 = vadd.s32 16, %v9912_v52 }
 0x383   :  { %v6535_v21 = vpack.c.bf16 %v1193_v3, %v1192_v4  ;;  %v1135_v39 = vsel %vm71_vm1, 0.0, %v8403_v1  ;;  %v1134_v5 = vsel %vm71_vm1, 0.0, %v8402_v43  ;;  %7359 = vmatprep.subr.bf16.mxu0 %v9752_v42  ;;  %v8421_v7 = vpop.permute.xlu0 %8420  ;;  %vm1590_vm11 = vcmp.eq.s32.totalorder %v9912_v52, %v9915_v54 }
 0x384   :  { %v6510_v6 = vpack.c.bf16 %v1135_v39, %v1134_v5  ;;  %v8423_v11 = vunpack.i.h.bf16 %v8421_v7  ;;  %v8422_v26 = vunpack.i.l.bf16 %v8421_v7  ;;  %v1576_v17 = vadd.s32 24, %v9912_v52 }
 0x385   :  { %8114 = vmatprep.subr.msk.bf16.mxu1 %vm9608_vm10, %v6535_v21  ;;  %v1577_v56 = vadd.s32 32, %v9912_v52  ;;  %v1578_v57 = vadd.s32 40, %v9912_v52  ;;  %vm1591_vm12 = vcmp.eq.s32.totalorder %v1574_v55, %v9915_v54  ;;  %vm1592_vm13 = vcmp.eq.s32.totalorder %v1575_v16, %v9915_v54 }
 0x386   :  { %7360 = vmatpush3.bf16.msk.msra.mxu0 %vm9566_vm8, %v6510_v6  ;;  %8115 = vmatpush3.bf16.msk.msra.mxu1 %vm9608_vm10, %v6535_v21  ;;  %v1197_v29 = vsel %vm76_vm5, %v8423_v11, 0.0  ;;  %v1196_v58 = vsel %vm76_vm5, %v8422_v26, 0.0  ;;  %vm6557_vm14 = vmpackc.low %vm1591_vm12, %vm1590_vm11  ;;  %vm1593_vm15 = vcmp.eq.s32.totalorder %v1576_v17, %v9915_v54  ;;  %v1579_v59 = vadd.s32 48, %v9912_v52 }
 0x387   :  { %v8406_v8 = vpop.permute.xlu1 %8405  ;;  %7361 = vmatprep.subr.bf16.mxu0 %v9760_v51  ;;  %v8937_v51 = vld [vmem:[%s12013_s5 + $0x1c] ss:$12 sps:$4 sm:$0xff]   ;;  %v8431_v31 = vpop.permute.xlu0 %8430  ;;  %v6545_v35 = vpack.c.bf16 %v1197_v29, %v1196_v58  ;;  %vm6559_vm0 = vmpackc.low %vm1593_vm15, %vm1592_vm13  ;;  %vm1594_vm2 = vcmp.eq.s32.totalorder %v1577_v56, %v9915_v54  ;;  %vm1595_vm3 = vcmp.eq.s32.totalorder %v1578_v57, %v9915_v54  ;;  %v1580_v63 = vadd.s32 56, %v9912_v52 }
 0x388   :  { %v8408_v9 = vunpack.i.h.bf16 %v8406_v8  ;;  %v8407_v10 = vunpack.i.l.bf16 %v8406_v8  ;;  %v8433_v23 = vunpack.i.h.bf16 %v8431_v31  ;;  %v8432_v36 = vunpack.i.l.bf16 %v8431_v31  ;;  %vm6561_vm4 = vmpackc.low %vm1595_vm3, %vm1594_vm2 }
 0x389   :  { %vm1596_vm6 = vcmp.eq.s32.totalorder %v1579_v59, %v9915_v54  ;;  %vm1597_vm7 = vcmp.eq.s32.totalorder %v1580_v63, %v9915_v54  ;;  %v1581_v60 = vadd.s32 64, %v9912_v52  ;;  %v1582_v0 = vadd.s32 72, %v9912_v52 }
 0x38a   :  { %v1137_v42 = vsel %vm71_vm1, 0.0, %v8408_v9  ;;  %v1136_v62 = vsel %vm71_vm1, 0.0, %v8407_v10  ;;  %v1201_v53 = vsel %vm76_vm5, %v8433_v23, 0.0  ;;  %v1200_v45 = vsel %vm76_vm5, %v8432_v36, 0.0  ;;  %vm6563_vm9 = vmpackc.low %vm1597_vm7, %vm1596_vm6 }
 0x38b   :  { %v6515_v13 = vpack.c.bf16 %v1137_v42, %v1136_v62  ;;  %v8416_v15 = vpop.permute.xlu1 %8415  ;;  %v6555_v61 = vpack.c.bf16 %v1201_v53, %v1200_v45  ;;  %vm1598_vm11 = vcmp.eq.s32.totalorder %v1581_v60, %v9915_v54  ;;  %vm1599_vm12 = vcmp.eq.s32.totalorder %v1582_v0, %v9915_v54 }
 0x38c   :  { %v8418_v25 = vunpack.i.h.bf16 %v8416_v15  ;;  %v8417_v27 = vunpack.i.l.bf16 %v8416_v15  ;;  %v1583_v1 = vadd.s32 80, %v9912_v52  ;;  %v1584_v43 = vadd.s32 88, %v9912_v52  ;;  %vm6565_vm13 = vmpackc.low %vm1599_vm12, %vm1598_vm11 }
 0x38d   :  { %7362 = vmatpush3.bf16.msk.msra.mxu0 %vm9566_vm8, %v6515_v13  ;;  %v1585_v13 = vadd.s32 96, %v9912_v52  ;;  %v1586_v15 = vadd.s32 104, %v9912_v52  ;;  %vm2182_vm11 = vcmask 523264  }
 0x38e   :  { %v1195_v30 = vsel %vm76_vm5, %v8418_v25, 0.0  ;;  %v1194_v24 = vsel %vm76_vm5, %v8417_v27, 0.0  ;;  %8132 = vmatprep.subr.msk.bf16.mxu0 %vm6557_vm14, %v9258_v19  ;;  %vm1601_vm15 = vcmp.eq.s32.totalorder %v1584_v43, %v9915_v54 }
 0x38f   :  { %v6540_v32 = vpack.c.bf16 %v1195_v30, %v1194_v24  ;;  %v8426_v33 = vpop.permute.xlu1 %8425  ;;  %vm1602_vm2 = vcmp.eq.s32.totalorder %v1585_v13, %v9915_v54  ;;  %vm1603_vm3 = vcmp.eq.s32.totalorder %v1586_v15, %v9915_v54 }
 0x390   :  { %v8428_v22 = vunpack.i.h.bf16 %v8426_v33  ;;  %v8427_v34 = vunpack.i.l.bf16 %v8426_v33  ;;  %1419 = vmatmul.mubr.bf16.vlgmr.msra.gmra.mrb[32].mxu0 %v8934_v18  ;;  %v1587_v18 = vadd.s32 112, %v9912_v52 }
 0x391   :  { %8116 = vmatprep.subr.msk.bf16.mxu1 %vm9608_vm10, %v6540_v32  ;;  %1426 = vmatprep.mubr.bf16.mxu0 %v8937_v51  ;;  %v1588_v51 = vadd.s32 120, %v9912_v52 }
 0x392   :  { %v1199_v37 = vsel %vm76_vm5, %v8428_v22, 0.0  ;;  %v1198_v14 = vsel %vm76_vm5, %v8427_v34, 0.0  ;;  %8117 = vmatpush3.bf16.msk.msra.mxu1 %vm9608_vm10, %v6540_v32  ;;  %8133 = vmatpush3.bf16.msk.msra.mxu0 %vm6557_vm14, %v9258_v19  ;;  %vm1600_vm14 = vcmp.eq.s32.totalorder %v1583_v1, %v9915_v54  ;;  %vm1604_vm6 = vcmp.eq.s32.totalorder %v1587_v18, %v9915_v54 }
 0x393   :  { %8118 = vmatprep.subr.msk.bf16.mxu1 %vm9608_vm10, %v6545_v35  ;;  %v6550_v40 = vpack.c.bf16 %v1199_v37, %v1198_v14  ;;  %8134 = vmatprep.subr.msk.bf16.mxu0 %vm6559_vm0, %v9258_v19  ;;  %vm1605_vm7 = vcmp.eq.s32.totalorder %v1588_v51, %v9915_v54 }
 0x396   :  { %8119 = vmatpush3.bf16.msk.msra.mxu1 %vm9608_vm10, %v6545_v35  ;;  %8135 = vmatpush3.bf16.msk.msra.mxu0 %vm6559_vm0, %v9258_v19  ;;  %vm6567_vm0 = vmpackc.low %vm1601_vm15, %vm1600_vm14  ;;  %vm1763_vm14 = vcmask 515072  }
 0x397   :  { %8120 = vmatprep.subr.msk.bf16.mxu1 %vm9608_vm10, %v6550_v40  ;;  %8136 = vmatprep.subr.msk.bf16.mxu0 %vm6561_vm4, %v9258_v19 }
 0x398   :  { %1427 = vmatmul.mubr.bf16.gmra.mrb[36].mxu0 %v8939_v38  ;;  %v1290_v9 = vpop.permute.xlu0 %1289 }
 0x399   :  { %1434 = vmatprep.mubr.bf16.mxu0 %v8940_v41 }
 0x39a   :  { %8121 = vmatpush3.bf16.msk.msra.mxu1 %vm9608_vm10, %v6550_v40  ;;  %8137 = vmatpush3.bf16.msk.msra.mxu0 %vm6561_vm4, %v9258_v19  ;;  %vm6569_vm4 = vmpackc.low %vm1603_vm3, %vm1602_vm2 }
 0x39b   :  { %8122 = vmatprep.subr.msk.bf16.mxu1 %vm9608_vm10, %v6555_v61  ;;  %8138 = vmatprep.subr.msk.bf16.mxu0 %vm6563_vm9, %v9258_v19 }
 0x39c   :  { %v1300_v27 = vpop.permute.xlu0 %1299 }
 0x39e   :  { %8123 = vmatpush3.bf16.msk.msra.mxu1 %vm9608_vm10, %v6555_v61  ;;  %8139 = vmatpush3.bf16.msk.msra.mxu0 %vm6563_vm9, %v9258_v19  ;;  %vm6571_vm9 = vmpackc.low %vm1605_vm7, %vm1604_vm6 }
 0x39f   :  { %2231 = vmatprep.subr.bf16.mxu1 %v9256_v2  ;;  %8140 = vmatprep.subr.msk.bf16.mxu0 %vm6565_vm13, %v9258_v19 }
 0x3a0   :  { %1435 = vmatmul.mubr.bf16.gmra.mrb[40].mxu0 %v8943_v46  ;;  %v1285_v6 = vpop.permute.xlu1 %1284 }
 0x3a1   :  { %8125 = vmatmul.mubr.bf16.vlgmr.msra.gmra.mrb[32].mxu1 %v8944_v47  ;;  %1442 = vmatprep.mubr.bf16.mxu0 %v8945_v44  ;;  %v1310_v47 = vpop.permute.xlu0 %1309 }
 0x3a2   :  { %8128 = vmatprep.mubr.bf16.mxu1 %v8948_v48  ;;  %8141 = vmatpush3.bf16.msk.msra.mxu0 %vm6565_vm13, %v9258_v19 }
 0x3a3   :  { %8142 = vmatprep.subr.msk.bf16.mxu0 %vm6567_vm0, %v9258_v19 }
 0x3a4   :  { %v1295_v11 = vpop.permute.xlu1 %1294 }
 0x3a6   :  { %8143 = vmatpush3.bf16.msk.msra.mxu0 %vm6567_vm0, %v9258_v19 }
 0x3a7   :  { %8144 = vmatprep.subr.msk.bf16.mxu0 %vm6569_vm4, %v9258_v19 }
 0x3a8   :  { %1443 = vmatmul.mubr.bf16.gmra.mrb[44].mxu0 %v8947_v50  ;;  %v1305_v29 = vpop.permute.xlu1 %1304 }
 0x3a9   :  { %8129 = vmatmul.mubr.bf16.gmra.mrb[36].mxu1 %v8949_v49 }
 0x3aa   :  { %8145 = vmatpush3.bf16.msk.msra.mxu0 %vm6569_vm4, %v9258_v19 }
 0x3ab   :  { %8146 = vmatprep.subr.msk.bf16.mxu0 %vm6571_vm9, %v9258_v19 }
 0x3ac   :  { %v1315_v50 = vpop.permute.xlu1 %1314 }
 0x3ae   :  { %8147 = vmatpush3.bf16.msk.msra.mxu0 %vm6571_vm9, %v9258_v19 }
 0x463   :  { %v7363_v3 = vpop.f32.mrb[32].mxu0 }
 0x464   :  { %v7364_v4 = vpop.f32.mrb[33].mxu0 }
 0x465   :  { %v7365_v21 = vadd.f32 %v7364_v4, %v7363_v3  ;;  %v7366_v39 = vpop.f32.mrb[34].mxu0  ;;  %v1320_v4 = vpop.permute.xlu0 %1319 }
 0x466   :  { %v7367_v5 = vpop.f32.mrb[35].mxu0 }
 0x467   :  { %v7368_v7 = vadd.f32 %v7367_v5, %v7366_v39  ;;  %v1421_v32 = vadd.f32 %v7365_v21, %v1285_v6 }
 0x469   :  { %v1424_v38 = vadd.f32 %v7368_v7, %v1290_v9 }
 0x46b   :  { %v7369_v8 = vpop.f32.mrb[36].mxu0 }
 0x46c   :  { %v7370_v10 = vpop.f32.mrb[37].mxu0 }
 0x46d   :  { %v7371_v26 = vadd.f32 %v7370_v10, %v7369_v8  ;;  %v7372_v42 = vpop.f32.mrb[38].mxu0 }
 0x46e   :  { %v7373_v62 = vpop.f32.mrb[39].mxu0 }
 0x46f   :  { %v7374_v25 = vadd.f32 %v7373_v62, %v7372_v42  ;;  %v1429_v30 = vadd.f32 %v7371_v26, %v1295_v11 }
 0x471   :  { %v1432_v23 = vadd.f32 %v7374_v25, %v1300_v27 }
 0x473   :  { %v7375_v58 = vpop.f32.mrb[40].mxu0 }
 0x474   :  { %v7376_v24 = vpop.f32.mrb[41].mxu0  ;;  %v8126_v31 = vpop.f32.mrb[32].mxu1 }
 0x475   :  { %v7377_v33 = vadd.f32 %v7376_v24, %v7375_v58  ;;  %v1494_v22 = vadd.f32 %v8126_v31, %v1429_v30  ;;  %v7378_v34 = vpop.f32.mrb[42].mxu0  ;;  %v1485_v35 = vpop.f32.mrb[33].mxu1 }
 0x476   :  { %v1486_v36 = vadd.f32 %v1485_v35, %v1421_v32  ;;  %v7379_v37 = vpop.f32.mrb[43].mxu0  ;;  %v8127_v14 = vpop.f32.mrb[34].mxu1 }
 0x477   :  { %v7380_v40 = vadd.f32 %v7379_v37, %v7378_v34  ;;  %v1497_v41 = vadd.f32 %v8127_v14, %v1432_v23  ;;  %v1488_v53 = vpop.f32.mrb[35].mxu1  ;;  %v1518_v61 = vmax.f32 %v1494_v22, 0.0  ;;  %v1437_v17 = vadd.f32 %v7377_v33, %v1305_v29 }
 0x478   :  { %v1489_v45 = vadd.f32 %v1488_v53, %v1424_v38  ;;  %v1516_v44 = vmax.f32 %v1486_v36, 0.0 }
 0x479   :  { %v1519_v46 = vmax.f32 %v1497_v41, 0.0  ;;  %v1440_v0 = vadd.f32 %v7380_v40, %v1310_v47 }
 0x47a   :  { %v1517_v48 = vmax.f32 %v1489_v45, 0.0 }
 0x47b   :  { %v8439_v49 = vpack.i.bf16 %v1519_v46, %v1518_v61  ;;  %v7381_v52 = vpop.f32.mrb[44].mxu0 }
 0x47c   :  { %v8434_v54 = vpack.i.bf16 %v1517_v48, %v1516_v44  ;;  %v7382_v55 = vpop.f32.mrb[45].mxu0  ;;  %v8130_v16 = vpop.f32.mrb[36].mxu1 }
 0x47d   :  { %v7383_v56 = vadd.f32 %v7382_v55, %v7381_v52  ;;  %v7384_v57 = vpop.f32.mrb[46].mxu0  ;;  %v1501_v59 = vpop.f32.mrb[37].mxu1  ;;  %8440 = vrot.lane.b32.xlu0 %v8439_v49, %s9255_s26 }
 0x47e   :  { %v1502_v63 = vadd.f32 %v1501_v59, %v1437_v17  ;;  %v7385_v19 = vpop.f32.mrb[47].mxu0  ;;  %v8131_v60 = vpop.f32.mrb[38].mxu1  ;;  %8435 = vrot.lane.b32.xlu1 %v8434_v54, %s9255_s26 }
 0x47f   :  { %v1445_v1 = vadd.f32 %v7383_v56, %v1315_v50  ;;  %v7386_v43 = vadd.f32 %v7385_v19, %v7384_v57  ;;  %v1504_v3 = vpop.f32.mrb[39].mxu1 }
 0x480   :  { %v1505_v21 = vadd.f32 %v1504_v3, %v1440_v0  ;;  %v1520_v6 = vmax.f32 %v1502_v63, 0.0  ;;  %v1863_v3 = vld [vmem:[%s12015_s8 + $0x88] sm:$0xff] }
 0x481   :  { %v1510_v39 = vadd.f32 %v8130_v16, %v1445_v1  ;;  %v1448_v5 = vadd.f32 %v7386_v43, %v1320_v4  ;;  %v1862_v4 = vld [vmem:[%s12015_s8 + $0x80] sm:$0xff] }
 0x482   :  { %v1521_v7 = vmax.f32 %v1505_v21, 0.0  ;;  %v1847_v21 = vld [vmem:[%s12015_s8 + $0x8] sm:$0xff] }
 0x483   :  { %v1513_v8 = vadd.f32 %v8131_v60, %v1448_v5  ;;  %v1522_v10 = vmax.f32 %v1510_v39, 0.0  ;;  %v1846_v39 = vld [vmem:[%s12015_s8] sm:$0xff]  ;;  %v1865_v5 = vld [vmem:[%s12015_s8 + $0x98] sm:$0xff] }
 0x484   :  { %v8444_v9 = vpack.i.bf16 %v1521_v7, %v1520_v6 }
 0x485   :  { %v1523_v11 = vmax.f32 %v1513_v8, 0.0  ;;  %v1848_v8 = vld [vmem:[%s12015_s8 + $0x10] sm:$0xff] }
 0x486   :  { %8445 = vrot.lane.b32.xlu1 %v8444_v9, %s9255_s26  ;;  %v1867_v9 = vld [vmem:[%s12015_s8 + $0xa8] sm:$0xff] }
 0x487   :  { %v8449_v26 = vpack.i.bf16 %v1523_v11, %v1522_v10 }
 0x489   :  { %8450 = vrot.lane.b32.xlu0 %v8449_v26, %s9255_s26  ;;  %v1850_v26 = vld [vmem:[%s12015_s8 + $0x20] sm:$0xff] }
 0x4ef   :  { %v8441_v42 = vpop.permute.xlu0 %8440 }
 0x4f0   :  { %v8443_v62 = vunpack.i.h.bf16 %v8441_v42  ;;  %v8442_v13 = vunpack.i.l.bf16 %v8441_v42  ;;  %v8436_v15 = vpop.permute.xlu1 %8435  ;;  %v1869_v42 = vld [vmem:[%s12015_s8 + $0xb8] sm:$0xff] }
 0x4f1   :  { %v8438_v25 = vunpack.i.h.bf16 %v8436_v15  ;;  %v8437_v27 = vunpack.i.l.bf16 %v8436_v15  ;;  %v1853_v15 = vld [vmem:[%s12015_s8 + $0x38] sm:$0xff] }
 0x4f2   :  { %v1559_v18 = vsel %vm76_vm5, %v8443_v62, 0.0  ;;  %v1558_v51 = vsel %vm76_vm5, %v8442_v13, 0.0  ;;  %v8952_v62 = vld [vmem:[%s12016_s7 + $0x4] ss:$8 sps:$4 sm:$0xff]   ;;  %v1868_v13 = vld [vmem:[%s12015_s8 + $0xb0] sm:$0xff] }
 0x4f3   :  { %v1567_v29 = vmax.f32 %v1519_v46, %v1559_v18  ;;  %v1566_v58 = vmax.f32 %v1518_v61, %v1558_v51  ;;  %v1557_v30 = vsel %vm76_vm5, %v8438_v25, 0.0  ;;  %v1556_v24 = vsel %vm76_vm5, %v8437_v27, 0.0  ;;  %6645 = vmatprep.mubr.msk.bf16.mxu1 %vm2182_vm11, %v8952_v62  ;;  %v1852_v25 = vld [vmem:[%s12015_s8 + $0x30] sm:$0xff]  ;;  %v1871_v27 = vld [vmem:[%s12015_s8 + $0xc8] sm:$0xff]  ;;  %v1870_v18 = vld [vmem:[%s12015_s8 + $0xc0] sm:$0xff] }
 0x4f4   :  { %v1564_v31 = vmax.f32 %v1516_v44, %v1556_v24  ;;  %v1565_v32 = vmax.f32 %v1517_v48, %v1557_v30  ;;  %v1855_v51 = vld [vmem:[%s12015_s8 + $0x48] sm:$0xff]  ;;  %v1872_v30 = vld [vmem:[%s12015_s8 + $0xd0] sm:$0xff]  ;;  %v1857_v24 = vld [vmem:[%s12015_s8 + $0x58] sm:$0xff] }
 0x4f5   :  { %v1631_v22 = vpack.c.bf16 %v1567_v29, %v1566_v58  ;;  %v1854_v29 = vld [vmem:[%s12015_s8 + $0x40] sm:$0xff]  ;;  %v1873_v58 = vld [vmem:[%s12015_s8 + $0xd8] sm:$0xff] }
 0x4f6   :  { %v1630_v33 = vpack.c.bf16 %v1565_v32, %v1564_v31  ;;  %v1856_v31 = vld [vmem:[%s12015_s8 + $0x50] sm:$0xff]  ;;  %v1875_v32 = vld [vmem:[%s12015_s8 + $0xe8] sm:$0xff] }
 0x4f8   :  { %v8446_v34 = vpop.permute.xlu1 %8445  ;;  %8148 = vmatprep.mubr.bf16.mxu0 %v1630_v33  ;;  %v1874_v33 = vld [vmem:[%s12015_s8 + $0xe0] sm:$0xff] }
 0x4f9   :  { %v8448_v35 = vunpack.i.h.bf16 %v8446_v34  ;;  %v8447_v23 = vunpack.i.l.bf16 %v8446_v34  ;;  %8149 = vmatmul.mubr.bf16.vlgmr.msra.gmra.mrb[48].mxu0 %v1631_v22  ;;  %v1859_v22 = vld [vmem:[%s12015_s8 + $0x68] sm:$0xff]  ;;  %v1858_v34 = vld [vmem:[%s12015_s8 + $0x60] sm:$0xff] }
 0x4fb   :  { %v1561_v36 = vsel %vm76_vm5, %v8448_v35, 0.0  ;;  %v1560_v37 = vsel %vm76_vm5, %v8447_v23, 0.0  ;;  %v8451_v14 = vpop.permute.xlu0 %8450  ;;  %v1877_v35 = vld [vmem:[%s12015_s8 + $0xf8] sm:$0xff]  ;;  %v1876_v23 = vld [vmem:[%s12015_s8 + $0xf0] sm:$0xff] }
 0x4fc   :  { %v8453_v38 = vunpack.i.h.bf16 %v8451_v14  ;;  %v8452_v40 = vunpack.i.l.bf16 %v8451_v14  ;;  %v1568_v41 = vmax.f32 %v1520_v6, %v1560_v37  ;;  %v1569_v53 = vmax.f32 %v1521_v7, %v1561_v36  ;;  %v1864_v6 = vld [vmem:[%s12015_s8 + $0x90] sm:$0xff]  ;;  %v1849_v7 = vld [vmem:[%s12015_s8 + $0x18] sm:$0xff] }
 0x4fd   :  { %v1861_v36 = vld [vmem:[%s12015_s8 + $0x78] sm:$0xff]  ;;  %v1860_v37 = vld [vmem:[%s12015_s8 + $0x70] sm:$0xff]  ;;  %v1776_v14 = vand.u32 31, %v9426_v20 }
 0x4fe   :  { %v1563_v45 = vsel %vm76_vm5, %v8453_v38, 0.0  ;;  %v1562_v61 = vsel %vm76_vm5, %v8452_v40, 0.0  ;;  %v1632_v46 = vpack.c.bf16 %v1569_v53, %v1568_v41 }
 0x4ff   :  { %v1570_v47 = vmax.f32 %v1522_v10, %v1562_v61  ;;  %v1571_v44 = vmax.f32 %v1523_v11, %v1563_v45  ;;  %v1866_v10 = vld [vmem:[%s12015_s8 + $0xa0] sm:$0xff]  ;;  %v1851_v11 = vld [vmem:[%s12015_s8 + $0x28] sm:$0xff]  ;;  %vm7255_vm12 = vcmp.ne.s32.totalorder %v1776_v14, 0  ;;  %vm7256_vm15 = vcmp.ne.s32.totalorder %v1776_v14, 31 }
 0x500   :  { %8152 = vmatprep.mubr.bf16.mxu0 %v1632_v46  ;;  %vm10118_vm13 = vmpackc.low %vm7255_vm12, %vm7255_vm12  ;;  %v8968_v14 = vld [vmem:[%s12016_s7 + $0x64] ss:$8 sps:$4 sm:$0xff]  }
 0x501   :  { %v1633_v48 = vpack.c.bf16 %v1571_v44, %v1570_v47  ;;  %vm10159_vm0 = vmpackc.low %vm7256_vm15, %vm7256_vm15 }
 0x503   :  { %8153 = vmatmul.mubr.bf16.gmra.mrb[52].mxu0 %v1633_v48 }
 0x5cc   :  { %v9977_v50 = vpop.f32.mrb[48].mxu0 }
 0x5cd   :  { %v9979_v49 = vpop.f32.mrb[49].mxu0 }
 0x5ce   :  { %v9981_v52 = vpop.f32.mrb[50].mxu0 }
 0x5cf   :  { %v8479_v54 = vpack.i.bf16 %v9981_v52, %v9977_v50  ;;  %v1839_v55 = vpack.c.bf16 %v9981_v52, %v9977_v50  ;;  %v9987_v16 = vpop.f32.mrb[51].mxu0 }
 0x5d0   :  { %v8474_v17 = vpack.i.bf16 %v9987_v16, %v9979_v49  ;;  %v1838_v56 = vpack.c.bf16 %v9987_v16, %v9979_v49 }
 0x5d1   :  { %8460 = vrot.lane.b32.xlu0 %v8479_v54, %s9254_s24 }
 0x5d2   :  { %8455 = vrot.lane.b32.xlu1 %v8474_v17, %s9254_s24 }
 0x5d6   :  { %v9995_v57 = vpop.f32.mrb[52].mxu0 }
 0x5d7   :  { %v9997_v59 = vpop.f32.mrb[53].mxu0 }
 0x5d8   :  { %v9999_v63 = vpop.f32.mrb[54].mxu0 }
 0x5d9   :  { %v8489_v19 = vpack.i.bf16 %v9999_v63, %v9995_v57  ;;  %v1841_v60 = vpack.c.bf16 %v9999_v63, %v9995_v57  ;;  %v10005_v0 = vpop.f32.mrb[55].mxu0 }
 0x5da   :  { %v8484_v1 = vpack.i.bf16 %v10005_v0, %v9997_v59  ;;  %v1840_v43 = vpack.c.bf16 %v10005_v0, %v9997_v59 }
 0x5db   :  { %8470 = vrot.lane.b32.xlu0 %v8489_v19, %s9254_s24 }
 0x5dc   :  { %8465 = vrot.lane.b32.xlu1 %v8484_v1, %s9254_s24 }
 0x5df   :  { %8480 = vrot.lane.b32.xlu0 %v8479_v54, %s9255_s26 }
 0x5e0   :  { %8475 = vrot.lane.b32.xlu1 %v8474_v17, %s9255_s26 }
 0x5e3   :  { %8490 = vrot.lane.b32.xlu0 %v8489_v19, %s9255_s26 }
 0x5e4   :  { %8485 = vrot.lane.b32.xlu1 %v8484_v1, %s9255_s26 }
 0x5e7   :  { %1965 = vperm.xlu0 %8273, %v1863_v3  }
 0x5e8   :  { %1960 = vperm.xlu1 %8272, %v1862_v4  }
 0x5eb   :  { %1885 = vperm.xlu0 %8273, %v1847_v21  }
 0x5ec   :  { %1880 = vperm.xlu1 %8272, %v1846_v39  }
 0x5ef   :  { %1975 = vperm.xlu0 %8273, %v1865_v5  }
 0x5f0   :  { %1970 = vperm.xlu1 %8272, %v1864_v6  }
 0x5f3   :  { %1895 = vperm.xlu0 %8273, %v1849_v7  }
 0x5f4   :  { %1890 = vperm.xlu1 %8272, %v1848_v8  }
 0x5f7   :  { %1985 = vperm.xlu0 %8273, %v1867_v9  }
 0x5f8   :  { %1980 = vperm.xlu1 %8272, %v1866_v10  }
 0x5fb   :  { %1905 = vperm.xlu0 %8273, %v1851_v11  }
 0x5fc   :  { %1900 = vperm.xlu1 %8272, %v1850_v26  }
 0x5ff   :  { %1995 = vperm.xlu0 %8273, %v1869_v42  }
 0x600   :  { %1990 = vperm.xlu1 %8272, %v1868_v13  }
 0x603   :  { %1915 = vperm.xlu0 %8273, %v1853_v15  }
 0x604   :  { %1910 = vperm.xlu1 %8272, %v1852_v25  }
 0x607   :  { %2005 = vperm.xlu0 %8273, %v1871_v27  }
 0x608   :  { %2000 = vperm.xlu1 %8272, %v1870_v18  }
 0x60b   :  { %1925 = vperm.xlu0 %8273, %v1855_v51  }
 0x60c   :  { %1920 = vperm.xlu1 %8272, %v1854_v29  }
 0x60f   :  { %2015 = vperm.xlu0 %8273, %v1873_v58  }
 0x610   :  { %2010 = vperm.xlu1 %8272, %v1872_v30  }
 0x613   :  { %1935 = vperm.xlu0 %8273, %v1857_v24   ;;  %v8950_v24 = vld [vmem:[%s12016_s7] ss:$8 sps:$4 sm:$0xff]  }
 0x614   :  { %1930 = vperm.xlu1 %8272, %v1856_v31   ;;  %v8953_v31 = vld [vmem:[%s12016_s7 + $0x14] ss:$8 sps:$4 sm:$0xff]  }
 0x617   :  { %2025 = vperm.xlu0 %8273, %v1875_v32   ;;  %v8955_v32 = vld [vmem:[%s12016_s7 + $0x10] ss:$8 sps:$4 sm:$0xff]  }
 0x618   :  { %2020 = vperm.xlu1 %8272, %v1874_v33   ;;  %v8958_v33 = vld [vmem:[%s12016_s7 + $0x20] ss:$8 sps:$4 sm:$0xff]  }
 0x61b   :  { %1945 = vperm.xlu0 %8273, %v1859_v22   ;;  %v8959_v22 = vld [vmem:[%s12016_s7 + $0x34] ss:$8 sps:$4 sm:$0xff]  }
 0x61c   :  { %1940 = vperm.xlu1 %8272, %v1858_v34   ;;  %v8961_v34 = vld [vmem:[%s12016_s7 + $0x30] ss:$8 sps:$4 sm:$0xff]  }
 0x61f   :  { %2035 = vperm.xlu0 %8273, %v1877_v35   ;;  %v8962_v35 = vld [vmem:[%s12016_s7 + $0x44] ss:$8 sps:$4 sm:$0xff]  }
 0x620   :  { %2030 = vperm.xlu1 %8272, %v1876_v23   ;;  %v8964_v23 = vld [vmem:[%s12016_s7 + $0x40] ss:$8 sps:$4 sm:$0xff]  }
 0x623   :  { %1955 = vperm.xlu0 %8273, %v1861_v36   ;;  %v8965_v36 = vld [vmem:[%s12016_s7 + $0x54] ss:$8 sps:$4 sm:$0xff]  }
 0x624   :  { %1950 = vperm.xlu1 %8272, %v1860_v37   ;;  %v8967_v37 = vld [vmem:[%s12016_s7 + $0x50] ss:$8 sps:$4 sm:$0xff]  }
 0x643   :  { %v8461_v38 = vpop.permute.xlu0 %8460 }
 0x644   :  { %v8456_v40 = vpop.permute.xlu1 %8455  ;;  %v8463_v41 = vunpack.i.h.bf16 %v8461_v38  ;;  %v8462_v53 = vunpack.i.l.bf16 %v8461_v38  ;;  %v8970_v38 = vld [vmem:[%s12016_s7 + $0x60] ss:$8 sps:$4 sm:$0xff]  }
 0x645   :  { %v8458_v45 = vunpack.i.h.bf16 %v8456_v40  ;;  %v8457_v61 = vunpack.i.l.bf16 %v8456_v40  ;;  %v8971_v40 = vld [vmem:[%s12016_s7 + $0x74] ss:$8 sps:$4 sm:$0xff]  }
 0x646   :  { %v1734_v54 = vsel %vm71_vm1, 0.0, %v8463_v41  ;;  %v1733_v20 = vsel %vm71_vm1, 0.0, %v8462_v53  ;;  %v8973_v41 = vld [vmem:[%s12016_s7 + $0x70] ss:$8 sps:$4 sm:$0xff]   ;;  %v8974_v53 = vld [vmem:[%s12016_s7 + $0x84] ss:$8 sps:$4 sm:$0xff]  }
 0x647   :  { %v1732_v47 = vsel %vm71_vm1, 0.0, %v8458_v45  ;;  %v1731_v44 = vsel %vm71_vm1, 0.0, %v8457_v61  ;;  %v6613_v17 = vpack.c.bf16 %v1734_v54, %v1733_v20  ;;  %v8976_v45 = vld [vmem:[%s12016_s7 + $0x80] ss:$8 sps:$4 sm:$0xff]   ;;  %v8977_v61 = vld [vmem:[%s12016_s7 + $0x94] ss:$8 sps:$4 sm:$0xff]  }
 0x648   :  { %v6608_v48 = vpack.c.bf16 %v1732_v47, %v1731_v44  ;;  %v8979_v47 = vld [vmem:[%s12016_s7 + $0x90] ss:$8 sps:$4 sm:$0xff]   ;;  %v8980_v44 = vld [vmem:[%s12016_s7 + $0xa4] ss:$8 sps:$4 sm:$0xff]   ;;  %v8983_v54 = vld [vmem:[%s12016_s7 + $0xb4] ss:$8 sps:$4 sm:$0xff]  }
 0x649   :  { %v8985_v20 = vld [vmem:[%s12016_s7 + $0xb0] ss:$8 sps:$4 sm:$0xff]  }
 0x64a   :  { %6609 = vmatpush1.bf16.msk.msra.mxu1 %vm10118_vm13, %v6608_v48  ;;  %v8982_v48 = vld [vmem:[%s12016_s7 + $0xa0] ss:$8 sps:$4 sm:$0xff]  }
 0x64b   :  { %2233 = vmatprep.subr.bf16.mxu1 %v9256_v2 }
 0x64d   :  { %v8471_v19 = vpop.permute.xlu0 %8470 }
 0x64e   :  { %6614 = vmatpush1.bf16.msk.msra.mxu1 %vm10118_vm13, %v6613_v17  ;;  %v8466_v1 = vpop.permute.xlu1 %8465  ;;  %v8473_v3 = vunpack.i.h.bf16 %v8471_v19  ;;  %v8472_v4 = vunpack.i.l.bf16 %v8471_v19  ;;  %v8986_v17 = vld [vmem:[%s12016_s7 + $0xc4] ss:$8 sps:$4 sm:$0xff]   ;;  %v8988_v19 = vld [vmem:[%s12016_s7 + $0xc0] ss:$8 sps:$4 sm:$0xff]  }
 0x64f   :  { %v8468_v21 = vunpack.i.h.bf16 %v8466_v1  ;;  %v8467_v39 = vunpack.i.l.bf16 %v8466_v1  ;;  %2235 = vmatprep.subr.bf16.mxu1 %v9256_v2  ;;  %v8989_v1 = vld [vmem:[%s12016_s7 + $0xd4] ss:$8 sps:$4 sm:$0xff]  }
 0x650   :  { %v1738_v8 = vsel %vm71_vm1, 0.0, %v8473_v3  ;;  %v1737_v9 = vsel %vm71_vm1, 0.0, %v8472_v4  ;;  %v8991_v3 = vld [vmem:[%s12016_s7 + $0xd0] ss:$8 sps:$4 sm:$0xff]   ;;  %v8992_v4 = vld [vmem:[%s12016_s7 + $0xe4] ss:$8 sps:$4 sm:$0xff]  }
 0x651   :  { %v1736_v5 = vsel %vm71_vm1, 0.0, %v8468_v21  ;;  %v1735_v6 = vsel %vm71_vm1, 0.0, %v8467_v39  ;;  %v6623_v10 = vpack.c.bf16 %v1738_v8, %v1737_v9  ;;  %v8481_v62 = vpop.permute.xlu0 %8480  ;;  %v8994_v21 = vld [vmem:[%s12016_s7 + $0xe0] ss:$8 sps:$4 sm:$0xff]   ;;  %v8995_v39 = vld [vmem:[%s12016_s7 + $0xf4] ss:$8 sps:$4 sm:$0xff]  }
 0x652   :  { %v6618_v7 = vpack.c.bf16 %v1736_v5, %v1735_v6  ;;  %v8476_v11 = vpop.permute.xlu1 %8475  ;;  %v8483_v49 = vunpack.i.h.bf16 %v8481_v62  ;;  %v8482_v16 = vunpack.i.l.bf16 %v8481_v62  ;;  %v8997_v5 = vld [vmem:[%s12016_s7 + $0xf0] ss:$8 sps:$4 sm:$0xff]  }
 0x653   :  { %v8478_v26 = vunpack.i.h.bf16 %v8476_v11  ;;  %v8477_v42 = vunpack.i.l.bf16 %v8476_v11 }
 0x654   :  { %6619 = vmatpush1.bf16.msk.msra.mxu1 %vm10118_vm13, %v6618_v7  ;;  %v1767_v0 = vsel %vm1763_vm14, %v8483_v49, 0.0 }
 0x655   :  { %2237 = vmatprep.subr.bf16.mxu1 %v9256_v2  ;;  %v1764_v50 = vsel %vm1763_vm14, %v8477_v42, 0.0  ;;  %v8491_v25 = vpop.permute.xlu0 %8490 }
 0x656   :  { %v8486_v52 = vpop.permute.xlu1 %8485  ;;  %v8493_v63 = vunpack.i.h.bf16 %v8491_v25 }
 0x657   :  { %v8488_v13 = vunpack.i.h.bf16 %v8486_v52  ;;  %v8487_v15 = vunpack.i.l.bf16 %v8486_v52 }
 0x658   :  { %6624 = vmatpush1.bf16.msk.msra.mxu1 %vm10118_vm13, %v6623_v10  ;;  %v1771_v29 = vsel %vm1763_vm14, %v8493_v63, 0.0 }
 0x659   :  { %2239 = vmatprep.subr.bf16.mxu1 %v9256_v2  ;;  %v1769_v27 = vsel %vm1763_vm14, %v8488_v13, 0.0  ;;  %v1768_v18 = vsel %vm1763_vm14, %v8487_v15, 0.0 }
 0x65a   :  { %v6638_v51 = vpack.c.bf16 %v1769_v27, %v1768_v18 }
 0x65c   :  { %2240 = vmatpush1.bf16.msra.mxu1 %v1838_v56  ;;  %v1765_v56 = vsel %vm1763_vm14, %v8478_v26, 0.0 }
 0x65d   :  { %2241 = vmatprep.subr.bf16.mxu1 %v9256_v2  ;;  %v6628_v59 = vpack.c.bf16 %v1765_v56, %v1764_v50 }
 0x660   :  { %2242 = vmatpush1.bf16.msra.mxu1 %v1839_v55  ;;  %v9056_v55 = vld [vmem:[%s12018_s9 + $0x40] ss:$24 sps:$4 sm:$0xff]  }
 0x661   :  { %2243 = vmatprep.subr.bf16.mxu1 %v9256_v2 }
 0x664   :  { %2244 = vmatpush1.bf16.msra.mxu1 %v1840_v43  ;;  %v1766_v43 = vsel %vm1763_vm14, %v8482_v16, 0.0 }
 0x665   :  { %2245 = vmatprep.subr.bf16.mxu1 %v9256_v2  ;;  %v6633_v57 = vpack.c.bf16 %v1767_v0, %v1766_v43 }
 0x666   :  { %v10291_v7 = vpop.permute.xlu0 %1965 }
 0x667   :  { %v10289_v6 = vpop.permute.xlu1 %1960 }
 0x668   :  { %2246 = vmatpush1.bf16.msra.mxu1 %v1841_v60  ;;  %v8492_v60 = vunpack.i.l.bf16 %v8491_v25 }
 0x669   :  { %2247 = vmatprep.subr.bf16.mxu1 %v9256_v2 }
 0x66a   :  { %v1770_v58 = vsel %vm1763_vm14, %v8492_v60, 0.0  ;;  %v1886_v9 = vpop.permute.xlu0 %1885 }
 0x66b   :  { %v6643_v30 = vpack.c.bf16 %v1771_v29, %v1770_v58  ;;  %v1881_v8 = vpop.permute.xlu1 %1880 }
 0x66c   :  { %6629 = vmatpush1.bf16.msk.msra.mxu1 %vm10159_vm0, %v6628_v59 }
 0x66d   :  { %2249 = vmatprep.subr.bf16.mxu1 %v9256_v2 }
 0x66e   :  { %v10295_v11 = vpop.permute.xlu0 %1975 }
 0x66f   :  { %v10293_v10 = vpop.permute.xlu1 %1970 }
 0x670   :  { %6634 = vmatpush1.bf16.msk.msra.mxu1 %vm10159_vm0, %v6633_v57 }
 0x671   :  { %2251 = vmatprep.subr.bf16.mxu1 %v9256_v2 }
 0x672   :  { %v1896_v42 = vpop.permute.xlu0 %1895 }
 0x673   :  { %v1891_v26 = vpop.permute.xlu1 %1890 }
 0x674   :  { %6639 = vmatpush1.bf16.msk.msra.mxu1 %vm10159_vm0, %v6638_v51 }
 0x675   :  { %2253 = vmatprep.subr.bf16.mxu1 %v9256_v2  ;;  %v8956_v2 = vld [vmem:[%s12016_s7 + $0x24] ss:$8 sps:$4 sm:$0xff]  }
 0x676   :  { %v10299_v49 = vpop.permute.xlu0 %1985 }
 0x677   :  { %v10297_v62 = vpop.permute.xlu1 %1980 }
 0x678   :  { %6644 = vmatpush1.bf16.msk.msra.mxu1 %vm10159_vm0, %v6643_v30 }
 0x67a   :  { %v1906_v56 = vpop.permute.xlu0 %1905 }
 0x67b   :  { %2264 = vmatmul.mubr.bf16.vlgmr.msra.gmra.mrb[40].mxu1 %v8950_v24  ;;  %v1901_v16 = vpop.permute.xlu1 %1900 }
 0x67c   :  { %6646 = vmatprep.mubr.msk.bf16.mxu1 %vm2182_vm11, %v8953_v31 }
 0x67e   :  { %v10303_v25 = vpop.permute.xlu0 %1995 }
 0x67f   :  { %v10301_v0 = vpop.permute.xlu1 %1990 }
 0x682   :  { %v1916_v30 = vpop.permute.xlu0 %1915 }
 0x683   :  { %2272 = vmatmul.mubr.bf16.gmra.mrb[44].mxu1 %v8955_v32  ;;  %v1911_v18 = vpop.permute.xlu1 %1910 }
 0x684   :  { %6647 = vmatprep.mubr.msk.bf16.mxu1 %vm2182_vm11, %v8956_v2 }
 0x68b   :  { %2280 = vmatmul.mubr.bf16.gmra.mrb[48].mxu1 %v8958_v33 }
 0x68c   :  { %6648 = vmatprep.mubr.msk.bf16.mxu1 %vm2182_vm11, %v8959_v22  ;;  %v10311_v22 = vpop.permute.xlu1 %2000 }
 0x693   :  { %2288 = vmatmul.mubr.bf16.gmra.mrb[52].mxu1 %v8961_v34 }
 0x694   :  { %6649 = vmatprep.mubr.msk.bf16.mxu1 %vm2182_vm11, %v8962_v35 }
 0x69b   :  { %2296 = vmatmul.mubr.bf16.gmra.mrb[56].mxu1 %v8964_v23  ;;  %v10317_v23 = vpop.permute.xlu0 %2005 }
 0x69c   :  { %6650 = vmatprep.mubr.msk.bf16.mxu1 %vm2182_vm11, %v8965_v36 }
 0x6a3   :  { %2304 = vmatmul.mubr.bf16.gmra.mrb[60].mxu1 %v8967_v37 }
 0x6a4   :  { %6651 = vmatprep.mubr.msk.bf16.mxu1 %vm2182_vm11, %v8968_v14 }
 0x6ab   :  { %2312 = vmatmul.mubr.bf16.gmra.mrb[64].mxu1 %v8970_v38 }
 0x6ac   :  { %6652 = vmatprep.mubr.msk.bf16.mxu1 %vm2182_vm11, %v8971_v40 }
 0x6b3   :  { %2320 = vmatmul.mubr.bf16.gmra.mrb[68].mxu1 %v8973_v41 }
 0x6b4   :  { %6653 = vmatprep.mubr.msk.bf16.mxu1 %vm2182_vm11, %v8974_v53  ;;  %v1921_v53 = vpop.permute.xlu1 %1920 }
 0x6bb   :  { %2328 = vmatmul.mubr.bf16.gmra.mrb[72].mxu1 %v8976_v45 }
 0x6bc   :  { %6654 = vmatprep.mubr.msk.bf16.mxu1 %vm2182_vm11, %v8977_v61 }
 0x6c3   :  { %2336 = vmatmul.mubr.bf16.gmra.mrb[76].mxu1 %v8979_v47  ;;  %v1926_v47 = vpop.permute.xlu0 %1925 }
 0x6c4   :  { %6655 = vmatprep.mubr.msk.bf16.mxu1 %vm2182_vm11, %v8980_v44 }
 0x6cb   :  { %2344 = vmatmul.mubr.bf16.gmra.mrb[80].mxu1 %v8982_v48 }
 0x6cc   :  { %6656 = vmatprep.mubr.msk.bf16.mxu1 %vm2182_vm11, %v8983_v54 }
 0x6d3   :  { %2352 = vmatmul.mubr.bf16.gmra.mrb[84].mxu1 %v8985_v20 }
 0x6d4   :  { %6657 = vmatprep.mubr.msk.bf16.mxu1 %vm2182_vm11, %v8986_v17 }
 0x6db   :  { %2360 = vmatmul.mubr.bf16.gmra.mrb[88].mxu1 %v8988_v19  ;;  %v10327_v19 = vpop.permute.xlu1 %2010 }
 0x6dc   :  { %6658 = vmatprep.mubr.msk.bf16.mxu1 %vm2182_vm11, %v8989_v1 }
 0x6e3   :  { %2368 = vmatmul.mubr.bf16.gmra.mrb[92].mxu1 %v8991_v3 }
 0x6e4   :  { %6659 = vmatprep.mubr.msk.bf16.mxu1 %vm2182_vm11, %v8992_v4 }
 0x6eb   :  { %2376 = vmatmul.mubr.bf16.gmra.mrb[96].mxu1 %v8994_v21  ;;  %v10329_v21 = vpop.permute.xlu0 %2015 }
 0x6ec   :  { %6660 = vmatprep.mubr.msk.bf16.mxu1 %vm2182_vm11, %v8995_v39 }
 0x6f3   :  { %2384 = vmatmul.mubr.bf16.gmra.mrb[100].mxu1 %v8997_v5 }
 0x74e   :  { %v2265_v50 = vpop.f32.mrb[40].mxu1 }
 0x74f   :  { %v2266_v52 = vadd.f32 %v2265_v50, %v1881_v8  ;;  %v2267_v59 = vpop.f32.mrb[41].mxu1  ;;  %v1936_v50 = vpop.permute.xlu0 %1935 }
 0x750   :  { %v2268_v43 = vpop.f32.mrb[42].mxu1 }
 0x751   :  { %v2269_v13 = vadd.f32 %v2268_v43, %v1886_v9  ;;  %v2270_v15 = vpop.f32.mrb[43].mxu1  ;;  %v2392_v57 = vmax.f32 %v2266_v52, 0.0 }
 0x753   :  { %v2393_v63 = vmax.f32 %v2269_v13, 0.0 }
 0x755   :  { %v10305_v60 = vpack.i.bf16 %v2393_v63, %v2392_v57  ;;  %v10307_v27 = vpack.c.bf16 %v2393_v63, %v2392_v57 }
 0x756   :  { %v2273_v51 = vpop.f32.mrb[44].mxu1 }
 0x757   :  { %v2274_v29 = vadd.f32 %v2273_v51, %v1891_v26  ;;  %v2275_v58 = vpop.f32.mrb[45].mxu1  ;;  %8495 = vrot.lane.b32.xlu0 %v10305_v60, %s9254_s24  ;;  %v1931_v26 = vpop.permute.xlu1 %1930 }
 0x758   :  { %v2276_v24 = vpop.f32.mrb[46].mxu1  ;;  %v10343_v51 = vpop.permute.xlu0 %2025 }
 0x759   :  { %v2277_v31 = vadd.f32 %v2276_v24, %v1896_v42  ;;  %v2278_v32 = vpop.f32.mrb[47].mxu1  ;;  %v2394_v2 = vmax.f32 %v2274_v29, 0.0 }
 0x75b   :  { %v2395_v33 = vmax.f32 %v2277_v31, 0.0  ;;  %v10337_v57 = vpop.permute.xlu1 %2020 }
 0x75d   :  { %v10313_v34 = vpack.i.bf16 %v2395_v33, %v2394_v2  ;;  %v10315_v35 = vpack.c.bf16 %v2395_v33, %v2394_v2 }
 0x75e   :  { %v2281_v36 = vpop.f32.mrb[48].mxu1 }
 0x75f   :  { %v2282_v37 = vadd.f32 %v2281_v36, %v1901_v16  ;;  %v2283_v14 = vpop.f32.mrb[49].mxu1  ;;  %8500 = vrot.lane.b32.xlu0 %v10313_v34, %s9254_s24  ;;  %v1941_v2 = vpop.permute.xlu1 %1940 }
 0x760   :  { %v2284_v38 = vpop.f32.mrb[50].mxu1 }
 0x761   :  { %v2285_v40 = vadd.f32 %v2284_v38, %v1906_v56  ;;  %v2286_v41 = vpop.f32.mrb[51].mxu1  ;;  %v2396_v45 = vmax.f32 %v2282_v37, 0.0  ;;  %v1946_v37 = vpop.permute.xlu0 %1945 }
 0x763   :  { %v2397_v61 = vmax.f32 %v2285_v40, 0.0 }
 0x765   :  { %v10321_v44 = vpack.i.bf16 %v2397_v61, %v2396_v45  ;;  %v10323_v48 = vpack.c.bf16 %v2397_v61, %v2396_v45  ;;  %v10353_v45 = vpop.permute.xlu1 %2030 }
 0x766   :  { %v2289_v54 = vpop.f32.mrb[52].mxu1 }
 0x767   :  { %v2290_v20 = vadd.f32 %v2289_v54, %v1911_v18  ;;  %v2291_v17 = vpop.f32.mrb[53].mxu1  ;;  %8505 = vrot.lane.b32.xlu0 %v10321_v44, %s9254_s24 }
 0x768   :  { %v2292_v1 = vpop.f32.mrb[54].mxu1 }
 0x769   :  { %v2293_v3 = vadd.f32 %v2292_v1, %v1916_v30  ;;  %v2294_v4 = vpop.f32.mrb[55].mxu1  ;;  %v2398_v39 = vmax.f32 %v2290_v20, 0.0  ;;  %v10355_v20 = vpop.permute.xlu0 %2035 }
 0x76b   :  { %v2399_v5 = vmax.f32 %v2293_v3, 0.0 }
 0x76d   :  { %v10331_v8 = vpack.i.bf16 %v2399_v5, %v2398_v39  ;;  %v10333_v9 = vpack.c.bf16 %v2399_v5, %v2398_v39  ;;  %v1951_v39 = vpop.permute.xlu1 %1950 }
 0x76e   :  { %v2297_v42 = vpop.f32.mrb[56].mxu1 }
 0x76f   :  { %v2298_v16 = vadd.f32 %v2297_v42, %v1921_v53  ;;  %v2299_v56 = vpop.f32.mrb[57].mxu1  ;;  %8510 = vrot.lane.b32.xlu0 %v10331_v8, %s9254_s24 }
 0x770   :  { %v2300_v52 = vpop.f32.mrb[58].mxu1 }
 0x771   :  { %v2301_v59 = vadd.f32 %v2300_v52, %v1926_v47  ;;  %v2302_v43 = vpop.f32.mrb[59].mxu1  ;;  %v2400_v13 = vmax.f32 %v2298_v16, 0.0  ;;  %v1956_v16 = vpop.permute.xlu0 %1955 }
 0x773   :  { %v2401_v15 = vmax.f32 %v2301_v59, 0.0 }
 0x775   :  { %v10339_v63 = vpack.i.bf16 %v2401_v15, %v2400_v13  ;;  %v10341_v18 = vpack.c.bf16 %v2401_v15, %v2400_v13 }
 0x776   :  { %v2305_v29 = vpop.f32.mrb[60].mxu1 }
 0x777   :  { %v2306_v58 = vadd.f32 %v2305_v29, %v1931_v26  ;;  %v2307_v30 = vpop.f32.mrb[61].mxu1  ;;  %8515 = vrot.lane.b32.xlu0 %v10339_v63, %s9254_s24 }
 0x778   :  { %v2308_v24 = vpop.f32.mrb[62].mxu1 }
 0x779   :  { %v2309_v31 = vadd.f32 %v2308_v24, %v1936_v50  ;;  %v2310_v32 = vpop.f32.mrb[63].mxu1  ;;  %v2402_v33 = vmax.f32 %v2306_v58, 0.0 }
 0x77b   :  { %v2403_v36 = vmax.f32 %v2309_v31, 0.0 }
 0x77d   :  { %v10347_v14 = vpack.i.bf16 %v2403_v36, %v2402_v33  ;;  %v10349_v38 = vpack.c.bf16 %v2403_v36, %v2402_v33 }
 0x77e   :  { %v2313_v40 = vpop.f32.mrb[64].mxu1 }
 0x77f   :  { %v2314_v41 = vadd.f32 %v2313_v40, %v1941_v2  ;;  %v2315_v53 = vpop.f32.mrb[65].mxu1  ;;  %8520 = vrot.lane.b32.xlu0 %v10347_v14, %s9254_s24 }
 0x780   :  { %v2316_v61 = vpop.f32.mrb[66].mxu1 }
 0x781   :  { %v2317_v47 = vadd.f32 %v2316_v61, %v1946_v37  ;;  %v2318_v54 = vpop.f32.mrb[67].mxu1  ;;  %v2404_v17 = vmax.f32 %v2314_v41, 0.0 }
 0x783   :  { %v2405_v1 = vmax.f32 %v2317_v47, 0.0 }
 0x785   :  { %v8639_v3 = vpack.i.bf16 %v2405_v1, %v2404_v17  ;;  %v10357_v4 = vpack.c.bf16 %v2405_v1, %v2404_v17 }
 0x786   :  { %v2321_v5 = vpop.f32.mrb[68].mxu1 }
 0x787   :  { %v2322_v26 = vadd.f32 %v2321_v5, %v1951_v39  ;;  %v2323_v42 = vpop.f32.mrb[69].mxu1  ;;  %8525 = vrot.lane.b32.xlu0 %v8639_v3, %s9254_s24 }
 0x788   :  { %v2324_v56 = vpop.f32.mrb[70].mxu1 }
 0x789   :  { %v2325_v50 = vadd.f32 %v2324_v56, %v1956_v16  ;;  %v2326_v52 = vpop.f32.mrb[71].mxu1  ;;  %v2406_v59 = vmax.f32 %v2322_v26, 0.0 }
 0x78b   :  { %v2407_v43 = vmax.f32 %v2325_v50, 0.0 }
 0x78d   :  { %v8649_v13 = vpack.i.bf16 %v2407_v43, %v2406_v59  ;;  %v10360_v15 = vpack.c.bf16 %v2407_v43, %v2406_v59 }
 0x78e   :  { %v2329_v29 = vpop.f32.mrb[72].mxu1 }
 0x78f   :  { %v2330_v58 = vadd.f32 %v2329_v29, %v10289_v6  ;;  %v2331_v30 = vpop.f32.mrb[73].mxu1  ;;  %8570 = vrot.lane.b32.xlu0 %v8649_v13, %s9254_s24 }
 0x790   :  { %v2332_v24 = vpop.f32.mrb[74].mxu1 }
 0x791   :  { %v2333_v31 = vadd.f32 %v2332_v24, %v10291_v7  ;;  %v2334_v32 = vpop.f32.mrb[75].mxu1  ;;  %v2408_v2 = vmax.f32 %v2330_v58, 0.0 }
 0x793   :  { %v2409_v33 = vmax.f32 %v2333_v31, 0.0  ;;  %8580 = vrot.lane.b32.xlu0 %v10305_v60, %s9255_s26 }
 0x795   :  { %v10367_v36 = vpack.i.bf16 %v2409_v33, %v2408_v2  ;;  %v10369_v37 = vpack.c.bf16 %v2409_v33, %v2408_v2 }
 0x796   :  { %v2337_v40 = vpop.f32.mrb[76].mxu1 }
 0x797   :  { %v2338_v41 = vadd.f32 %v2337_v40, %v10293_v10  ;;  %v2339_v6 = vpop.f32.mrb[77].mxu1  ;;  %8530 = vrot.lane.b32.xlu1 %v10367_v36, %s9254_s24  ;;  %8590 = vrot.lane.b32.xlu0 %v10313_v34, %s9255_s26 }
 0x798   :  { %v2340_v7 = vpop.f32.mrb[78].mxu1  ;;  %v2925_v6 = vld [vmem:[%s12017_s10 + $0x28] sm:$0xff] }
 0x799   :  { %v2341_v53 = vadd.f32 %v2340_v7, %v10295_v11  ;;  %v2342_v61 = vpop.f32.mrb[79].mxu1  ;;  %v2410_v47 = vmax.f32 %v2338_v41, 0.0 }
 0x79b   :  { %v2411_v60 = vmax.f32 %v2341_v53, 0.0  ;;  %8600 = vrot.lane.b32.xlu0 %v10321_v44, %s9255_s26 }
 0x79d   :  { %v10379_v54 = vpack.i.bf16 %v2411_v60, %v2410_v47  ;;  %v10381_v17 = vpack.c.bf16 %v2411_v60, %v2410_v47 }
 0x79e   :  { %v2345_v10 = vpop.f32.mrb[80].mxu1 }
 0x79f   :  { %v2346_v1 = vadd.f32 %v2345_v10, %v10297_v62  ;;  %v2347_v39 = vpop.f32.mrb[81].mxu1  ;;  %8535 = vrot.lane.b32.xlu1 %v10379_v54, %s9254_s24  ;;  %8610 = vrot.lane.b32.xlu0 %v10331_v8, %s9255_s26 }
 0x7a0   :  { %v2348_v11 = vpop.f32.mrb[82].mxu1 }
 0x7a1   :  { %v2349_v34 = vadd.f32 %v2348_v11, %v10299_v49  ;;  %v2350_v5 = vpop.f32.mrb[83].mxu1  ;;  %v2412_v26 = vmax.f32 %v2346_v1, 0.0 }
 0x7a3   :  { %v2413_v44 = vmax.f32 %v2349_v34, 0.0  ;;  %8620 = vrot.lane.b32.xlu0 %v10339_v63, %s9255_s26 }
 0x7a5   :  { %v10391_v42 = vpack.i.bf16 %v2413_v44, %v2412_v26  ;;  %v10393_v16 = vpack.c.bf16 %v2413_v44, %v2412_v26 }
 0x7a6   :  { %v2353_v62 = vpop.f32.mrb[84].mxu1 }
 0x7a7   :  { %v2354_v56 = vadd.f32 %v2353_v62, %v10301_v0  ;;  %v2355_v50 = vpop.f32.mrb[85].mxu1  ;;  %8540 = vrot.lane.b32.xlu1 %v10391_v42, %s9254_s24  ;;  %8630 = vrot.lane.b32.xlu0 %v10347_v14, %s9255_s26 }
 0x7a8   :  { %v2356_v49 = vpop.f32.mrb[86].mxu1 }
 0x7a9   :  { %v2357_v8 = vadd.f32 %v2356_v49, %v10303_v25  ;;  %v2358_v52 = vpop.f32.mrb[87].mxu1  ;;  %v2414_v59 = vmax.f32 %v2354_v56, 0.0  ;;  %v2921_v25 = vld [vmem:[%s12017_s10 + $0x8] sm:$0xff]  ;;  %v2931_v56 = vld [vmem:[%s12017_s10 + $0x58] sm:$0xff] }
 0x7ab   :  { %v2415_v63 = vmax.f32 %v2357_v8, 0.0  ;;  %8640 = vrot.lane.b32.xlu0 %v8639_v3, %s9255_s26 }
 0x7ad   :  { %v10402_v43 = vpack.i.bf16 %v2415_v63, %v2414_v59  ;;  %v10404_v29 = vpack.c.bf16 %v2415_v63, %v2414_v59 }
 0x7ae   :  { %v2361_v0 = vpop.f32.mrb[88].mxu1 }
 0x7af   :  { %v2362_v58 = vadd.f32 %v2361_v0, %v10311_v22  ;;  %v2363_v30 = vpop.f32.mrb[89].mxu1  ;;  %8545 = vrot.lane.b32.xlu1 %v10402_v43, %s9254_s24  ;;  %8650 = vrot.lane.b32.xlu0 %v8649_v13, %s9255_s26  ;;  %v2923_v22 = vld [vmem:[%s12017_s10 + $0x18] sm:$0xff] }
 0x7b0   :  { %v2364_v14 = vpop.f32.mrb[90].mxu1 }
 0x7b1   :  { %v2365_v3 = vadd.f32 %v2364_v14, %v10317_v23  ;;  %v2366_v24 = vpop.f32.mrb[91].mxu1  ;;  %v2416_v31 = vmax.f32 %v2362_v58, 0.0  ;;  %v9000_v58 = vld [vmem:[%s12018_s9 + $0x4] ss:$24 sps:$4 sm:$0xff]  }
 0x7b2   :  { %3624 = vmatprep.mubr.bf16.mxu0 %v9000_v58  ;;  %v2939_v24 = vld [vmem:[%s12017_s10 + $0x98] sm:$0xff] }
 0x7b3   :  { %v2417_v32 = vmax.f32 %v2365_v3, 0.0  ;;  %2959 = vperm.xlu0 %8273, %v2921_v25  }
 0x7b5   :  { %v10417_v2 = vpack.i.bf16 %v2417_v32, %v2416_v31  ;;  %v10419_v33 = vpack.c.bf16 %v2417_v32, %v2416_v31  ;;  %v2941_v31 = vld [vmem:[%s12017_s10 + $0xa8] sm:$0xff]  ;;  %v2943_v32 = vld [vmem:[%s12017_s10 + $0xb8] sm:$0xff] }
 0x7b6   :  { %v2369_v13 = vpop.f32.mrb[92].mxu1 }
 0x7b7   :  { %v2370_v40 = vadd.f32 %v2369_v13, %v10327_v19  ;;  %v2371_v41 = vpop.f32.mrb[93].mxu1  ;;  %8550 = vrot.lane.b32.xlu1 %v10417_v2, %s9254_s24  ;;  %2969 = vperm.xlu0 %8273, %v2923_v22   ;;  %v2927_v19 = vld [vmem:[%s12017_s10 + $0x38] sm:$0xff]  ;;  %v2920_v22 = vld [vmem:[%s12017_s10] sm:$0xff] }
 0x7b8   :  { %v2372_v23 = vpop.f32.mrb[94].mxu1  ;;  %v2924_v13 = vld [vmem:[%s12017_s10 + $0x20] sm:$0xff] }
 0x7b9   :  { %v2373_v7 = vadd.f32 %v2372_v23, %v10329_v21  ;;  %v2374_v53 = vpop.f32.mrb[95].mxu1  ;;  %v2418_v61 = vmax.f32 %v2370_v40, 0.0  ;;  %v2929_v21 = vld [vmem:[%s12017_s10 + $0x48] sm:$0xff]  ;;  %v2926_v40 = vld [vmem:[%s12017_s10 + $0x30] sm:$0xff]  ;;  %v2928_v41 = vld [vmem:[%s12017_s10 + $0x40] sm:$0xff] }
 0x7bb   :  { %v2419_v47 = vmax.f32 %v2373_v7, 0.0  ;;  %2979 = vperm.xlu0 %8273, %v2925_v6   ;;  %v2930_v6 = vld [vmem:[%s12017_s10 + $0x50] sm:$0xff] }
 0x7bd   :  { %v8624_v60 = vpack.i.bf16 %v2419_v47, %v2418_v61  ;;  %v10431_v10 = vpack.c.bf16 %v2419_v47, %v2418_v61  ;;  %v2932_v61 = vld [vmem:[%s12017_s10 + $0x60] sm:$0xff] }
 0x7be   :  { %v2377_v1 = vpop.f32.mrb[96].mxu1 }
 0x7bf   :  { %v2378_v39 = vadd.f32 %v2377_v1, %v10337_v57  ;;  %v2379_v11 = vpop.f32.mrb[97].mxu1  ;;  %8555 = vrot.lane.b32.xlu1 %v8624_v60, %s9254_s24  ;;  %2989 = vperm.xlu0 %8273, %v2927_v19  }
 0x7c0   :  { %v2380_v34 = vpop.f32.mrb[98].mxu1 }
 0x7c1   :  { %v2381_v5 = vadd.f32 %v2380_v34, %v10343_v51  ;;  %v2382_v26 = vpop.f32.mrb[99].mxu1  ;;  %v2420_v44 = vmax.f32 %v2378_v39, 0.0  ;;  %v2933_v51 = vld [vmem:[%s12017_s10 + $0x68] sm:$0xff] }
 0x7c3   :  { %v2421_v62 = vmax.f32 %v2381_v5, 0.0  ;;  %2999 = vperm.xlu0 %8273, %v2929_v21   ;;  %v2934_v5 = vld [vmem:[%s12017_s10 + $0x70] sm:$0xff] }
 0x7c5   :  { %v8634_v57 = vpack.i.bf16 %v2421_v62, %v2420_v44  ;;  %v10442_v50 = vpack.c.bf16 %v2421_v62, %v2420_v44 }
 0x7c6   :  { %v2385_v49 = vpop.f32.mrb[100].mxu1 }
 0x7c7   :  { %v2386_v8 = vadd.f32 %v2385_v49, %v10353_v45  ;;  %v2387_v52 = vpop.f32.mrb[101].mxu1  ;;  %8560 = vrot.lane.b32.xlu1 %v8634_v57, %s9254_s24  ;;  %3009 = vperm.xlu0 %8273, %v2931_v56   ;;  %v2935_v45 = vld [vmem:[%s12017_s10 + $0x78] sm:$0xff] }
 0x7c8   :  { %v2388_v59 = vpop.f32.mrb[102].mxu1 }
 0x7c9   :  { %v2389_v63 = vadd.f32 %v2388_v59, %v10355_v20  ;;  %v2390_v0 = vpop.f32.mrb[103].mxu1  ;;  %v2422_v30 = vmax.f32 %v2386_v8, 0.0  ;;  %v2937_v20 = vld [vmem:[%s12017_s10 + $0x88] sm:$0xff]  ;;  %v8496_v23 = vpop.permute.xlu0 %8495 }
 0x7ca   :  { %v8498_v7 = vunpack.i.h.bf16 %v8496_v23  ;;  %v8497_v53 = vunpack.i.l.bf16 %v8496_v23 }
 0x7cb   :  { %v2423_v14 = vmax.f32 %v2389_v63, 0.0  ;;  %3019 = vperm.xlu0 %8273, %v2933_v51  }
 0x7cc   :  { %v2553_v1 = vsel %vm71_vm1, 0.0, %v8498_v7  ;;  %v2552_v39 = vsel %vm71_vm1, 0.0, %v8497_v53  ;;  %v2944_v53 = vld [vmem:[%s12017_s10 + $0xc0] sm:$0xff] }
 0x7cd   :  { %v8644_v25 = vpack.i.bf16 %v2423_v14, %v2422_v30  ;;  %v10456_v3 = vpack.c.bf16 %v2423_v14, %v2422_v30  ;;  %v6760_v44 = vpack.c.bf16 %v2553_v1, %v2552_v39 }
 0x7cf   :  { %8565 = vrot.lane.b32.xlu1 %v8644_v25, %s9254_s24  ;;  %3029 = vperm.xlu0 %8273, %v2935_v45   ;;  %v2938_v45 = vld [vmem:[%s12017_s10 + $0x90] sm:$0xff] }
 0x7d1   :  { %v8501_v11 = vpop.permute.xlu0 %8500 }
 0x7d2   :  { %v8503_v62 = vunpack.i.h.bf16 %v8501_v11  ;;  %v8502_v56 = vunpack.i.l.bf16 %v8501_v11 }
 0x7d3   :  { %8575 = vrot.lane.b32.xlu1 %v10367_v36, %s9255_s26  ;;  %3039 = vperm.xlu0 %8273, %v2937_v20   ;;  %v2945_v36 = vld [vmem:[%s12017_s10 + $0xc8] sm:$0xff] }
 0x7d4   :  { %v2555_v59 = vsel %vm71_vm1, 0.0, %v8503_v62  ;;  %v2554_v51 = vsel %vm71_vm1, 0.0, %v8502_v56 }
 0x7d5   :  { %v6765_v14 = vpack.c.bf16 %v2555_v59, %v2554_v51 }
 0x7d7   :  { %8585 = vrot.lane.b32.xlu1 %v10379_v54, %s9255_s26  ;;  %3049 = vperm.xlu0 %8273, %v2939_v24   ;;  %v2947_v54 = vld [vmem:[%s12017_s10 + $0xd8] sm:$0xff]  ;;  %v2940_v24 = vld [vmem:[%s12017_s10 + $0xa0] sm:$0xff] }
 0x7d9   :  { %v8506_v63 = vpop.permute.xlu0 %8505 }
 0x7da   :  { %v8507_v20 = vunpack.i.l.bf16 %v8506_v63 }
 0x7db   :  { %8595 = vrot.lane.b32.xlu1 %v10391_v42, %s9255_s26  ;;  %3059 = vperm.xlu0 %8273, %v2941_v31   ;;  %v2949_v42 = vld [vmem:[%s12017_s10 + $0xe8] sm:$0xff] }
 0x7df   :  { %8605 = vrot.lane.b32.xlu1 %v10402_v43, %s9255_s26  ;;  %3069 = vperm.xlu0 %8273, %v2943_v32   ;;  %v2951_v43 = vld [vmem:[%s12017_s10 + $0xf8] sm:$0xff] }
 0x7e3   :  { %8615 = vrot.lane.b32.xlu1 %v10417_v2, %s9255_s26  ;;  %3079 = vperm.xlu0 %8273, %v2945_v36   ;;  %v2922_v2 = vld [vmem:[%s12017_s10 + $0x10] sm:$0xff] }
 0x7e7   :  { %8625 = vrot.lane.b32.xlu1 %v8624_v60, %s9255_s26  ;;  %3089 = vperm.xlu0 %8273, %v2947_v54  }
 0x7eb   :  { %8635 = vrot.lane.b32.xlu1 %v8634_v57, %s9255_s26  ;;  %3099 = vperm.xlu0 %8273, %v2949_v42   ;;  %v2936_v57 = vld [vmem:[%s12017_s10 + $0x80] sm:$0xff]  ;;  %v2556_v42 = vsel %vm71_vm1, 0.0, %v8507_v20 }
 0x7ef   :  { %8645 = vrot.lane.b32.xlu1 %v8644_v25, %s9255_s26  ;;  %3109 = vperm.xlu0 %8273, %v2951_v43   ;;  %v8508_v25 = vunpack.i.h.bf16 %v8506_v63  ;;  %v8511_v43 = vpop.permute.xlu0 %8510 }
 0x7f0   :  { %v8513_v23 = vunpack.i.h.bf16 %v8511_v43 }
 0x7f1   :  { %v2557_v54 = vsel %vm71_vm1, 0.0, %v8508_v25 }
 0x7f3   :  { %2954 = vperm.xlu1 %8272, %v2920_v22   ;;  %v8516_v7 = vpop.permute.xlu0 %8515 }
 0x7f4   :  { %v8517_v62 = vunpack.i.l.bf16 %v8516_v7 }
 0x7f6   :  { %v2560_v51 = vsel %vm71_vm1, 0.0, %v8517_v62 }
 0x7f7   :  { %2964 = vperm.xlu1 %8272, %v2922_v2   ;;  %v8521_v39 = vpop.permute.xlu0 %8520 }
 0x7f8   :  { %v8523_v25 = vunpack.i.h.bf16 %v8521_v39  ;;  %v8522_v20 = vunpack.i.l.bf16 %v8521_v39 }
 0x7fb   :  { %2974 = vperm.xlu1 %8272, %v2924_v13   ;;  %v2942_v13 = vld [vmem:[%s12017_s10 + $0xb0] sm:$0xff]  ;;  %v8526_v56 = vpop.permute.xlu0 %8525 }
 0x7ff   :  { %2984 = vperm.xlu1 %8272, %v2926_v40  }
 0x801   :  { %v8571_v63 = vpop.permute.xlu0 %8570 }
 0x803   :  { %2994 = vperm.xlu1 %8272, %v2928_v41   ;;  %v6770_v41 = vpack.c.bf16 %v2557_v54, %v2556_v42  ;;  %v2563_v54 = vsel %vm71_vm1, 0.0, %v8523_v25  ;;  %v2562_v42 = vsel %vm71_vm1, 0.0, %v8522_v20 }
 0x807   :  { %3004 = vperm.xlu1 %8272, %v2930_v6   ;;  %v8512_v6 = vunpack.i.l.bf16 %v8511_v43 }
 0x809   :  { %v8531_v47 = vpop.permute.xlu1 %8530  ;;  %v2558_v1 = vsel %vm71_vm1, 0.0, %v8512_v6 }
 0x80a   :  { %v8533_v19 = vunpack.i.h.bf16 %v8531_v47  ;;  %v8532_v60 = vunpack.i.l.bf16 %v8531_v47 }
 0x80b   :  { %3014 = vperm.xlu1 %8272, %v2932_v61  }
 0x80c   :  { %v2569_v34 = vsel %vm71_vm1, 0.0, %v8533_v19  ;;  %v2568_v21 = vsel %vm71_vm1, 0.0, %v8532_v60  ;;  %v2559_v60 = vsel %vm71_vm1, 0.0, %v8513_v23 }
 0x80d   :  { %v6800_v26 = vpack.c.bf16 %v2569_v34, %v2568_v21  ;;  %v2946_v21 = vld [vmem:[%s12017_s10 + $0xd0] sm:$0xff] }
 0x80f   :  { %3024 = vperm.xlu1 %8272, %v2934_v5   ;;  %7411 = vmatprep.subr.msk.bf16.mxu0 %vm10118_vm13, %v6800_v26  ;;  %v6775_v26 = vpack.c.bf16 %v2559_v60, %v2558_v1 }
 0x810   :  { %7412 = vmatpush3.bf16.msk.msra.mxu0 %vm10118_vm13, %v6760_v44  ;;  %v8518_v44 = vunpack.i.h.bf16 %v8516_v7 }
 0x811   :  { %v8536_v49 = vpop.permute.xlu1 %8535 }
 0x812   :  { %v8538_v8 = vunpack.i.h.bf16 %v8536_v49  ;;  %v8537_v52 = vunpack.i.l.bf16 %v8536_v49  ;;  %v2561_v59 = vsel %vm71_vm1, 0.0, %v8518_v44 }
 0x813   :  { %3034 = vperm.xlu1 %8272, %v2936_v57   ;;  %v2948_v57 = vld [vmem:[%s12017_s10 + $0xe0] sm:$0xff] }
 0x814   :  { %v2571_v0 = vsel %vm71_vm1, 0.0, %v8538_v8  ;;  %v2570_v58 = vsel %vm71_vm1, 0.0, %v8537_v52 }
 0x815   :  { %v6805_v30 = vpack.c.bf16 %v2571_v0, %v2570_v58 }
 0x817   :  { %3044 = vperm.xlu1 %8272, %v2938_v45   ;;  %7413 = vmatprep.subr.msk.bf16.mxu0 %vm10118_vm13, %v6805_v30  ;;  %v2950_v45 = vld [vmem:[%s12017_s10 + $0xf0] sm:$0xff] }
 0x818   :  { %7414 = vmatpush3.bf16.msk.msra.mxu0 %vm10118_vm13, %v6765_v14  ;;  %v6780_v14 = vpack.c.bf16 %v2561_v59, %v2560_v51 }
 0x819   :  { %v8541_v31 = vpop.permute.xlu1 %8540 }
 0x81a   :  { %v8543_v32 = vunpack.i.h.bf16 %v8541_v31  ;;  %v8542_v36 = vunpack.i.l.bf16 %v8541_v31  ;;  %v8581_v31 = vpop.permute.xlu0 %8580 }
 0x81b   :  { %3054 = vperm.xlu1 %8272, %v2940_v24  }
 0x81c   :  { %v2573_v22 = vsel %vm71_vm1, 0.0, %v8543_v32  ;;  %v2572_v2 = vsel %vm71_vm1, 0.0, %v8542_v36 }
 0x81d   :  { %v6810_v40 = vpack.c.bf16 %v2573_v22, %v2572_v2 }
 0x81e   :  { %v8591_v23 = vpop.permute.xlu0 %8590 }
 0x81f   :  { %3064 = vperm.xlu1 %8272, %v2942_v13   ;;  %7415 = vmatprep.subr.msk.bf16.mxu0 %vm10118_vm13, %v6810_v40  ;;  %v6785_v13 = vpack.c.bf16 %v2563_v54, %v2562_v42  ;;  %v8528_v40 = vunpack.i.h.bf16 %v8526_v56  ;;  %v8593_v20 = vunpack.i.h.bf16 %v8591_v23 }
 0x820   :  { %7416 = vmatpush3.bf16.msk.msra.mxu0 %vm10118_vm13, %v6770_v41  ;;  %v8527_v41 = vunpack.i.l.bf16 %v8526_v56 }
 0x821   :  { %v8546_v61 = vpop.permute.xlu1 %8545 }
 0x822   :  { %v8548_v47 = vunpack.i.h.bf16 %v8546_v61  ;;  %v8547_v19 = vunpack.i.l.bf16 %v8546_v61  ;;  %v2565_v61 = vsel %vm71_vm1, 0.0, %v8528_v40 }
 0x823   :  { %3074 = vperm.xlu1 %8272, %v2944_v53  }
 0x824   :  { %v2575_v11 = vsel %vm71_vm1, 0.0, %v8548_v47  ;;  %v2574_v34 = vsel %vm71_vm1, 0.0, %v8547_v19  ;;  %v2564_v47 = vsel %vm71_vm1, 0.0, %v8527_v41  ;;  %v2683_v41 = vsel %vm1763_vm14, %v8593_v20, 0.0 }
 0x825   :  { %v6815_v5 = vpack.c.bf16 %v2575_v11, %v2574_v34  ;;  %v6790_v39 = vpack.c.bf16 %v2565_v61, %v2564_v47  ;;  %v8601_v11 = vpop.permute.xlu0 %8600  ;;  %v8573_v34 = vunpack.i.h.bf16 %v8571_v63 }
 0x827   :  { %3084 = vperm.xlu1 %8272, %v2946_v21   ;;  %7417 = vmatprep.subr.msk.bf16.mxu0 %vm10118_vm13, %v6815_v5  ;;  %v8572_v21 = vunpack.i.l.bf16 %v8571_v63  ;;  %v2567_v62 = vsel %vm71_vm1, 0.0, %v8573_v34 }
 0x828   :  { %7418 = vmatpush3.bf16.msk.msra.mxu0 %vm10118_vm13, %v6775_v26 }
 0x829   :  { %v8551_v49 = vpop.permute.xlu1 %8550  ;;  %v2566_v56 = vsel %vm71_vm1, 0.0, %v8572_v21 }
 0x82a   :  { %v8553_v8 = vunpack.i.h.bf16 %v8551_v49  ;;  %v8552_v52 = vunpack.i.l.bf16 %v8551_v49  ;;  %v8582_v49 = vunpack.i.l.bf16 %v8581_v31 }
 0x82b   :  { %3094 = vperm.xlu1 %8272, %v2948_v57   ;;  %v8583_v57 = vunpack.i.h.bf16 %v8581_v31  ;;  %v8998_v31 = vld [vmem:[%s12018_s9] ss:$24 sps:$4 sm:$0xff]  }
 0x82c   :  { %v2577_v0 = vsel %vm71_vm1, 0.0, %v8553_v8  ;;  %v2576_v58 = vsel %vm71_vm1, 0.0, %v8552_v52  ;;  %v9048_v8 = vld [vmem:[%s12018_s9 + $0x14] ss:$24 sps:$4 sm:$0xff]   ;;  %v10605_v52 = vpop.permute.xlu0 %8610  ;;  %v2680_v25 = vsel %vm1763_vm14, %v8582_v49, 0.0 }
 0x82d   :  { %v6820_v30 = vpack.c.bf16 %v2577_v0, %v2576_v58  ;;  %3946 = vmatprep.mubr.bf16.mxu1 %v9048_v8  ;;  %v6795_v58 = vpack.c.bf16 %v2567_v62, %v2566_v56  ;;  %v8612_v34 = vunpack.i.l.bf16 %v10605_v52  ;;  %v9004_v62 = vld [vmem:[%s12018_s9 + $0x64] ss:$24 sps:$4 sm:$0xff]  }
 0x82f   :  { %3104 = vperm.xlu1 %8272, %v2950_v45   ;;  %7419 = vmatprep.subr.msk.bf16.mxu0 %vm10118_vm13, %v6820_v30 }
 0x830   :  { %7420 = vmatpush3.bf16.msk.msra.mxu0 %vm10118_vm13, %v6780_v14  ;;  %v2681_v14 = vsel %vm1763_vm14, %v8583_v57, 0.0 }
 0x831   :  { %v8556_v24 = vpop.permute.xlu1 %8555 }
 0x832   :  { %v8558_v32 = vunpack.i.h.bf16 %v8556_v24  ;;  %v8557_v36 = vunpack.i.l.bf16 %v8556_v24  ;;  %v8592_v24 = vunpack.i.l.bf16 %v8591_v23 }
 0x834   :  { %v2579_v43 = vsel %vm71_vm1, 0.0, %v8558_v32  ;;  %v2578_v22 = vsel %vm71_vm1, 0.0, %v8557_v36  ;;  %v2682_v23 = vsel %vm1763_vm14, %v8592_v24, 0.0 }
 0x835   :  { %v6825_v2 = vpack.c.bf16 %v2579_v43, %v2578_v22  ;;  %v9001_v43 = vld [vmem:[%s12018_s9 + $0x34] ss:$24 sps:$4 sm:$0xff]   ;;  %v6840_v22 = vpack.c.bf16 %v2681_v14, %v2680_v25  ;;  %v6845_v47 = vpack.c.bf16 %v2683_v41, %v2682_v23 }
 0x837   :  { %7421 = vmatprep.subr.msk.bf16.mxu0 %vm10118_vm13, %v6825_v2  ;;  %v8621_v2 = vpop.permute.xlu0 %8620 }
 0x838   :  { %7422 = vmatpush3.bf16.msk.msra.mxu0 %vm10118_vm13, %v6785_v13 }
 0x839   :  { %v8561_v6 = vpop.permute.xlu1 %8560 }
 0x83a   :  { %v8563_v7 = vunpack.i.h.bf16 %v8561_v6  ;;  %v8562_v53 = vunpack.i.l.bf16 %v8561_v6  ;;  %v8603_v6 = vunpack.i.h.bf16 %v8601_v11 }
 0x83c   :  { %v2581_v19 = vsel %vm71_vm1, 0.0, %v8563_v7  ;;  %v2580_v60 = vsel %vm71_vm1, 0.0, %v8562_v53  ;;  %v8602_v7 = vunpack.i.l.bf16 %v8601_v11  ;;  %v8613_v11 = vunpack.i.h.bf16 %v10605_v52 }
 0x83d   :  { %v6830_v1 = vpack.c.bf16 %v2581_v19, %v2580_v60  ;;  %v2686_v52 = vsel %vm1763_vm14, %v8612_v34, 0.0 }
 0x83e   :  { %v2687_v8 = vsel %vm1763_vm14, %v8613_v11, 0.0 }
 0x83f   :  { %7423 = vmatprep.subr.msk.bf16.mxu0 %vm10118_vm13, %v6830_v1  ;;  %v2685_v1 = vsel %vm1763_vm14, %v8603_v6, 0.0 }
 0x840   :  { %7424 = vmatpush3.bf16.msk.msra.mxu0 %vm10118_vm13, %v6790_v39  ;;  %v2684_v39 = vsel %vm1763_vm14, %v8602_v7, 0.0 }
 0x841   :  { %v8566_v5 = vpop.permute.xlu1 %8565  ;;  %v6850_v56 = vpack.c.bf16 %v2685_v1, %v2684_v39 }
 0x842   :  { %v8568_v26 = vunpack.i.h.bf16 %v8566_v5  ;;  %v8567_v44 = vunpack.i.l.bf16 %v8566_v5 }
 0x844   :  { %v2583_v59 = vsel %vm71_vm1, 0.0, %v8568_v26  ;;  %v2582_v51 = vsel %vm71_vm1, 0.0, %v8567_v44 }
 0x845   :  { %v6835_v63 = vpack.c.bf16 %v2583_v59, %v2582_v51  ;;  %v8576_v0 = vpop.permute.xlu1 %8575  ;;  %v8623_v59 = vunpack.i.h.bf16 %v8621_v2 }
 0x846   :  { %v8578_v45 = vunpack.i.h.bf16 %v8576_v0  ;;  %v8577_v30 = vunpack.i.l.bf16 %v8576_v0 }
 0x847   :  { %7425 = vmatprep.subr.msk.bf16.mxu0 %vm10118_vm13, %v6835_v63  ;;  %v2689_v25 = vsel %vm1763_vm14, %v8623_v59, 0.0  ;;  %v9018_v59 = vld [vmem:[%s12018_s9 + $0x120] ss:$24 sps:$4 sm:$0xff]  }
 0x848   :  { %v2697_v32 = vsel %vm1763_vm14, %v8578_v45, 0.0  ;;  %v2696_v36 = vsel %vm1763_vm14, %v8577_v30, 0.0  ;;  %7426 = vmatpush3.bf16.msk.msra.mxu0 %vm10118_vm13, %v6795_v58  ;;  %v6855_v58 = vpack.c.bf16 %v2687_v8, %v2686_v52  ;;  %v9015_v8 = vld [vmem:[%s12018_s9 + $0xf0] ss:$24 sps:$4 sm:$0xff]   ;;  %v9058_v52 = vld [vmem:[%s12018_s9 + $0x74] ss:$24 sps:$4 sm:$0xff]  }
 0x849   :  { %v6880_v54 = vpack.c.bf16 %v2697_v32, %v2696_v36  ;;  %v8586_v42 = vpop.permute.xlu1 %8585  ;;  %7523 = vmatprep.subr.bf16.mxu0 %v10369_v37 }
 0x84a   :  { %v8588_v13 = vunpack.i.h.bf16 %v8586_v42  ;;  %v8587_v40 = vunpack.i.l.bf16 %v8586_v42  ;;  %v9007_v42 = vld [vmem:[%s12018_s9 + $0x94] ss:$24 sps:$4 sm:$0xff]  }
 0x84b   :  { %3625 = vmatmul.mubr.bf16.vlgmr.msra.gmra.mrb[56].mxu0 %v8998_v31  ;;  %7635 = vmatprep.subr.msk.bf16.mxu1 %vm10159_vm0, %v6880_v54 }
 0x84c   :  { %v2699_v46 = vsel %vm1763_vm14, %v8588_v13, 0.0  ;;  %v2698_v37 = vsel %vm1763_vm14, %v8587_v40, 0.0  ;;  %7524 = vmatpush3.bf16.msra.mxu0 %v10307_v27  ;;  %7636 = vmatpush3.bf16.msk.msra.mxu1 %vm10159_vm0, %v6840_v22  ;;  %v9003_v27 = vld [vmem:[%s12018_s9 + $0x30] ss:$24 sps:$4 sm:$0xff]  }
 0x84d   :  { %v6885_v53 = vpack.c.bf16 %v2699_v46, %v2698_v37  ;;  %v8596_v61 = vpop.permute.xlu1 %8595  ;;  %7525 = vmatprep.subr.bf16.mxu0 %v10381_v17  ;;  %3632 = vmatprep.mubr.bf16.mxu0 %v9001_v43  ;;  %v8631_v17 = vpop.permute.xlu0 %8630 }
 0x84e   :  { %v8598_v19 = vunpack.i.h.bf16 %v8596_v61  ;;  %v8597_v60 = vunpack.i.l.bf16 %v8596_v61  ;;  %v8633_v24 = vunpack.i.h.bf16 %v8631_v17  ;;  %v8632_v31 = vunpack.i.l.bf16 %v8631_v17 }
 0x84f   :  { %7637 = vmatprep.subr.msk.bf16.mxu1 %vm10159_vm0, %v6885_v53 }
 0x850   :  { %v2701_v21 = vsel %vm1763_vm14, %v8598_v19, 0.0  ;;  %v2700_v5 = vsel %vm1763_vm14, %v8597_v60, 0.0  ;;  %7526 = vmatpush3.bf16.msra.mxu0 %v10315_v35  ;;  %7638 = vmatpush3.bf16.msk.msra.mxu1 %vm10159_vm0, %v6845_v47  ;;  %v8622_v35 = vunpack.i.l.bf16 %v8621_v2  ;;  %v2691_v13 = vsel %vm1763_vm14, %v8633_v24, 0.0  ;;  %v9027_v24 = vld [vmem:[%s12018_s9 + $0x1b0] ss:$24 sps:$4 sm:$0xff]  }
 0x851   :  { %v6890_v26 = vpack.c.bf16 %v2701_v21, %v2700_v5  ;;  %v8606_v44 = vpop.permute.xlu1 %8605  ;;  %7527 = vmatprep.subr.bf16.mxu0 %v10393_v16  ;;  %v8641_v45 = vpop.permute.xlu0 %8640  ;;  %v2690_v40 = vsel %vm1763_vm14, %v8632_v31, 0.0  ;;  %v9080_v31 = vld [vmem:[%s12018_s9 + $0x100] ss:$24 sps:$4 sm:$0xff]  }
 0x852   :  { %v8608_v57 = vunpack.i.h.bf16 %v8606_v44  ;;  %v8607_v49 = vunpack.i.l.bf16 %v8606_v44  ;;  %v2688_v20 = vsel %vm1763_vm14, %v8622_v35, 0.0  ;;  %v8643_v41 = vunpack.i.h.bf16 %v8641_v45  ;;  %v9062_v35 = vld [vmem:[%s12018_s9 + $0x70] ss:$24 sps:$4 sm:$0xff]  }
 0x853   :  { %3633 = vmatmul.mubr.bf16.gmra.mrb[60].mxu0 %v9003_v27  ;;  %7639 = vmatprep.subr.msk.bf16.mxu1 %vm10159_vm0, %v6890_v26  ;;  %v6860_v43 = vpack.c.bf16 %v2689_v25, %v2688_v20  ;;  %v6865_v37 = vpack.c.bf16 %v2691_v13, %v2690_v40  ;;  %v9010_v27 = vld [vmem:[%s12018_s9 + $0xc4] ss:$24 sps:$4 sm:$0xff]   ;;  %v9025_v25 = vld [vmem:[%s12018_s9 + $0x1b4] ss:$24 sps:$4 sm:$0xff]   ;;  %v9036_v40 = vld [vmem:[%s12018_s9 + $0x240] ss:$24 sps:$4 sm:$0xff]  }
 0x854   :  { %v2703_v51 = vsel %vm1763_vm14, %v8608_v57, 0.0  ;;  %v2702_v16 = vsel %vm1763_vm14, %v8607_v49, 0.0  ;;  %7528 = vmatpush3.bf16.msra.mxu0 %v10323_v48  ;;  %7640 = vmatpush3.bf16.msk.msra.mxu1 %vm10159_vm0, %v6850_v56  ;;  %v9006_v48 = vld [vmem:[%s12018_s9 + $0x60] ss:$24 sps:$4 sm:$0xff]   ;;  %v2693_v47 = vsel %vm1763_vm14, %v8643_v41, 0.0 }
 0x855   :  { %v6895_v63 = vpack.c.bf16 %v2703_v51, %v2702_v16  ;;  %v8616_v0 = vpop.permute.xlu1 %8615  ;;  %7529 = vmatprep.subr.bf16.mxu0 %v10404_v29  ;;  %3640 = vmatprep.mubr.bf16.mxu0 %v9004_v62  ;;  %v8651_v23 = vpop.permute.xlu0 %8650  ;;  %v9012_v57 = vld [vmem:[%s12018_s9 + $0xc0] ss:$24 sps:$4 sm:$0xff]   ;;  %v9046_v49 = vld [vmem:[%s12018_s9 + $0x10] ss:$24 sps:$4 sm:$0xff]   ;;  %v9019_v51 = vld [vmem:[%s12018_s9 + $0x154] ss:$24 sps:$4 sm:$0xff]  }
 0x856   :  { %v8618_v30 = vunpack.i.h.bf16 %v8616_v0  ;;  %v8617_v14 = vunpack.i.l.bf16 %v8616_v0  ;;  %v8653_v60 = vunpack.i.h.bf16 %v8651_v23  ;;  %v8652_v1 = vunpack.i.l.bf16 %v8651_v23  ;;  %v9064_v16 = vld [vmem:[%s12018_s9 + $0xa4] ss:$24 sps:$4 sm:$0xff]   ;;  %v9068_v0 = vld [vmem:[%s12018_s9 + $0xa0] ss:$24 sps:$4 sm:$0xff]   ;;  %v9094_v13 = vld [vmem:[%s12018_s9 + $0x194] ss:$24 sps:$4 sm:$0xff]  }
 0x857   :  { %7641 = vmatprep.subr.msk.bf16.mxu1 %vm10159_vm0, %v6895_v63  ;;  %v9021_v63 = vld [vmem:[%s12018_s9 + $0x150] ss:$24 sps:$4 sm:$0xff]   ;;  %v9076_v20 = vld [vmem:[%s12018_s9 + $0x104] ss:$24 sps:$4 sm:$0xff]  }
 0x858   :  { %v2705_v29 = vsel %vm1763_vm14, %v8618_v30, 0.0  ;;  %v2704_v32 = vsel %vm1763_vm14, %v8617_v14, 0.0  ;;  %7530 = vmatpush3.bf16.msra.mxu0 %v10333_v9  ;;  %7642 = vmatpush3.bf16.msk.msra.mxu1 %vm10159_vm0, %v6855_v58  ;;  %v8642_v9 = vunpack.i.l.bf16 %v8641_v45  ;;  %v2695_v26 = vsel %vm1763_vm14, %v8653_v60, 0.0  ;;  %v9022_v58 = vld [vmem:[%s12018_s9 + $0x184] ss:$24 sps:$4 sm:$0xff]  }
 0x859   :  { %v6900_v36 = vpack.c.bf16 %v2705_v29, %v2704_v32  ;;  %v8626_v54 = vpop.permute.xlu1 %8625  ;;  %7531 = vmatprep.subr.bf16.mxu0 %v10419_v33  ;;  %v2694_v44 = vsel %vm1763_vm14, %v8652_v1, 0.0  ;;  %v9070_v45 = vld [vmem:[%s12018_s9 + $0xd4] ss:$24 sps:$4 sm:$0xff]   ;;  %v9024_v30 = vld [vmem:[%s12018_s9 + $0x180] ss:$24 sps:$4 sm:$0xff]  }
 0x85a   :  { %v8628_v22 = vunpack.i.h.bf16 %v8626_v54  ;;  %v8627_v2 = vunpack.i.l.bf16 %v8626_v54  ;;  %v2692_v19 = vsel %vm1763_vm14, %v8642_v9, 0.0  ;;  %v6875_v56 = vpack.c.bf16 %v2695_v26, %v2694_v44  ;;  %v9074_v14 = vld [vmem:[%s12018_s9 + $0xd0] ss:$24 sps:$4 sm:$0xff]   ;;  %v9082_v29 = vld [vmem:[%s12018_s9 + $0x134] ss:$24 sps:$4 sm:$0xff]  }
 0x85b   :  { %3641 = vmatmul.mubr.bf16.gmra.mrb[64].mxu0 %v9006_v48  ;;  %7643 = vmatprep.subr.msk.bf16.mxu1 %vm10159_vm0, %v6900_v36  ;;  %v6870_v17 = vpack.c.bf16 %v2693_v47, %v2692_v19  ;;  %v9028_v48 = vld [vmem:[%s12018_s9 + $0x1e4] ss:$24 sps:$4 sm:$0xff]   ;;  %v9030_v32 = vld [vmem:[%s12018_s9 + $0x1e0] ss:$24 sps:$4 sm:$0xff]   ;;  %v9086_v36 = vld [vmem:[%s12018_s9 + $0x130] ss:$24 sps:$4 sm:$0xff]  }
 0x85c   :  { %v2707_v33 = vsel %vm1763_vm14, %v8628_v22, 0.0  ;;  %v2706_v6 = vsel %vm1763_vm14, %v8627_v2, 0.0  ;;  %7532 = vmatpush3.bf16.msra.mxu0 %v10341_v18  ;;  %7644 = vmatpush3.bf16.msk.msra.mxu1 %vm10159_vm0, %v6860_v43  ;;  %v9009_v18 = vld [vmem:[%s12018_s9 + $0x90] ss:$24 sps:$4 sm:$0xff]   ;;  %v9031_v54 = vld [vmem:[%s12018_s9 + $0x214] ss:$24 sps:$4 sm:$0xff]  }
 0x85d   :  { %v6905_v7 = vpack.c.bf16 %v2707_v33, %v2706_v6  ;;  %v8636_v46 = vpop.permute.xlu1 %8635  ;;  %7533 = vmatprep.subr.bf16.mxu0 %v10431_v10  ;;  %3648 = vmatprep.mubr.bf16.mxu0 %v9007_v42  ;;  %v9088_v42 = vld [vmem:[%s12018_s9 + $0x164] ss:$24 sps:$4 sm:$0xff]   ;;  %v9033_v43 = vld [vmem:[%s12018_s9 + $0x210] ss:$24 sps:$4 sm:$0xff]   ;;  %v9092_v22 = vld [vmem:[%s12018_s9 + $0x160] ss:$24 sps:$4 sm:$0xff]  }
 0x85e   :  { %v8638_v53 = vunpack.i.h.bf16 %v8636_v46  ;;  %v8637_v61 = vunpack.i.l.bf16 %v8636_v46  ;;  %v9034_v2 = vld [vmem:[%s12018_s9 + $0x244] ss:$24 sps:$4 sm:$0xff]   ;;  %v9098_v41 = vld [vmem:[%s12018_s9 + $0x190] ss:$24 sps:$4 sm:$0xff]   ;;  %v9037_v9 = vld [vmem:[%s12018_s9 + $0x274] ss:$24 sps:$4 sm:$0xff]  }
 0x85f   :  { %7645 = vmatprep.subr.msk.bf16.mxu1 %vm10159_vm0, %v6905_v7  ;;  %v9100_v23 = vld [vmem:[%s12018_s9 + $0x1c4] ss:$24 sps:$4 sm:$0xff]   ;;  %v9039_v33 = vld [vmem:[%s12018_s9 + $0x270] ss:$24 sps:$4 sm:$0xff]   ;;  %v9104_v6 = vld [vmem:[%s12018_s9 + $0x1c0] ss:$24 sps:$4 sm:$0xff]  }
 0x860   :  { %v2709_v39 = vsel %vm1763_vm14, %v8638_v53, 0.0  ;;  %v2708_v10 = vsel %vm1763_vm14, %v8637_v61, 0.0  ;;  %7534 = vmatpush3.bf16.msra.mxu0 %v10349_v38  ;;  %7646 = vmatpush3.bf16.msk.msra.mxu1 %vm10159_vm0, %v6865_v37  ;;  %v9040_v7 = vld [vmem:[%s12018_s9 + $0x2a4] ss:$24 sps:$4 sm:$0xff]   ;;  %v9109_v46 = vld [vmem:[%s12018_s9 + $0x1f4] ss:$24 sps:$4 sm:$0xff]  }
 0x861   :  { %v6910_v11 = vpack.c.bf16 %v2709_v39, %v2708_v10  ;;  %v8646_v34 = vpop.permute.xlu1 %8645  ;;  %7535 = vmatprep.subr.bf16.mxu0 %v10442_v50  ;;  %v9042_v37 = vld [vmem:[%s12018_s9 + $0x2a0] ss:$24 sps:$4 sm:$0xff]   ;;  %v9111_v53 = vld [vmem:[%s12018_s9 + $0x1f0] ss:$24 sps:$4 sm:$0xff]   ;;  %v9043_v61 = vld [vmem:[%s12018_s9 + $0x2d4] ss:$24 sps:$4 sm:$0xff]  }
 0x862   :  { %v8648_v21 = vunpack.i.h.bf16 %v8646_v34  ;;  %v8647_v5 = vunpack.i.l.bf16 %v8646_v34  ;;  %v9115_v47 = vld [vmem:[%s12018_s9 + $0x224] ss:$24 sps:$4 sm:$0xff]   ;;  %v9045_v19 = vld [vmem:[%s12018_s9 + $0x2d0] ss:$24 sps:$4 sm:$0xff]   ;;  %v9117_v60 = vld [vmem:[%s12018_s9 + $0x220] ss:$24 sps:$4 sm:$0xff]  }
 0x863   :  { %3649 = vmatmul.mubr.bf16.gmra.mrb[68].mxu0 %v9009_v18  ;;  %7647 = vmatprep.subr.msk.bf16.mxu1 %vm10159_vm0, %v6910_v11  ;;  %v9051_v1 = vld [vmem:[%s12018_s9 + $0xc] ss:$24 sps:$4 sm:$0xff]   ;;  %v9049_v39 = vld [vmem:[%s12018_s9 + $0x8] ss:$24 sps:$4 sm:$0xff]   ;;  %v9054_v11 = vld [vmem:[%s12018_s9 + $0x3c] ss:$24 sps:$4 sm:$0xff]  }
 0x864   :  { %v2711_v38 = vsel %vm1763_vm14, %v8648_v21, 0.0  ;;  %v2710_v62 = vsel %vm1763_vm14, %v8647_v5, 0.0  ;;  %7536 = vmatpush3.bf16.msra.mxu0 %v10357_v4  ;;  %7648 = vmatpush3.bf16.msk.msra.mxu1 %vm10159_vm0, %v6870_v17  ;;  %v9013_v4 = vld [vmem:[%s12018_s9 + $0xf4] ss:$24 sps:$4 sm:$0xff]   ;;  %v9123_v10 = vld [vmem:[%s12018_s9 + $0x250] ss:$24 sps:$4 sm:$0xff]  }
 0x865   :  { %v6915_v50 = vpack.c.bf16 %v2711_v38, %v2710_v62  ;;  %7537 = vmatprep.subr.bf16.mxu0 %v10456_v3  ;;  %3656 = vmatprep.mubr.bf16.mxu0 %v9010_v27  ;;  %v9052_v3 = vld [vmem:[%s12018_s9 + $0x44] ss:$24 sps:$4 sm:$0xff]   ;;  %v9121_v18 = vld [vmem:[%s12018_s9 + $0x254] ss:$24 sps:$4 sm:$0xff]   ;;  %v9057_v27 = vld [vmem:[%s12018_s9 + $0x38] ss:$24 sps:$4 sm:$0xff]  }
 0x866   :  { %v9127_v34 = vld [vmem:[%s12018_s9 + $0x284] ss:$24 sps:$4 sm:$0xff]   ;;  %v9129_v17 = vld [vmem:[%s12018_s9 + $0x280] ss:$24 sps:$4 sm:$0xff]   ;;  %v9133_v5 = vld [vmem:[%s12018_s9 + $0x2b4] ss:$24 sps:$4 sm:$0xff]  }
 0x867   :  { %7649 = vmatprep.subr.msk.bf16.mxu1 %vm10159_vm0, %v6915_v50  ;;  %v9060_v21 = vld [vmem:[%s12018_s9 + $0x6c] ss:$24 sps:$4 sm:$0xff]   ;;  %v9063_v26 = vld [vmem:[%s12018_s9 + $0x68] ss:$24 sps:$4 sm:$0xff]   ;;  %v9066_v38 = vld [vmem:[%s12018_s9 + $0x9c] ss:$24 sps:$4 sm:$0xff]  }
 0x868   :  { %7538 = vmatpush3.bf16.msra.mxu0 %v10360_v15  ;;  %7650 = vmatpush3.bf16.msk.msra.mxu1 %vm10159_vm0, %v6875_v56  ;;  %v9016_v15 = vld [vmem:[%s12018_s9 + $0x124] ss:$24 sps:$4 sm:$0xff]   ;;  %v9135_v44 = vld [vmem:[%s12018_s9 + $0x2b0] ss:$24 sps:$4 sm:$0xff]   ;;  %v9141_v56 = vld [vmem:[%s12018_s9 + $0x2e0] ss:$24 sps:$4 sm:$0xff]  }
 0x869   :  { %v9139_v62 = vld [vmem:[%s12018_s9 + $0x2e4] ss:$24 sps:$4 sm:$0xff]   ;;  %v9069_v50 = vld [vmem:[%s12018_s9 + $0x98] ss:$24 sps:$4 sm:$0xff]  }
 0x86b   :  { %3657 = vmatmul.mubr.bf16.gmra.mrb[72].mxu0 %v9012_v57  ;;  %3947 = vmatmul.mubr.bf16.vlgmr.msra.gmra.mrb[104].mxu1 %v9046_v49  ;;  %v9072_v57 = vld [vmem:[%s12018_s9 + $0xcc] ss:$24 sps:$4 sm:$0xff]   ;;  %v9075_v49 = vld [vmem:[%s12018_s9 + $0xc8] ss:$24 sps:$4 sm:$0xff]  }
 0x86c   :  { %3664 = vmatprep.mubr.bf16.mxu0 %v9013_v4  ;;  %3954 = vmatprep.mubr.bf16.mxu1 %v9052_v3  ;;  %v9078_v4 = vld [vmem:[%s12018_s9 + $0xfc] ss:$24 sps:$4 sm:$0xff]   ;;  %v9081_v3 = vld [vmem:[%s12018_s9 + $0xf8] ss:$24 sps:$4 sm:$0xff]  }
 0x873   :  { %3665 = vmatmul.mubr.bf16.gmra.mrb[76].mxu0 %v9015_v8  ;;  %3955 = vmatmul.mubr.bf16.gmra.mrb[108].mxu1 %v9056_v55  ;;  %v9084_v8 = vld [vmem:[%s12018_s9 + $0x12c] ss:$24 sps:$4 sm:$0xff]   ;;  %v9087_v55 = vld [vmem:[%s12018_s9 + $0x128] ss:$24 sps:$4 sm:$0xff]  }
 0x874   :  { %3672 = vmatprep.mubr.bf16.mxu0 %v9016_v15  ;;  %3962 = vmatprep.mubr.bf16.mxu1 %v9058_v52  ;;  %v9090_v15 = vld [vmem:[%s12018_s9 + $0x15c] ss:$24 sps:$4 sm:$0xff]   ;;  %v9093_v52 = vld [vmem:[%s12018_s9 + $0x158] ss:$24 sps:$4 sm:$0xff]  }
 0x87b   :  { %3673 = vmatmul.mubr.bf16.gmra.mrb[80].mxu0 %v9018_v59  ;;  %3963 = vmatmul.mubr.bf16.gmra.mrb[112].mxu1 %v9062_v35  ;;  %v9096_v59 = vld [vmem:[%s12018_s9 + $0x18c] ss:$24 sps:$4 sm:$0xff]   ;;  %v9099_v35 = vld [vmem:[%s12018_s9 + $0x188] ss:$24 sps:$4 sm:$0xff]  }
 0x87c   :  { %3680 = vmatprep.mubr.bf16.mxu0 %v9019_v51  ;;  %3970 = vmatprep.mubr.bf16.mxu1 %v9064_v16  ;;  %v9102_v51 = vld [vmem:[%s12018_s9 + $0x1bc] ss:$24 sps:$4 sm:$0xff]   ;;  %v9105_v16 = vld [vmem:[%s12018_s9 + $0x1b8] ss:$24 sps:$4 sm:$0xff]  }
 0x883   :  { %3681 = vmatmul.mubr.bf16.gmra.mrb[84].mxu0 %v9021_v63  ;;  %3971 = vmatmul.mubr.bf16.gmra.mrb[116].mxu1 %v9068_v0  ;;  %v9106_v63 = vld [vmem:[%s12018_s9 + $0x1ec] ss:$24 sps:$4 sm:$0xff]   ;;  %v9108_v0 = vld [vmem:[%s12018_s9 + $0x1e8] ss:$24 sps:$4 sm:$0xff]  }
 0x884   :  { %3688 = vmatprep.mubr.bf16.mxu0 %v9022_v58  ;;  %3978 = vmatprep.mubr.bf16.mxu1 %v9070_v45  ;;  %v9112_v58 = vld [vmem:[%s12018_s9 + $0x21c] ss:$24 sps:$4 sm:$0xff]  }
 0x88b   :  { %3689 = vmatmul.mubr.bf16.gmra.mrb[88].mxu0 %v9024_v30  ;;  %3979 = vmatmul.mubr.bf16.gmra.mrb[120].mxu1 %v9074_v14  ;;  %v9114_v14 = vld [vmem:[%s12018_s9 + $0x218] ss:$24 sps:$4 sm:$0xff]  }
 0x88c   :  { %3696 = vmatprep.mubr.bf16.mxu0 %v9025_v25  ;;  %3986 = vmatprep.mubr.bf16.mxu1 %v9076_v20 }
 0x893   :  { %3697 = vmatmul.mubr.bf16.gmra.mrb[92].mxu0 %v9027_v24  ;;  %3987 = vmatmul.mubr.bf16.gmra.mrb[124].mxu1 %v9080_v31  ;;  %v9118_v24 = vld [vmem:[%s12018_s9 + $0x24c] ss:$24 sps:$4 sm:$0xff]  }
 0x894   :  { %3704 = vmatprep.mubr.bf16.mxu0 %v9028_v48  ;;  %3994 = vmatprep.mubr.bf16.mxu1 %v9082_v29  ;;  %v9142_v29 = vld [vmem:[%s12019_s11] sm:$0xff]  }
 0x895   :  { %8156 = vmatprep.subr.bf16.mxu0 %v9142_v29 }
 0x89b   :  { %3705 = vmatmul.mubr.bf16.gmra.mrb[96].mxu0 %v9030_v32  ;;  %3995 = vmatmul.mubr.bf16.gmra.mrb[128].mxu1 %v9086_v36 }
 0x89c   :  { %3712 = vmatprep.mubr.bf16.mxu0 %v9031_v54  ;;  %4002 = vmatprep.mubr.bf16.mxu1 %v9088_v42  ;;  %v9120_v54 = vld [vmem:[%s12018_s9 + $0x248] ss:$24 sps:$4 sm:$0xff]  }
 0x89d   :  { %v9143_v42 = vld [vmem:[%s12019_s11 + $0x8] sm:$0xff]  }
 0x8a3   :  { %3713 = vmatmul.mubr.bf16.gmra.mrb[100].mxu0 %v9033_v43  ;;  %4003 = vmatmul.mubr.bf16.gmra.mrb[132].mxu1 %v9092_v22 }
 0x8a4   :  { %3720 = vmatprep.mubr.bf16.mxu0 %v9034_v2  ;;  %4010 = vmatprep.mubr.bf16.mxu1 %v9094_v13  ;;  %v9124_v2 = vld [vmem:[%s12018_s9 + $0x27c] ss:$24 sps:$4 sm:$0xff]  }
 0x8ab   :  { %3721 = vmatmul.mubr.bf16.gmra.mrb[104].mxu0 %v9036_v40  ;;  %4011 = vmatmul.mubr.bf16.gmra.mrb[136].mxu1 %v9098_v41  ;;  %v9144_v41 = vld [vmem:[%s12019_s11 + $0x10] sm:$0xff]  }
 0x8ac   :  { %3728 = vmatprep.mubr.bf16.mxu0 %v9037_v9  ;;  %4018 = vmatprep.mubr.bf16.mxu1 %v9100_v23 }
 0x8b3   :  { %3729 = vmatmul.mubr.bf16.gmra.mrb[108].mxu0 %v9039_v33  ;;  %4019 = vmatmul.mubr.bf16.gmra.mrb[140].mxu1 %v9104_v6  ;;  %v9126_v33 = vld [vmem:[%s12018_s9 + $0x278] ss:$24 sps:$4 sm:$0xff]  }
 0x8b4   :  { %3736 = vmatprep.mubr.bf16.mxu0 %v9040_v7  ;;  %4026 = vmatprep.mubr.bf16.mxu1 %v9109_v46  ;;  %v9145_v6 = vld [vmem:[%s12019_s11 + $0x18] sm:$0xff]  }
 0x8bb   :  { %3737 = vmatmul.mubr.bf16.gmra.mrb[112].mxu0 %v9042_v37  ;;  %4027 = vmatmul.mubr.bf16.gmra.mrb[144].mxu1 %v9111_v53  ;;  %v9130_v37 = vld [vmem:[%s12018_s9 + $0x2ac] ss:$24 sps:$4 sm:$0xff]  }
 0x8bc   :  { %3744 = vmatprep.mubr.bf16.mxu0 %v9043_v61  ;;  %4034 = vmatprep.mubr.bf16.mxu1 %v9115_v47 }
 0x8c3   :  { %3745 = vmatmul.mubr.bf16.gmra.mrb[116].mxu0 %v9045_v19  ;;  %4035 = vmatmul.mubr.bf16.gmra.mrb[148].mxu1 %v9117_v60  ;;  %v9132_v60 = vld [vmem:[%s12018_s9 + $0x2a8] ss:$24 sps:$4 sm:$0xff]  }
 0x8c4   :  { %3785 = vmatprep.mubr.bf16.mxu0 %v9051_v1  ;;  %4042 = vmatprep.mubr.bf16.mxu1 %v9121_v18 }
 0x8cb   :  { %3786 = vmatmul.mubr.bf16.vlgmr.msra.gmra.mrb[120].mxu0 %v9049_v39  ;;  %4043 = vmatmul.mubr.bf16.gmra.mrb[152].mxu1 %v9123_v10  ;;  %v9136_v39 = vld [vmem:[%s12018_s9 + $0x2dc] ss:$24 sps:$4 sm:$0xff]  }
 0x8cc   :  { %3793 = vmatprep.mubr.bf16.mxu0 %v9054_v11  ;;  %4050 = vmatprep.mubr.bf16.mxu1 %v9127_v34 }
 0x8cd   :  { %8157 = vmatpush3.bf16.msra.mxu0 %v9142_v29 }
 0x8ce   :  { %8158 = vmatprep.subr.bf16.mxu0 %v9143_v42 }
 0x8d1   :  { %8159 = vmatpush3.bf16.msra.mxu0 %v9143_v42 }
 0x8d2   :  { %8160 = vmatprep.subr.bf16.mxu0 %v9144_v41 }
 0x8d3   :  { %3794 = vmatmul.mubr.bf16.gmra.mrb[124].mxu0 %v9057_v27  ;;  %4051 = vmatmul.mubr.bf16.gmra.mrb[156].mxu1 %v9129_v17 }
 0x8d4   :  { %3801 = vmatprep.mubr.bf16.mxu0 %v9060_v21  ;;  %4058 = vmatprep.mubr.bf16.mxu1 %v9133_v5  ;;  %v9138_v21 = vld [vmem:[%s12018_s9 + $0x2d8] ss:$24 sps:$4 sm:$0xff]  }
 0x8d5   :  { %8161 = vmatpush3.bf16.msra.mxu0 %v9144_v41 }
 0x8d6   :  { %8162 = vmatprep.subr.bf16.mxu0 %v9145_v6 }
 0x8d9   :  { %8163 = vmatpush3.bf16.msra.mxu0 %v9145_v6 }
 0x8db   :  { %3802 = vmatmul.mubr.bf16.gmra.mrb[128].mxu0 %v9063_v26  ;;  %4059 = vmatmul.mubr.bf16.gmra.mrb[160].mxu1 %v9135_v44 }
 0x8dc   :  { %3809 = vmatprep.mubr.bf16.mxu0 %v9066_v38  ;;  %4066 = vmatprep.mubr.bf16.mxu1 %v9139_v62 }
 0x8e3   :  { %3810 = vmatmul.mubr.bf16.gmra.mrb[132].mxu0 %v9069_v50  ;;  %4067 = vmatmul.mubr.bf16.gmra.mrb[164].mxu1 %v9141_v56 }
 0x8e4   :  { %3817 = vmatprep.mubr.bf16.mxu0 %v9072_v57 }
 0x8eb   :  { %3818 = vmatmul.mubr.bf16.gmra.mrb[136].mxu0 %v9075_v49 }
 0x8ec   :  { %3825 = vmatprep.mubr.bf16.mxu0 %v9078_v4 }
 0x8f3   :  { %3826 = vmatmul.mubr.bf16.gmra.mrb[140].mxu0 %v9081_v3 }
 0x8f4   :  { %3833 = vmatprep.mubr.bf16.mxu0 %v9084_v8 }
 0x8fb   :  { %3834 = vmatmul.mubr.bf16.gmra.mrb[144].mxu0 %v9087_v55 }
 0x8fc   :  { %3841 = vmatprep.mubr.bf16.mxu0 %v9090_v15 }
 0x903   :  { %3842 = vmatmul.mubr.bf16.gmra.mrb[148].mxu0 %v9093_v52 }
 0x904   :  { %3849 = vmatprep.mubr.bf16.mxu0 %v9096_v59 }
 0x90b   :  { %3850 = vmatmul.mubr.bf16.gmra.mrb[152].mxu0 %v9099_v35 }
 0x90c   :  { %3857 = vmatprep.mubr.bf16.mxu0 %v9102_v51 }
 0x913   :  { %3858 = vmatmul.mubr.bf16.gmra.mrb[156].mxu0 %v9105_v16 }
 0x914   :  { %3865 = vmatprep.mubr.bf16.mxu0 %v9106_v63 }
 0x91b   :  { %3866 = vmatmul.mubr.bf16.gmra.mrb[160].mxu0 %v9108_v0 }
 0x91c   :  { %3873 = vmatprep.mubr.bf16.mxu0 %v9112_v58 }
 0x91e   :  { %v7427_v45 = vpop.f32.mrb[56].mxu0 }
 0x91f   :  { %v7428_v30 = vpop.f32.mrb[57].mxu0 }
 0x920   :  { %v10953_v25 = vadd.f32 %v7428_v30, %v7427_v45  ;;  %v7430_v20 = vpop.f32.mrb[58].mxu0 }
 0x921   :  { %v7431_v31 = vpop.f32.mrb[59].mxu0 }
 0x922   :  { %v10958_v48 = vadd.f32 %v7431_v31, %v7430_v20 }
 0x923   :  { %3874 = vmatmul.mubr.bf16.gmra.mrb[164].mxu0 %v9114_v14 }
 0x924   :  { %3881 = vmatprep.mubr.bf16.mxu0 %v9118_v24 }
 0x926   :  { %v7433_v32 = vpop.f32.mrb[60].mxu0 }
 0x927   :  { %v7434_v36 = vpop.f32.mrb[61].mxu0 }
 0x928   :  { %v10969_v43 = vadd.f32 %v7434_v36, %v7433_v32  ;;  %v7436_v22 = vpop.f32.mrb[62].mxu0 }
 0x929   :  { %v7437_v13 = vpop.f32.mrb[63].mxu0 }
 0x92a   :  { %v10974_v40 = vadd.f32 %v7437_v13, %v7436_v22 }
 0x92b   :  { %3882 = vmatmul.mubr.bf16.gmra.mrb[168].mxu0 %v9120_v54 }
 0x92c   :  { %3889 = vmatprep.mubr.bf16.mxu0 %v9124_v2 }
 0x92e   :  { %v7439_v9 = vpop.f32.mrb[64].mxu0 }
 0x92f   :  { %v7440_v23 = vpop.f32.mrb[65].mxu0 }
 0x930   :  { %v10985_v7 = vadd.f32 %v7440_v23, %v7439_v9  ;;  %v7442_v46 = vpop.f32.mrb[66].mxu0 }
 0x931   :  { %v7443_v53 = vpop.f32.mrb[67].mxu0 }
 0x932   :  { %v10990_v61 = vadd.f32 %v7443_v53, %v7442_v46 }
 0x933   :  { %3890 = vmatmul.mubr.bf16.gmra.mrb[172].mxu0 %v9126_v33 }
 0x934   :  { %3897 = vmatprep.mubr.bf16.mxu0 %v9130_v37 }
 0x936   :  { %v7445_v47 = vpop.f32.mrb[68].mxu0 }
 0x937   :  { %v7446_v19 = vpop.f32.mrb[69].mxu0 }
 0x938   :  { %v10995_v1 = vadd.f32 %v7446_v19, %v7445_v47  ;;  %v7448_v18 = vpop.f32.mrb[70].mxu0 }
 0x939   :  { %v7449_v10 = vpop.f32.mrb[71].mxu0 }
 0x93a   :  { %v11000_v11 = vadd.f32 %v7449_v10, %v7448_v18 }
 0x93b   :  { %3898 = vmatmul.mubr.bf16.gmra.mrb[176].mxu0 %v9132_v60 }
 0x93c   :  { %3905 = vmatprep.mubr.bf16.mxu0 %v9136_v39 }
 0x93e   :  { %v7451_v34 = vpop.f32.mrb[72].mxu0  ;;  %v7651_v27 = vpop.f32.mrb[104].mxu1 }
 0x93f   :  { %v7452_v17 = vpop.f32.mrb[73].mxu0  ;;  %v7652_v5 = vpop.f32.mrb[105].mxu1 }
 0x940   :  { %v11005_v26 = vadd.f32 %v7452_v17, %v7451_v34  ;;  %v7454_v44 = vpop.f32.mrb[74].mxu0  ;;  %v11007_v38 = vadd.f32 %v7652_v5, %v7651_v27  ;;  %v7654_v62 = vpop.f32.mrb[106].mxu1 }
 0x941   :  { %v7455_v50 = vpop.f32.mrb[75].mxu0  ;;  %v7655_v56 = vpop.f32.mrb[107].mxu1 }
 0x942   :  { %v11009_v57 = vadd.f32 %v7455_v50, %v7454_v44  ;;  %v11011_v49 = vadd.f32 %v7655_v56, %v7654_v62 }
 0x943   :  { %3906 = vmatmul.mubr.bf16.gmra.mrb[180].mxu0 %v9138_v21 }
 0x946   :  { %v7457_v4 = vpop.f32.mrb[76].mxu0  ;;  %v7657_v3 = vpop.f32.mrb[108].mxu1 }
 0x947   :  { %v7458_v8 = vpop.f32.mrb[77].mxu0  ;;  %v7658_v55 = vpop.f32.mrb[109].mxu1 }
 0x948   :  { %v11013_v15 = vadd.f32 %v7458_v8, %v7457_v4  ;;  %v7460_v52 = vpop.f32.mrb[78].mxu0  ;;  %v11015_v59 = vadd.f32 %v7658_v55, %v7657_v3  ;;  %v7660_v35 = vpop.f32.mrb[110].mxu1 }
 0x949   :  { %v7461_v51 = vpop.f32.mrb[79].mxu0  ;;  %v7661_v16 = vpop.f32.mrb[111].mxu1 }
 0x94a   :  { %v11017_v63 = vadd.f32 %v7461_v51, %v7460_v52  ;;  %v11019_v0 = vadd.f32 %v7661_v16, %v7660_v35 }
 0x94e   :  { %v7463_v58 = vpop.f32.mrb[80].mxu0  ;;  %v7663_v45 = vpop.f32.mrb[112].mxu1 }
 0x94f   :  { %v7464_v30 = vpop.f32.mrb[81].mxu0  ;;  %v7664_v14 = vpop.f32.mrb[113].mxu1 }
 0x950   :  { %v11021_v20 = vadd.f32 %v7464_v30, %v7463_v58  ;;  %v7466_v24 = vpop.f32.mrb[82].mxu0  ;;  %v11023_v31 = vadd.f32 %v7664_v14, %v7663_v45  ;;  %v7666_v29 = vpop.f32.mrb[114].mxu1 }
 0x951   :  { %v7467_v32 = vpop.f32.mrb[83].mxu0  ;;  %v7667_v36 = vpop.f32.mrb[115].mxu1 }
 0x952   :  { %v11025_v54 = vadd.f32 %v7467_v32, %v7466_v24  ;;  %v11027_v42 = vadd.f32 %v7667_v36, %v7666_v29 }
 0x956   :  { %v7469_v22 = vpop.f32.mrb[84].mxu0  ;;  %v7669_v2 = vpop.f32.mrb[116].mxu1 }
 0x957   :  { %v7470_v13 = vpop.f32.mrb[85].mxu0  ;;  %v7670_v41 = vpop.f32.mrb[117].mxu1 }
 0x958   :  { %v11029_v9 = vadd.f32 %v7470_v13, %v7469_v22  ;;  %v7472_v23 = vpop.f32.mrb[86].mxu0  ;;  %v11031_v33 = vadd.f32 %v7670_v41, %v7669_v2  ;;  %v7672_v6 = vpop.f32.mrb[118].mxu1 }
 0x959   :  { %v7473_v46 = vpop.f32.mrb[87].mxu0  ;;  %v7673_v37 = vpop.f32.mrb[119].mxu1 }
 0x95a   :  { %v11033_v53 = vadd.f32 %v7473_v46, %v7472_v23  ;;  %v11035_v47 = vadd.f32 %v7673_v37, %v7672_v6 }
 0x95e   :  { %v7475_v19 = vpop.f32.mrb[88].mxu0  ;;  %v7675_v60 = vpop.f32.mrb[120].mxu1 }
 0x95f   :  { %v7476_v18 = vpop.f32.mrb[89].mxu0  ;;  %v7676_v39 = vpop.f32.mrb[121].mxu1 }
 0x960   :  { %v11037_v10 = vadd.f32 %v7476_v18, %v7475_v19  ;;  %v7478_v34 = vpop.f32.mrb[90].mxu0  ;;  %v11039_v27 = vadd.f32 %v7676_v39, %v7675_v60  ;;  %v7678_v17 = vpop.f32.mrb[122].mxu1 }
 0x961   :  { %v7479_v21 = vpop.f32.mrb[91].mxu0  ;;  %v7679_v5 = vpop.f32.mrb[123].mxu1 }
 0x962   :  { %v11041_v44 = vadd.f32 %v7479_v21, %v7478_v34  ;;  %v11043_v62 = vadd.f32 %v7679_v5, %v7678_v17 }
 0x966   :  { %v7481_v50 = vpop.f32.mrb[92].mxu0  ;;  %v7681_v56 = vpop.f32.mrb[124].mxu1 }
 0x967   :  { %v7482_v4 = vpop.f32.mrb[93].mxu0  ;;  %v7682_v3 = vpop.f32.mrb[125].mxu1 }
 0x968   :  { %v11045_v8 = vadd.f32 %v7482_v4, %v7481_v50  ;;  %v7484_v55 = vpop.f32.mrb[94].mxu0  ;;  %v11047_v52 = vadd.f32 %v7682_v3, %v7681_v56  ;;  %v7684_v35 = vpop.f32.mrb[126].mxu1 }
 0x969   :  { %v7485_v51 = vpop.f32.mrb[95].mxu0  ;;  %v7685_v16 = vpop.f32.mrb[127].mxu1 }
 0x96a   :  { %v11049_v58 = vadd.f32 %v7485_v51, %v7484_v55  ;;  %v11051_v45 = vadd.f32 %v7685_v16, %v7684_v35 }
 0x96e   :  { %v7487_v30 = vpop.f32.mrb[96].mxu0  ;;  %v7687_v14 = vpop.f32.mrb[128].mxu1 }
 0x96f   :  { %v7488_v24 = vpop.f32.mrb[97].mxu0  ;;  %v7688_v29 = vpop.f32.mrb[129].mxu1 }
 0x970   :  { %v11053_v32 = vadd.f32 %v7488_v24, %v7487_v30  ;;  %v7490_v36 = vpop.f32.mrb[98].mxu0  ;;  %v11055_v22 = vadd.f32 %v7688_v29, %v7687_v14  ;;  %v7690_v2 = vpop.f32.mrb[130].mxu1 }
 0x971   :  { %v7491_v13 = vpop.f32.mrb[99].mxu0  ;;  %v7691_v41 = vpop.f32.mrb[131].mxu1 }
 0x972   :  { %v11057_v23 = vadd.f32 %v7491_v13, %v7490_v36  ;;  %v11059_v6 = vadd.f32 %v7691_v41, %v7690_v2 }
 0x976   :  { %v7493_v46 = vpop.f32.mrb[100].mxu0  ;;  %v7693_v37 = vpop.f32.mrb[132].mxu1 }
 0x977   :  { %v7494_v19 = vpop.f32.mrb[101].mxu0  ;;  %v7694_v60 = vpop.f32.mrb[133].mxu1 }
 0x978   :  { %v11061_v18 = vadd.f32 %v7494_v19, %v7493_v46  ;;  %v7496_v39 = vpop.f32.mrb[102].mxu0  ;;  %v11063_v34 = vadd.f32 %v7694_v60, %v7693_v37  ;;  %v7696_v17 = vpop.f32.mrb[134].mxu1 }
 0x979   :  { %v7497_v21 = vpop.f32.mrb[103].mxu0  ;;  %v7697_v5 = vpop.f32.mrb[135].mxu1 }
 0x97a   :  { %12061 = vst [vmem:[#allocation4_spill] sm:$0xff] %v11061_v18  ;;  %v11065_v50 = vadd.f32 %v7497_v21, %v7496_v39  ;;  %v11067_v56 = vadd.f32 %v7697_v5, %v7696_v17 }
 0x97c   :  { %12062 = vst [vmem:[#allocation5_spill] sm:$0xff] %v11065_v50 }
 0x97e   :  { %v7499_v4 = vpop.f32.mrb[104].mxu0  ;;  %v7699_v3 = vpop.f32.mrb[136].mxu1 }
 0x97f   :  { %v7500_v55 = vpop.f32.mrb[105].mxu0  ;;  %v7700_v35 = vpop.f32.mrb[137].mxu1 }
 0x980   :  { %v11069_v51 = vadd.f32 %v7500_v55, %v7499_v4  ;;  %v7502_v16 = vpop.f32.mrb[106].mxu0  ;;  %v11071_v30 = vadd.f32 %v7700_v35, %v7699_v3  ;;  %v7702_v14 = vpop.f32.mrb[138].mxu1 }
 0x981   :  { %v7503_v24 = vpop.f32.mrb[107].mxu0  ;;  %v7703_v29 = vpop.f32.mrb[139].mxu1 }
 0x982   :  { %12063 = vst [vmem:[#allocation6_spill] sm:$0xff] %v11069_v51  ;;  %v11073_v36 = vadd.f32 %v7503_v24, %v7502_v16  ;;  %v11075_v2 = vadd.f32 %v7703_v29, %v7702_v14 }
 0x984   :  { %12064 = vst [vmem:[#allocation7_spill] sm:$0xff] %v11073_v36 }
 0x986   :  { %v7505_v13 = vpop.f32.mrb[108].mxu0  ;;  %v7705_v41 = vpop.f32.mrb[140].mxu1 }
 0x987   :  { %v7506_v46 = vpop.f32.mrb[109].mxu0  ;;  %v7706_v37 = vpop.f32.mrb[141].mxu1 }
 0x988   :  { %v11077_v19 = vadd.f32 %v7506_v46, %v7505_v13  ;;  %v7508_v60 = vpop.f32.mrb[110].mxu0  ;;  %v11079_v39 = vadd.f32 %v7706_v37, %v7705_v41  ;;  %v7708_v17 = vpop.f32.mrb[142].mxu1 }
 0x989   :  { %v7509_v21 = vpop.f32.mrb[111].mxu0  ;;  %v7709_v5 = vpop.f32.mrb[143].mxu1 }
 0x98a   :  { %12065 = vst [vmem:[#allocation8_spill] sm:$0xff] %v11077_v19  ;;  %v11081_v4 = vadd.f32 %v7509_v21, %v7508_v60  ;;  %v11083_v3 = vadd.f32 %v7709_v5, %v7708_v17 }
 0x98c   :  { %12066 = vst [vmem:[#allocation9_spill] sm:$0xff] %v11081_v4 }
 0x98e   :  { %v7511_v55 = vpop.f32.mrb[112].mxu0  ;;  %v7711_v35 = vpop.f32.mrb[144].mxu1 }
 0x98f   :  { %v7512_v16 = vpop.f32.mrb[113].mxu0  ;;  %v7712_v14 = vpop.f32.mrb[145].mxu1 }
 0x990   :  { %v11085_v24 = vadd.f32 %v7512_v16, %v7511_v55  ;;  %v7514_v29 = vpop.f32.mrb[114].mxu0  ;;  %v11087_v12 = vadd.f32 %v7712_v14, %v7711_v35  ;;  %v7714_v13 = vpop.f32.mrb[146].mxu1 }
 0x991   :  { %v7515_v46 = vpop.f32.mrb[115].mxu0  ;;  %v7715_v41 = vpop.f32.mrb[147].mxu1 }
 0x992   :  { %12067 = vst [vmem:[#allocation10_spill] sm:$0xff] %v11085_v24  ;;  %12068 = vst [vmem:[#allocation11_spill] sm:$0xff] %v11087_v12  ;;  %v11089_v37 = vadd.f32 %v7515_v46, %v7514_v29  ;;  %v11091_v28 = vadd.f32 %v7715_v41, %v7714_v13  ;;  %v2960_v29 = vpop.permute.xlu0 %2959  ;;  %v2955_v46 = vpop.permute.xlu1 %2954 }
 0x993   :  { %v3627_v50 = vadd.f32 %v10953_v25, %v2955_v46 }
 0x994   :  { %12069 = vst [vmem:[#allocation12_spill] sm:$0xff] %v11089_v37  ;;  %12070 = vst [vmem:[#allocation13_spill] sm:$0xff] %v11091_v28 }
 0x996   :  { %v7517_v60 = vpop.f32.mrb[116].mxu0  ;;  %v7717_v21 = vpop.f32.mrb[148].mxu1 }
 0x997   :  { %v7518_v17 = vpop.f32.mrb[117].mxu0  ;;  %v7718_v5 = vpop.f32.mrb[149].mxu1 }
 0x998   :  { %v11093_v4 = vadd.f32 %v7518_v17, %v7517_v60  ;;  %v7520_v19 = vpop.f32.mrb[118].mxu0  ;;  %v11095_v36 = vadd.f32 %v7718_v5, %v7717_v21  ;;  %v7720_v55 = vpop.f32.mrb[150].mxu1 }
 0x999   :  { %v7521_v16 = vpop.f32.mrb[119].mxu0  ;;  %v7721_v35 = vpop.f32.mrb[151].mxu1 }
 0x99a   :  { %12071 = vst [vmem:[#allocation14_spill] sm:$0xff] %v11093_v4  ;;  %12072 = vst [vmem:[#allocation15_spill] sm:$0xff] %v11095_v36  ;;  %v11097_v14 = vadd.f32 %v7521_v16, %v7520_v19  ;;  %v11099_v24 = vadd.f32 %v7721_v35, %v7720_v55  ;;  %v3630_v19 = vadd.f32 %v10958_v48, %v2960_v29  ;;  %v2970_v18 = vpop.permute.xlu0 %2969  ;;  %v2965_v28 = vpop.permute.xlu1 %2964 }
 0x99c   :  { %12073 = vst [vmem:[#allocation16_spill] sm:$0xff] %v11097_v14  ;;  %12074 = vst [vmem:[#allocation17_spill] sm:$0xff] %v11099_v24 }
 0x99e   :  { %v7539_v13 = vpop.f32.mrb[120].mxu0  ;;  %v7723_v41 = vpop.f32.mrb[152].mxu1 }
 0x99f   :  { %v7540_v37 = vpop.f32.mrb[121].mxu0  ;;  %v7724_v51 = vpop.f32.mrb[153].mxu1 }
 0x9a0   :  { %v7541_v60 = vadd.f32 %v7540_v37, %v7539_v13  ;;  %v7542_v17 = vpop.f32.mrb[122].mxu0  ;;  %v11102_v4 = vadd.f32 %v7724_v51, %v7723_v41  ;;  %v7726_v21 = vpop.f32.mrb[154].mxu1  ;;  %v3635_v51 = vadd.f32 %v10969_v43, %v2965_v28 }
 0x9a1   :  { %v7543_v5 = vpop.f32.mrb[123].mxu0  ;;  %v7727_v36 = vpop.f32.mrb[155].mxu1 }
 0x9a2   :  { %12075 = vst [vmem:[#allocation18_spill] sm:$0xff] %v11102_v4  ;;  %v3788_v16 = vadd.f32 %v7541_v60, %v3627_v50  ;;  %v7544_v55 = vadd.f32 %v7543_v5, %v7542_v17  ;;  %v11105_v35 = vadd.f32 %v7727_v36, %v7726_v21 }
 0x9a4   :  { %v3949_v14 = vadd.f32 %v11007_v38, %v3788_v16  ;;  %v3791_v24 = vadd.f32 %v7544_v55, %v3630_v19  ;;  %v3638_v38 = vadd.f32 %v10974_v40, %v2970_v18  ;;  %v2975_v19 = vpop.permute.xlu1 %2974 }
 0x9a5   :  { %v3643_v40 = vadd.f32 %v10985_v7, %v2975_v19 }
 0x9a6   :  { %v3952_v25 = vadd.f32 %v11011_v49, %v3791_v24  ;;  %v7545_v37 = vpop.f32.mrb[124].mxu0  ;;  %v7729_v46 = vpop.f32.mrb[156].mxu1  ;;  %v4075_v4 = vmax.f32 %v3949_v14, 0.0 }
 0x9a7   :  { %v7546_v13 = vpop.f32.mrb[125].mxu0  ;;  %v7730_v41 = vpop.f32.mrb[157].mxu1 }
 0x9a8   :  { %v4076_v12 = vmax.f32 %v3952_v25, 0.0  ;;  %v7547_v48 = vadd.f32 %v7546_v13, %v7545_v37  ;;  %v7548_v50 = vpop.f32.mrb[126].mxu0  ;;  %v11110_v29 = vadd.f32 %v7730_v41, %v7729_v46  ;;  %v7732_v36 = vpop.f32.mrb[158].mxu1 }
 0x9a9   :  { %v7549_v60 = vpop.f32.mrb[127].mxu0  ;;  %v7733_v17 = vpop.f32.mrb[159].mxu1 }
 0x9aa   :  { %v4107_v21 = vpack.c.bf16 %v4076_v12, %v4075_v4  ;;  %v3796_v5 = vadd.f32 %v7547_v48, %v3635_v51  ;;  %v7550_v49 = vadd.f32 %v7549_v60, %v7548_v50  ;;  %v11113_v24 = vadd.f32 %v7733_v17, %v7732_v36  ;;  %v2980_v14 = vpop.permute.xlu0 %2979 }
 0x9ab   :  { %v3646_v41 = vadd.f32 %v10990_v61, %v2980_v14 }
 0x9ac   :  { %v3957_v28 = vadd.f32 %v11015_v59, %v3796_v5  ;;  %v3799_v43 = vadd.f32 %v7550_v49, %v3638_v38  ;;  %8164 = vmatprep.mubr.msk.bf16.mxu0 %vm2182_vm11, %v4107_v21  ;;  %v2985_v5 = vpop.permute.xlu1 %2984 }
 0x9ad   :  { %v3651_v61 = vadd.f32 %v10995_v1, %v2985_v5 }
 0x9ae   :  { %v3960_v16 = vadd.f32 %v11019_v0, %v3799_v43  ;;  %v7551_v55 = vpop.f32.mrb[128].mxu0  ;;  %v7735_v25 = vpop.f32.mrb[160].mxu1  ;;  %v4077_v12 = vmax.f32 %v3957_v28, 0.0 }
 0x9af   :  { %v7552_v18 = vpop.f32.mrb[129].mxu0  ;;  %v7736_v37 = vpop.f32.mrb[161].mxu1 }
 0x9b0   :  { %v4078_v4 = vmax.f32 %v3960_v16, 0.0  ;;  %v7553_v46 = vadd.f32 %v7552_v18, %v7551_v55  ;;  %v7554_v51 = vpop.f32.mrb[130].mxu0  ;;  %v11119_v13 = vadd.f32 %v7736_v37, %v7735_v25  ;;  %v7738_v59 = vpop.f32.mrb[162].mxu1 }
 0x9b1   :  { %v7555_v48 = vpop.f32.mrb[131].mxu0  ;;  %v7739_v50 = vpop.f32.mrb[163].mxu1 }
 0x9b2   :  { %v4108_v36 = vpack.c.bf16 %v4078_v4, %v4077_v12  ;;  %v3804_v38 = vadd.f32 %v7553_v46, %v3643_v40  ;;  %v7556_v0 = vadd.f32 %v7555_v48, %v7554_v51  ;;  %v11122_v60 = vadd.f32 %v7739_v50, %v7738_v59  ;;  %v2990_v21 = vpop.permute.xlu0 %2989 }
 0x9b3   :  { %v3654_v37 = vadd.f32 %v11000_v11, %v2990_v21 }
 0x9b4   :  { %v3965_v7 = vadd.f32 %v11023_v31, %v3804_v38  ;;  %v3807_v17 = vadd.f32 %v7556_v0, %v3646_v41  ;;  %8165 = vmatmul.mubr.msk.bf16.vlgmr.msra.gmra.mrb[184].mxu0 %vm2182_vm11, %v4108_v36  ;;  %v2995_v36 = vpop.permute.xlu1 %2994 }
 0x9b5   :  { %v3659_v0 = vadd.f32 %v11005_v26, %v2995_v36 }
 0x9b6   :  { %v3968_v49 = vadd.f32 %v11027_v42, %v3807_v17  ;;  %v7557_v28 = vpop.f32.mrb[132].mxu0  ;;  %v7741_v43 = vpop.f32.mrb[164].mxu1  ;;  %v4079_v16 = vmax.f32 %v3965_v7, 0.0 }
 0x9b7   :  { %v7558_v14 = vpop.f32.mrb[133].mxu0  ;;  %v7742_v19 = vpop.f32.mrb[165].mxu1 }
 0x9b8   :  { %v4080_v55 = vmax.f32 %v3968_v49, 0.0  ;;  %v7559_v25 = vadd.f32 %v7558_v14, %v7557_v28  ;;  %v7560_v40 = vpop.f32.mrb[134].mxu0  ;;  %v11128_v18 = vadd.f32 %v7742_v19, %v7741_v43  ;;  %v7744_v31 = vpop.f32.mrb[166].mxu1 }
 0x9b9   :  { %v7561_v12 = vpop.f32.mrb[135].mxu0  ;;  %v7745_v4 = vpop.f32.mrb[167].mxu1 }
 0x9ba   :  { %v4109_v46 = vpack.c.bf16 %v4080_v55, %v4079_v16  ;;  %v3812_v51 = vadd.f32 %v7559_v25, %v3651_v61  ;;  %v7562_v42 = vadd.f32 %v7561_v12, %v7560_v40  ;;  %v11131_v59 = vadd.f32 %v7745_v4, %v7744_v31  ;;  %v3000_v5 = vpop.permute.xlu0 %2999  ;;  %v3005_v26 = vpop.permute.xlu1 %3004 }
 0x9bb   :  { %v3662_v28 = vadd.f32 %v11009_v57, %v3000_v5  ;;  %v3667_v25 = vadd.f32 %v11013_v15, %v3005_v26 }
 0x9bc   :  { %v3973_v1 = vadd.f32 %v11031_v33, %v3812_v51  ;;  %v3815_v41 = vadd.f32 %v7562_v42, %v3654_v37  ;;  %8168 = vmatprep.mubr.msk.bf16.mxu0 %vm2182_vm11, %v4109_v46 }
 0x9be   :  { %v3976_v48 = vadd.f32 %v11035_v47, %v3815_v41  ;;  %v7563_v50 = vpop.f32.mrb[136].mxu0  ;;  %v4081_v11 = vmax.f32 %v3973_v1, 0.0  ;;  %v3010_v57 = vpop.permute.xlu0 %3009 }
 0x9bf   :  { %v7564_v38 = vpop.f32.mrb[137].mxu0  ;;  %v3670_v46 = vadd.f32 %v11017_v63, %v3010_v57  ;;  %v3015_v15 = vpop.permute.xlu1 %3014 }
 0x9c0   :  { %v4082_v7 = vmax.f32 %v3976_v48, 0.0  ;;  %v7565_v17 = vadd.f32 %v7564_v38, %v7563_v50  ;;  %v7566_v21 = vpop.f32.mrb[138].mxu0  ;;  %v3675_v36 = vadd.f32 %v11021_v20, %v3015_v15 }
 0x9c1   :  { %v7567_v49 = vpop.f32.mrb[139].mxu0 }
 0x9c2   :  { %v4110_v43 = vpack.c.bf16 %v4082_v7, %v4081_v11  ;;  %v3820_v33 = vadd.f32 %v7565_v17, %v3659_v0  ;;  %v7568_v61 = vadd.f32 %v7567_v49, %v7566_v21  ;;  %v3020_v63 = vpop.permute.xlu0 %3019 }
 0x9c3   :  { %v3678_v21 = vadd.f32 %v11025_v54, %v3020_v63  ;;  %v3025_v20 = vpop.permute.xlu1 %3024 }
 0x9c4   :  { %v3981_v14 = vadd.f32 %v11039_v27, %v3820_v33  ;;  %v3823_v19 = vadd.f32 %v7568_v61, %v3662_v28  ;;  %8169 = vmatmul.mubr.msk.bf16.gmra.mrb[188].mxu0 %vm2182_vm11, %v4110_v43 }
 0x9c6   :  { %v3984_v47 = vadd.f32 %v11043_v62, %v3823_v19  ;;  %v7569_v16 = vpop.f32.mrb[140].mxu0  ;;  %v4083_v40 = vmax.f32 %v3981_v14, 0.0  ;;  %v3683_v14 = vadd.f32 %v11029_v9, %v3025_v20  ;;  %v3030_v54 = vpop.permute.xlu0 %3029 }
 0x9c7   :  { %v7570_v55 = vpop.f32.mrb[141].mxu0  ;;  %v3035_v9 = vpop.permute.xlu1 %3034 }
 0x9c8   :  { %v4084_v31 = vmax.f32 %v3984_v47, 0.0  ;;  %v7571_v37 = vadd.f32 %v7570_v55, %v7569_v16  ;;  %v7572_v12 = vpop.f32.mrb[142].mxu0 }
 0x9c9   :  { %v7573_v4 = vpop.f32.mrb[143].mxu0 }
 0x9ca   :  { %v4111_v51 = vpack.c.bf16 %v4084_v31, %v4083_v40  ;;  %v3828_v27 = vadd.f32 %v7571_v37, %v3667_v25  ;;  %v7574_v42 = vadd.f32 %v7573_v4, %v7572_v12  ;;  %v3686_v25 = vadd.f32 %v11033_v53, %v3030_v54  ;;  %v3040_v53 = vpop.permute.xlu0 %3039 }
 0x9cc   :  { %v3989_v1 = vadd.f32 %v11047_v52, %v3828_v27  ;;  %v3831_v41 = vadd.f32 %v7574_v42, %v3670_v46  ;;  %8172 = vmatprep.mubr.msk.bf16.mxu0 %vm2182_vm11, %v4111_v51  ;;  %v3691_v46 = vadd.f32 %v11037_v10, %v3035_v9  ;;  %v3045_v10 = vpop.permute.xlu1 %3044 }
 0x9ce   :  { %v3992_v62 = vadd.f32 %v11051_v45, %v3831_v41  ;;  %v7575_v48 = vpop.f32.mrb[144].mxu0  ;;  %v4085_v38 = vmax.f32 %v3989_v1, 0.0 }
 0x9cf   :  { %v7576_v50 = vpop.f32.mrb[145].mxu0 }
 0x9d0   :  { %v4086_v0 = vmax.f32 %v3992_v62, 0.0  ;;  %v7577_v11 = vadd.f32 %v7576_v50, %v7575_v48  ;;  %v7578_v7 = vpop.f32.mrb[146].mxu0  ;;  %v3694_v62 = vadd.f32 %v11041_v44, %v3040_v53  ;;  %v3050_v44 = vpop.permute.xlu0 %3049 }
 0x9d1   :  { %v7579_v17 = vpop.f32.mrb[147].mxu0 }
 0x9d2   :  { %v4112_v5 = vpack.c.bf16 %v4086_v0, %v4085_v38  ;;  %v3836_v52 = vadd.f32 %v7577_v11, %v3675_v36  ;;  %v7580_v49 = vadd.f32 %v7579_v17, %v7578_v7  ;;  %v3699_v11 = vadd.f32 %v11045_v8, %v3045_v10  ;;  %v3055_v8 = vpop.permute.xlu1 %3054 }
 0x9d4   :  { %v3997_v28 = vadd.f32 %v11055_v22, %v3836_v52  ;;  %v3839_v43 = vadd.f32 %v7580_v49, %v3678_v21  ;;  %8173 = vmatmul.mubr.msk.bf16.gmra.mrb[192].mxu0 %vm2182_vm11, %v4112_v5  ;;  %v3702_v52 = vadd.f32 %v11049_v58, %v3050_v44  ;;  %v3060_v58 = vpop.permute.xlu0 %3059 }
 0x9d5   :  { %v3710_v54 = vadd.f32 %v11057_v23, %v3060_v58 }
 0x9d6   :  { %v4000_v45 = vadd.f32 %v11059_v6, %v3839_v43  ;;  %v7581_v33 = vpop.f32.mrb[148].mxu0  ;;  %v4087_v19 = vmax.f32 %v3997_v28, 0.0 }
 0x9d7   :  { %v7582_v61 = vpop.f32.mrb[149].mxu0 }
 0x9d8   :  { %v4088_v47 = vmax.f32 %v4000_v45, 0.0  ;;  %v7583_v16 = vadd.f32 %v7582_v61, %v7581_v33  ;;  %v7584_v26 = vpop.f32.mrb[150].mxu0  ;;  %v3707_v61 = vadd.f32 %v11053_v32, %v3055_v8  ;;  %v3065_v32 = vpop.permute.xlu1 %3064 }
 0x9d9   :  { %v7585_v55 = vpop.f32.mrb[151].mxu0  ;;  %v3070_v23 = vpop.permute.xlu0 %3069 }
 0x9da   :  { %v4113_v40 = vpack.c.bf16 %v4088_v47, %v4087_v19  ;;  %v3844_v22 = vadd.f32 %v7583_v16, %v3683_v14  ;;  %v7586_v31 = vadd.f32 %v7585_v55, %v7584_v26 }
 0x9dc   :  { %v4005_v37 = vadd.f32 %v11063_v34, %v3844_v22  ;;  %v3847_v12 = vadd.f32 %v7586_v31, %v3686_v25  ;;  %8176 = vmatprep.mubr.msk.bf16.mxu0 %vm2182_vm11, %v4113_v40  ;;  %v12076_v22 = vld [vmem:[#allocation11_spill] sm:$0xff]  ;;  %v3075_v10 = vpop.permute.xlu1 %3074 }
 0x9de   :  { %v4008_v6 = vadd.f32 %v11067_v56, %v3847_v12  ;;  %v7587_v57 = vpop.f32.mrb[152].mxu0  ;;  %v4089_v51 = vmax.f32 %v4005_v37, 0.0 }
 0x9df   :  { %v7588_v4 = vpop.f32.mrb[153].mxu0 }
 0x9e0   :  { %v4090_v27 = vmax.f32 %v4008_v6, 0.0  ;;  %v7589_v42 = vadd.f32 %v7588_v4, %v7587_v57  ;;  %v7590_v1 = vpop.f32.mrb[154].mxu0  ;;  %v12078_v57 = vld [vmem:[#allocation4_spill] sm:$0xff] }
 0x9e1   :  { %v7591_v41 = vpop.f32.mrb[155].mxu0  ;;  %v3715_v9 = vadd.f32 %v12078_v57, %v3065_v32 }
 0x9e2   :  { %v4114_v48 = vpack.c.bf16 %v4090_v27, %v4089_v51  ;;  %v3852_v34 = vadd.f32 %v7589_v42, %v3691_v46  ;;  %v7592_v15 = vadd.f32 %v7591_v41, %v7590_v1  ;;  %v12079_v1 = vld [vmem:[#allocation5_spill] sm:$0xff] }
 0x9e3   :  { %v3718_v53 = vadd.f32 %v12079_v1, %v3070_v23 }
 0x9e4   :  { %v4013_v50 = vadd.f32 %v11071_v30, %v3852_v34  ;;  %v3855_v36 = vadd.f32 %v7592_v15, %v3694_v62  ;;  %8177 = vmatmul.mubr.msk.bf16.gmra.mrb[196].mxu0 %vm2182_vm11, %v4114_v48  ;;  %v12080_v15 = vld [vmem:[#allocation15_spill] sm:$0xff] }
 0x9e6   :  { %v4016_v56 = vadd.f32 %v11075_v2, %v3855_v36  ;;  %v7593_v38 = vpop.f32.mrb[156].mxu0  ;;  %v4091_v7 = vmax.f32 %v4013_v50, 0.0  ;;  %v12081_v36 = vld [vmem:[#allocation17_spill] sm:$0xff] }
 0x9e7   :  { %v7594_v0 = vpop.f32.mrb[157].mxu0 }
 0x9e8   :  { %v4092_v63 = vmax.f32 %v4016_v56, 0.0  ;;  %v7595_v17 = vadd.f32 %v7594_v0, %v7593_v38  ;;  %v7596_v21 = vpop.f32.mrb[158].mxu0 }
 0x9e9   :  { %v7597_v5 = vpop.f32.mrb[159].mxu0 }
 0x9ea   :  { %v4115_v49 = vpack.c.bf16 %v4092_v63, %v4091_v7  ;;  %v3860_v30 = vadd.f32 %v7595_v17, %v3699_v11  ;;  %v7598_v28 = vadd.f32 %v7597_v5, %v7596_v21  ;;  %v12082_v11 = vld [vmem:[#allocation6_spill] sm:$0xff]  ;;  %v3080_v5 = vpop.permute.xlu0 %3079 }
 0x9eb   :  { %v3723_v7 = vadd.f32 %v12082_v11, %v3075_v10  ;;  %v12089_v10 = vld [vmem:[#allocation14_spill] sm:$0xff] }
 0x9ec   :  { %v4021_v43 = vadd.f32 %v11079_v39, %v3860_v30  ;;  %v3863_v45 = vadd.f32 %v7598_v28, %v3702_v52  ;;  %8180 = vmatprep.mubr.msk.bf16.mxu0 %vm2182_vm11, %v4115_v49  ;;  %v12083_v49 = vld [vmem:[#allocation7_spill] sm:$0xff] }
 0x9ed   :  { %v3726_v30 = vadd.f32 %v12083_v49, %v3080_v5  ;;  %v12090_v5 = vld [vmem:[#allocation16_spill] sm:$0xff] }
 0x9ee   :  { %v4024_v2 = vadd.f32 %v11083_v3, %v3863_v45  ;;  %v7599_v33 = vpop.f32.mrb[160].mxu0  ;;  %v4093_v14 = vmax.f32 %v4021_v43, 0.0  ;;  %v12077_v3 = vld [vmem:[#allocation13_spill] sm:$0xff] }
 0x9ef   :  { %v7600_v20 = vpop.f32.mrb[161].mxu0 }
 0x9f0   :  { %v4094_v19 = vmax.f32 %v4024_v2, 0.0  ;;  %v7601_v47 = vadd.f32 %v7600_v20, %v7599_v33  ;;  %v7602_v16 = vpop.f32.mrb[162].mxu0  ;;  %v12084_v33 = vld [vmem:[#allocation18_spill] sm:$0xff] }
 0x9f1   :  { %v7603_v26 = vpop.f32.mrb[163].mxu0 }
 0x9f2   :  { %v4116_v55 = vpack.c.bf16 %v4094_v19, %v4093_v14  ;;  %v3868_v39 = vadd.f32 %v7601_v47, %v3707_v61  ;;  %v7604_v25 = vadd.f32 %v7603_v26, %v7602_v16  ;;  %v3085_v14 = vpop.permute.xlu1 %3084  ;;  %v12085_v47 = vld [vmem:[#allocation8_spill] sm:$0xff] }
 0x9f3   :  { %v3731_v16 = vadd.f32 %v12085_v47, %v3085_v14 }
 0x9f4   :  { %v3871_v40 = vadd.f32 %v7604_v25, %v3710_v54  ;;  %v4029_v31 = vadd.f32 %v12076_v22, %v3868_v39  ;;  %8181 = vmatmul.mubr.msk.bf16.gmra.mrb[200].mxu0 %vm2182_vm11, %v4116_v55  ;;  %v3090_v39 = vpop.permute.xlu0 %3089 }
 0x9f6   :  { %v4032_v37 = vadd.f32 %v12077_v3, %v3871_v40  ;;  %v7605_v12 = vpop.f32.mrb[164].mxu0  ;;  %v4095_v4 = vmax.f32 %v4029_v31, 0.0  ;;  %v12086_v40 = vld [vmem:[#allocation9_spill] sm:$0xff]  ;;  %v3095_v57 = vpop.permute.xlu1 %3094 }
 0x9f7   :  { %v7606_v6 = vpop.f32.mrb[165].mxu0  ;;  %v3734_v22 = vadd.f32 %v12086_v40, %v3090_v39 }
 0x9f8   :  { %v4096_v46 = vmax.f32 %v4032_v37, 0.0  ;;  %v7607_v51 = vadd.f32 %v7606_v6, %v7605_v12  ;;  %v7608_v27 = vpop.f32.mrb[166].mxu0  ;;  %v3100_v1 = vpop.permute.xlu0 %3099 }
 0x9f9   :  { %v7609_v42 = vpop.f32.mrb[167].mxu0 }
 0x9fa   :  { %v4117_v41 = vpack.c.bf16 %v4096_v46, %v4095_v4  ;;  %v3876_v62 = vadd.f32 %v7607_v51, %v3715_v9  ;;  %v7610_v48 = vadd.f32 %v7609_v42, %v7608_v27  ;;  %v12087_v4 = vld [vmem:[#allocation10_spill] sm:$0xff] }
 0x9fb   :  { %v3739_v46 = vadd.f32 %v12087_v4, %v3095_v57 }
 0x9fc   :  { %v3879_v34 = vadd.f32 %v7610_v48, %v3718_v53  ;;  %v4037_v50 = vadd.f32 %v12080_v15, %v3876_v62  ;;  %8184 = vmatprep.mubr.msk.bf16.mxu0 %vm2182_vm11, %v4117_v41  ;;  %v12088_v41 = vld [vmem:[#allocation12_spill] sm:$0xff] }
 0x9fd   :  { %v3742_v62 = vadd.f32 %v12088_v41, %v3100_v1 }
 0x9fe   :  { %v4040_v56 = vadd.f32 %v12081_v36, %v3879_v34  ;;  %v7611_v38 = vpop.f32.mrb[168].mxu0  ;;  %v4097_v63 = vmax.f32 %v4037_v50, 0.0 }
 0x9ff   :  { %v7612_v0 = vpop.f32.mrb[169].mxu0 }
 0xa00   :  { %v4098_v17 = vmax.f32 %v4040_v56, 0.0  ;;  %v7613_v21 = vadd.f32 %v7612_v0, %v7611_v38  ;;  %v7614_v44 = vpop.f32.mrb[170].mxu0  ;;  %v3105_v56 = vpop.permute.xlu1 %3104 }
 0xa01   :  { %v7615_v52 = vpop.f32.mrb[171].mxu0  ;;  %v3747_v0 = vadd.f32 %v12089_v10, %v3105_v56 }
 0xa02   :  { %v4118_v28 = vpack.c.bf16 %v4098_v17, %v4097_v63  ;;  %v3884_v43 = vadd.f32 %v7613_v21, %v3723_v7  ;;  %v7616_v45 = vadd.f32 %v7615_v52, %v7614_v44  ;;  %v3110_v21 = vpop.permute.xlu0 %3109 }
 0xa03   :  { %v3750_v52 = vadd.f32 %v12090_v5, %v3110_v21 }
 0xa04   :  { %v3887_v2 = vadd.f32 %v7616_v45, %v3726_v30  ;;  %v4045_v8 = vadd.f32 %v12084_v33, %v3884_v43  ;;  %8185 = vmatmul.mubr.msk.bf16.gmra.mrb[204].mxu0 %vm2182_vm11, %v4118_v28 }
 0xa06   :  { %v4048_v20 = vadd.f32 %v11105_v35, %v3887_v2  ;;  %v7617_v61 = vpop.f32.mrb[172].mxu0  ;;  %v4099_v58 = vmax.f32 %v4045_v8, 0.0 }
 0xa07   :  { %v7618_v19 = vpop.f32.mrb[173].mxu0 }
 0xa08   :  { %v4100_v26 = vmax.f32 %v4048_v20, 0.0  ;;  %v7619_v54 = vadd.f32 %v7618_v19, %v7617_v61  ;;  %v7620_v55 = vpop.f32.mrb[174].mxu0 }
 0xa09   :  { %v7621_v25 = vpop.f32.mrb[175].mxu0 }
 0xa0a   :  { %v4119_v31 = vpack.c.bf16 %v4100_v26, %v4099_v58  ;;  %v3892_v3 = vadd.f32 %v7619_v54, %v3731_v16  ;;  %v7622_v37 = vadd.f32 %v7621_v25, %v7620_v55 }
 0xa0c   :  { %v3895_v12 = vadd.f32 %v7622_v37, %v3734_v22  ;;  %v4053_v32 = vadd.f32 %v11110_v29, %v3892_v3  ;;  %8188 = vmatprep.mubr.msk.bf16.mxu0 %vm2182_vm11, %v4119_v31 }
 0xa0e   :  { %v4056_v35 = vadd.f32 %v11113_v24, %v3895_v12  ;;  %v7623_v6 = vpop.f32.mrb[176].mxu0  ;;  %v4101_v51 = vmax.f32 %v4053_v32, 0.0 }
 0xa0f   :  { %v7624_v9 = vpop.f32.mrb[177].mxu0 }
 0xa10   :  { %v4102_v27 = vmax.f32 %v4056_v35, 0.0  ;;  %v7625_v23 = vadd.f32 %v7624_v9, %v7623_v6  ;;  %v7626_v42 = vpop.f32.mrb[178].mxu0 }
 0xa11   :  { %v7627_v53 = vpop.f32.mrb[179].mxu0 }
 0xa12   :  { %v4120_v48 = vpack.c.bf16 %v4102_v27, %v4101_v51  ;;  %v3900_v34 = vadd.f32 %v7625_v23, %v3739_v46  ;;  %v7628_v29 = vadd.f32 %v7627_v53, %v7626_v42 }
 0xa14   :  { %v3903_v15 = vadd.f32 %v7628_v29, %v3742_v62  ;;  %v4061_v50 = vadd.f32 %v11119_v13, %v3900_v34  ;;  %8189 = vmatmul.mubr.msk.bf16.gmra.mrb[208].mxu0 %vm2182_vm11, %v4120_v48 }
 0xa16   :  { %v4064_v24 = vadd.f32 %v11122_v60, %v3903_v15  ;;  %v7629_v36 = vpop.f32.mrb[180].mxu0  ;;  %v4103_v11 = vmax.f32 %v4061_v50, 0.0 }
 0xa17   :  { %v7630_v38 = vpop.f32.mrb[181].mxu0 }
 0xa18   :  { %v4104_v7 = vmax.f32 %v4064_v24, 0.0  ;;  %v7631_v63 = vadd.f32 %v7630_v38, %v7629_v36  ;;  %v7632_v17 = vpop.f32.mrb[182].mxu0 }
 0xa19   :  { %v7633_v44 = vpop.f32.mrb[183].mxu0 }
 0xa1a   :  { %v4121_v49 = vpack.c.bf16 %v4104_v7, %v4103_v11  ;;  %v3908_v30 = vadd.f32 %v7631_v63, %v3747_v0  ;;  %v7634_v13 = vadd.f32 %v7633_v44, %v7632_v17  ;;  %v4813_v7 = vld [vmem:[%s12020_s13 + $0x8] sm:$0xff]  ;;  %v4815_v63 = vld [vmem:[%s12020_s13 + $0x18] sm:$0xff] }
 0xa1c   :  { %v3911_v28 = vadd.f32 %v7634_v13, %v3750_v52  ;;  %v4069_v43 = vadd.f32 %v11128_v18, %v3908_v30  ;;  %8192 = vmatprep.mubr.msk.bf16.mxu0 %vm2182_vm11, %v4121_v49  ;;  %v4817_v30 = vld [vmem:[%s12020_s13 + $0x28] sm:$0xff] }
 0xa1e   :  { %v4072_v60 = vadd.f32 %v11131_v59, %v3911_v28  ;;  %v4105_v45 = vmax.f32 %v4069_v43, 0.0  ;;  %v4819_v43 = vld [vmem:[%s12020_s13 + $0x38] sm:$0xff] }
 0xa20   :  { %v4106_v2 = vmax.f32 %v4072_v60, 0.0  ;;  %v4821_v60 = vld [vmem:[%s12020_s13 + $0x48] sm:$0xff] }
 0xa22   :  { %v4122_v33 = vpack.c.bf16 %v4106_v2, %v4105_v45  ;;  %v4823_v45 = vld [vmem:[%s12020_s13 + $0x58] sm:$0xff] }
 0xa24   :  { %8193 = vmatmul.mubr.msk.bf16.gmra.mrb[212].mxu0 %vm2182_vm11, %v4122_v33 }
 0xa87   :  { %v8166_v8 = vpop.f32.mrb[184].mxu0 }
 0xa88   :  { %v4237_v20 = vpop.f32.mrb[185].mxu0 }
 0xa89   :  { %v8167_v61 = vpop.f32.mrb[186].mxu0 }
 0xa8a   :  { %v8749_v14 = vpack.i.bf16 %v8167_v61, %v8166_v8  ;;  %v4781_v19 = vpack.c.bf16 %v8167_v61, %v8166_v8  ;;  %v4240_v47 = vpop.f32.mrb[187].mxu0 }
 0xa8b   :  { %v8739_v16 = vpack.i.bf16 %v4240_v47, %v4237_v20  ;;  %v4780_v58 = vpack.c.bf16 %v4240_v47, %v4237_v20 }
 0xa8d   :  { %8655 = vrot.lane.b32.xlu0 %v8739_v16, %s9254_s24 }
 0xa91   :  { %8670 = vrot.lane.b32.xlu0 %v8749_v14, %s9254_s24 }
 0xa97   :  { %v11199_v18 = vpop.f32.mrb[188].mxu0 }
 0xa98   :  { %v4253_v59 = vpop.f32.mrb[189].mxu0 }
 0xa99   :  { %v11201_v26 = vpop.f32.mrb[190].mxu0 }
 0xa9a   :  { %v8769_v54 = vpack.i.bf16 %v11201_v26, %v11199_v18  ;;  %v4783_v55 = vpack.c.bf16 %v11201_v26, %v11199_v18  ;;  %v4256_v39 = vpop.f32.mrb[191].mxu0  ;;  %v9151_v18 = vld [vmem:[%s12021_s12 + $0xc] ss:$24 sps:$4 sm:$0xff]   ;;  %v9149_v26 = vld [vmem:[%s12021_s12 + $0x8] ss:$24 sps:$4 sm:$0xff]  }
 0xa9b   :  { %v8759_v25 = vpack.i.bf16 %v4256_v39, %v4253_v59  ;;  %v4782_v40 = vpack.c.bf16 %v4256_v39, %v4253_v59  ;;  %v4827_v59 = vld [vmem:[%s12020_s13 + $0x78] sm:$0xff]  ;;  %5277 = vmatprep.mubr.bf16.mxu0 %v9151_v18  ;;  %v9161_v39 = vld [vmem:[%s12021_s12 + $0x6c] ss:$24 sps:$4 sm:$0xff]  }
 0xa9d   :  { %8675 = vrot.lane.b32.xlu0 %v8759_v25, %s9254_s24 }
 0xaa1   :  { %8690 = vrot.lane.b32.xlu0 %v8769_v54, %s9254_s24 }
 0xaa7   :  { %v11209_v22 = vpop.f32.mrb[192].mxu0 }
 0xaa8   :  { %v11211_v31 = vpop.f32.mrb[193].mxu0 }
 0xaa9   :  { %v11213_v3 = vpop.f32.mrb[194].mxu0 }
 0xaaa   :  { %v8789_v37 = vpack.i.bf16 %v11213_v3, %v11209_v22  ;;  %v4785_v12 = vpack.c.bf16 %v11213_v3, %v11209_v22  ;;  %v11219_v32 = vpop.f32.mrb[195].mxu0  ;;  %v9169_v22 = vld [vmem:[%s12021_s12 + $0x98] ss:$24 sps:$4 sm:$0xff]   ;;  %v4812_v3 = vld [vmem:[%s12020_s13] sm:$0xff] }
 0xaab   :  { %v8779_v35 = vpack.i.bf16 %v11219_v32, %v11211_v31  ;;  %v4784_v6 = vpack.c.bf16 %v11219_v32, %v11211_v31  ;;  %v9173_v31 = vld [vmem:[%s12021_s12 + $0xcc] ss:$24 sps:$4 sm:$0xff]   ;;  %v4814_v32 = vld [vmem:[%s12020_s13 + $0x10] sm:$0xff] }
 0xaad   :  { %8695 = vrot.lane.b32.xlu0 %v8779_v35, %s9254_s24 }
 0xab1   :  { %8710 = vrot.lane.b32.xlu0 %v8789_v37, %s9254_s24 }
 0xab7   :  { %v11227_v57 = vpop.f32.mrb[196].mxu0 }
 0xab8   :  { %v11229_v9 = vpop.f32.mrb[197].mxu0 }
 0xab9   :  { %v11231_v4 = vpop.f32.mrb[198].mxu0 }
 0xaba   :  { %v8809_v46 = vpack.i.bf16 %v11231_v4, %v11227_v57  ;;  %v4787_v51 = vpack.c.bf16 %v11231_v4, %v11227_v57  ;;  %v11237_v27 = vpop.f32.mrb[199].mxu0  ;;  %v9185_v57 = vld [vmem:[%s12021_s12 + $0x12c] ss:$24 sps:$4 sm:$0xff]  }
 0xabb   :  { %v8794_v23 = vpack.i.bf16 %v11237_v27, %v11229_v9  ;;  %v4786_v42 = vpack.c.bf16 %v11237_v27, %v11229_v9  ;;  %v4818_v9 = vld [vmem:[%s12020_s13 + $0x30] sm:$0xff]  ;;  %v4820_v4 = vld [vmem:[%s12020_s13 + $0x40] sm:$0xff] }
 0xabc   :  { %v4822_v27 = vld [vmem:[%s12020_s13 + $0x50] sm:$0xff] }
 0xabd   :  { %8715 = vrot.lane.b32.xlu0 %v8794_v23, %s9254_s24 }
 0xac1   :  { %8730 = vrot.lane.b32.xlu0 %v8809_v46, %s9254_s24 }
 0xac5   :  { %8740 = vrot.lane.b32.xlu0 %v8739_v16, %s9255_s26 }
 0xac7   :  { %v8182_v1 = vpop.f32.mrb[200].mxu0 }
 0xac8   :  { %v4301_v53 = vpop.f32.mrb[201].mxu0 }
 0xac9   :  { %8750 = vrot.lane.b32.xlu0 %v8749_v14, %s9255_s26  ;;  %v8183_v41 = vpop.f32.mrb[202].mxu0 }
 0xaca   :  { %v11247_v62 = vpack.i.bf16 %v8183_v41, %v8182_v1  ;;  %v4789_v48 = vpack.c.bf16 %v8183_v41, %v8182_v1  ;;  %v4304_v34 = vpop.f32.mrb[203].mxu0  ;;  %v9193_v1 = vld [vmem:[%s12021_s12 + $0x158] ss:$24 sps:$4 sm:$0xff]  }
 0xacb   :  { %v11249_v29 = vpack.i.bf16 %v4304_v34, %v4301_v53  ;;  %v4788_v15 = vpack.c.bf16 %v4304_v34, %v4301_v53 }
 0xacd   :  { %8760 = vrot.lane.b32.xlu0 %v8759_v25, %s9255_s26  ;;  %8660 = vrot.lane.b32.xlu1 %v11249_v29, %s9254_s24  ;;  %v9163_v25 = vld [vmem:[%s12021_s12 + $0x68] ss:$24 sps:$4 sm:$0xff]  }
 0xace   :  { %7831 = vmatprep.subr.bf16.mxu0 %v4788_v15 }
 0xacf   :  { %7832 = vmatpush3.bf16.msra.mxu0 %v4780_v58  ;;  %v9148_v58 = vld [vmem:[%s12021_s12 + $0x4] ss:$24 sps:$4 sm:$0xff]  }
 0xad0   :  { %7833 = vmatprep.subr.bf16.mxu0 %v4789_v48  ;;  %5180 = vmatprep.mubr.bf16.mxu1 %v9148_v58  ;;  %v4826_v48 = vld [vmem:[%s12020_s13 + $0x70] sm:$0xff] }
 0xad1   :  { %8770 = vrot.lane.b32.xlu0 %v8769_v54, %s9255_s26  ;;  %8665 = vrot.lane.b32.xlu1 %v11247_v62, %s9254_s24  ;;  %v9155_v54 = vld [vmem:[%s12021_s12 + $0x3c] ss:$24 sps:$4 sm:$0xff]  }
 0xad3   :  { %7834 = vmatpush3.bf16.msra.mxu0 %v4781_v19  ;;  %v4825_v19 = vld [vmem:[%s12020_s13 + $0x68] sm:$0xff] }
 0xad5   :  { %8780 = vrot.lane.b32.xlu0 %v8779_v35, %s9255_s26  ;;  %v4816_v35 = vld [vmem:[%s12020_s13 + $0x20] sm:$0xff] }
 0xad7   :  { %v8186_v50 = vpop.f32.mrb[204].mxu0 }
 0xad8   :  { %v4317_v24 = vpop.f32.mrb[205].mxu0 }
 0xad9   :  { %8790 = vrot.lane.b32.xlu0 %v8789_v37, %s9255_s26  ;;  %v8187_v36 = vpop.f32.mrb[206].mxu0  ;;  %v9175_v37 = vld [vmem:[%s12021_s12 + $0xc8] ss:$24 sps:$4 sm:$0xff]  }
 0xada   :  { %v11259_v56 = vpack.i.bf16 %v8187_v36, %v8186_v50  ;;  %v4791_v38 = vpack.c.bf16 %v8187_v36, %v8186_v50  ;;  %v4320_v10 = vpop.f32.mrb[207].mxu0 }
 0xadb   :  { %v11261_v0 = vpack.i.bf16 %v4320_v10, %v4317_v24  ;;  %v4790_v11 = vpack.c.bf16 %v4320_v10, %v4317_v24 }
 0xadd   :  { %8795 = vrot.lane.b32.xlu0 %v8794_v23, %s9255_s26  ;;  %8680 = vrot.lane.b32.xlu1 %v11261_v0, %s9254_s24 }
 0xade   :  { %7835 = vmatprep.subr.bf16.mxu0 %v4790_v11 }
 0xadf   :  { %7836 = vmatpush3.bf16.msra.mxu0 %v4782_v40  ;;  %v9167_v40 = vld [vmem:[%s12021_s12 + $0x9c] ss:$24 sps:$4 sm:$0xff]  }
 0xae0   :  { %7837 = vmatprep.subr.bf16.mxu0 %v4791_v38 }
 0xae1   :  { %8810 = vrot.lane.b32.xlu0 %v8809_v46, %s9255_s26  ;;  %8685 = vrot.lane.b32.xlu1 %v11259_v56, %s9254_s24  ;;  %v9187_v46 = vld [vmem:[%s12021_s12 + $0x128] ss:$24 sps:$4 sm:$0xff]  }
 0xae3   :  { %7838 = vmatpush3.bf16.msra.mxu0 %v4783_v55  ;;  %v9157_v55 = vld [vmem:[%s12021_s12 + $0x38] ss:$24 sps:$4 sm:$0xff]  }
 0xae5   :  { %4835 = vperm.xlu0 %8273, %v4813_v7  }
 0xae7   :  { %v8190_v17 = vpop.f32.mrb[208].mxu0 }
 0xae8   :  { %v4333_v21 = vpop.f32.mrb[209].mxu0 }
 0xae9   :  { %4845 = vperm.xlu0 %8273, %v4815_v63   ;;  %v8191_v44 = vpop.f32.mrb[210].mxu0 }
 0xaea   :  { %v8784_v5 = vpack.i.bf16 %v8191_v44, %v8190_v17  ;;  %v4793_v52 = vpack.c.bf16 %v8191_v44, %v8190_v17  ;;  %v4336_v49 = vpop.f32.mrb[211].mxu0 }
 0xaeb   :  { %v8774_v13 = vpack.i.bf16 %v4336_v49, %v4333_v21  ;;  %v4792_v28 = vpack.c.bf16 %v4336_v49, %v4333_v21 }
 0xaed   :  { %4855 = vperm.xlu0 %8273, %v4817_v30   ;;  %8700 = vrot.lane.b32.xlu1 %v8774_v13, %s9254_s24 }
 0xaee   :  { %7839 = vmatprep.subr.bf16.mxu0 %v4792_v28 }
 0xaef   :  { %7840 = vmatpush3.bf16.msra.mxu0 %v4784_v6  ;;  %v9181_v6 = vld [vmem:[%s12021_s12 + $0xf8] ss:$24 sps:$4 sm:$0xff]  }
 0xaf0   :  { %7841 = vmatprep.subr.bf16.mxu0 %v4793_v52 }
 0xaf1   :  { %4865 = vperm.xlu0 %8273, %v4819_v43   ;;  %8705 = vrot.lane.b32.xlu1 %v8784_v5, %s9254_s24 }
 0xaf3   :  { %7842 = vmatpush3.bf16.msra.mxu0 %v4785_v12  ;;  %v9179_v12 = vld [vmem:[%s12021_s12 + $0xfc] ss:$24 sps:$4 sm:$0xff]  }
 0xaf5   :  { %4875 = vperm.xlu0 %8273, %v4821_v60  }
 0xaf7   :  { %v8194_v2 = vpop.f32.mrb[212].mxu0 }
 0xaf8   :  { %v4349_v33 = vpop.f32.mrb[213].mxu0 }
 0xaf9   :  { %4885 = vperm.xlu0 %8273, %v4823_v45   ;;  %v8195_v8 = vpop.f32.mrb[214].mxu0 }
 0xafa   :  { %v8804_v20 = vpack.i.bf16 %v8195_v8, %v8194_v2  ;;  %v4795_v61 = vpack.c.bf16 %v8195_v8, %v8194_v2  ;;  %v4352_v14 = vpop.f32.mrb[215].mxu0 }
 0xafb   :  { %v8799_v47 = vpack.i.bf16 %v4352_v14, %v4349_v33  ;;  %v4794_v16 = vpack.c.bf16 %v4352_v14, %v4349_v33 }
 0xafd   :  { %4895 = vperm.xlu0 %8273, %v4825_v19   ;;  %8720 = vrot.lane.b32.xlu1 %v8799_v47, %s9254_s24 }
 0xafe   :  { %7843 = vmatprep.subr.bf16.mxu0 %v4794_v16 }
 0xaff   :  { %7844 = vmatpush3.bf16.msra.mxu0 %v4786_v42  ;;  %v8656_v23 = vpop.permute.xlu0 %8655  ;;  %v4824_v42 = vld [vmem:[%s12020_s13 + $0x60] sm:$0xff] }
 0xb00   :  { %7845 = vmatprep.subr.bf16.mxu0 %v4795_v61  ;;  %v8658_v53 = vunpack.i.h.bf16 %v8656_v23  ;;  %v8657_v41 = vunpack.i.l.bf16 %v8656_v23 }
 0xb01   :  { %4905 = vperm.xlu0 %8273, %v4827_v59   ;;  %8725 = vrot.lane.b32.xlu1 %v8804_v20, %s9254_s24 }
 0xb02   :  { %v4493_v50 = vsel %vm71_vm1, 0.0, %v8658_v53  ;;  %v4492_v24 = vsel %vm71_vm1, 0.0, %v8657_v41 }
 0xb03   :  { %7846 = vmatpush3.bf16.msra.mxu0 %v4787_v51  ;;  %v9191_v51 = vld [vmem:[%s12021_s12 + $0x15c] ss:$24 sps:$4 sm:$0xff]   ;;  %v6988_v7 = vpack.c.bf16 %v4493_v50, %v4492_v24 }
 0xb05   :  { %8735 = vrot.lane.b32.xlu1 %v11249_v29, %s9255_s26 }
 0xb06   :  { %5278 = vmatmul.mubr.bf16.vlgmr.msra.gmra.mrb[216].mxu0 %v9149_v26 }
 0xb07   :  { %5285 = vmatprep.mubr.bf16.mxu0 %v9155_v54 }
 0xb09   :  { %8745 = vrot.lane.b32.xlu1 %v11247_v62, %s9255_s26  ;;  %v8671_v62 = vpop.permute.xlu0 %8670 }
 0xb0a   :  { %v8673_v36 = vunpack.i.h.bf16 %v8671_v62 }
 0xb0c   :  { %v4495_v44 = vsel %vm71_vm1, 0.0, %v8673_v36 }
 0xb0d   :  { %8755 = vrot.lane.b32.xlu1 %v11261_v0, %s9255_s26 }
 0xb0e   :  { %5286 = vmatmul.mubr.bf16.gmra.mrb[220].mxu0 %v9157_v55 }
 0xb0f   :  { %5293 = vmatprep.mubr.bf16.mxu0 %v9161_v39  ;;  %v8676_v63 = vpop.permute.xlu0 %8675 }
 0xb10   :  { %v8678_v60 = vunpack.i.h.bf16 %v8676_v63  ;;  %v8677_v45 = vunpack.i.l.bf16 %v8676_v63 }
 0xb11   :  { %8765 = vrot.lane.b32.xlu1 %v11259_v56, %s9255_s26  ;;  %v8672_v56 = vunpack.i.l.bf16 %v8671_v62 }
 0xb12   :  { %v4497_v61 = vsel %vm71_vm1, 0.0, %v8678_v60  ;;  %v4496_v14 = vsel %vm71_vm1, 0.0, %v8677_v45 }
 0xb13   :  { %v8691_v43 = vpop.permute.xlu0 %8690  ;;  %v6998_v26 = vpack.c.bf16 %v4497_v61, %v4496_v14 }
 0xb14   :  { %v8693_v19 = vunpack.i.h.bf16 %v8691_v43 }
 0xb15   :  { %8775 = vrot.lane.b32.xlu1 %v8774_v13, %s9255_s26 }
 0xb16   :  { %5294 = vmatmul.mubr.bf16.gmra.mrb[224].mxu0 %v9163_v25  ;;  %v4499_v25 = vsel %vm71_vm1, 0.0, %v8693_v19 }
 0xb17   :  { %5301 = vmatprep.mubr.bf16.mxu0 %v9167_v40 }
 0xb19   :  { %8785 = vrot.lane.b32.xlu1 %v8784_v5, %s9255_s26  ;;  %v4494_v5 = vsel %vm71_vm1, 0.0, %v8672_v56 }
 0xb1a   :  { %v6993_v28 = vpack.c.bf16 %v4495_v44, %v4494_v5 }
 0xb1d   :  { %8800 = vrot.lane.b32.xlu1 %v8799_v47, %s9255_s26  ;;  %v8692_v47 = vunpack.i.l.bf16 %v8691_v43 }
 0xb1e   :  { %5302 = vmatmul.mubr.bf16.gmra.mrb[228].mxu0 %v9169_v22 }
 0xb1f   :  { %5309 = vmatprep.mubr.bf16.mxu0 %v9173_v31  ;;  %v8696_v2 = vpop.permute.xlu0 %8695  ;;  %v4498_v40 = vsel %vm71_vm1, 0.0, %v8692_v47 }
 0xb21   :  { %8805 = vrot.lane.b32.xlu1 %v8804_v20, %s9255_s26 }
 0xb23   :  { %v8711_v54 = vpop.permute.xlu0 %8710 }
 0xb24   :  { %v8712_v23 = vunpack.i.l.bf16 %v8711_v54 }
 0xb25   :  { %4830 = vperm.xlu1 %8272, %v4812_v3  }
 0xb26   :  { %5310 = vmatmul.mubr.bf16.gmra.mrb[232].mxu0 %v9175_v37  ;;  %v7003_v37 = vpack.c.bf16 %v4499_v25, %v4498_v40  ;;  %v4502_v50 = vsel %vm71_vm1, 0.0, %v8712_v23  ;;  %v9236_v23 = vld [vmem:[%s12022_s14 + $0x50] ss:$12 sps:$4 sm:$0xff]  }
 0xb27   :  { %5317 = vmatprep.mubr.bf16.mxu0 %v9179_v12 }
 0xb29   :  { %4840 = vperm.xlu1 %8272, %v4814_v32   ;;  %v8698_v32 = vunpack.i.h.bf16 %v8696_v2 }
 0xb2d   :  { %4850 = vperm.xlu1 %8272, %v4816_v35   ;;  %v8697_v35 = vunpack.i.l.bf16 %v8696_v2 }
 0xb2e   :  { %5318 = vmatmul.mubr.bf16.gmra.mrb[236].mxu0 %v9181_v6 }
 0xb2f   :  { %5325 = vmatprep.mubr.bf16.mxu0 %v9185_v57  ;;  %v8716_v12 = vpop.permute.xlu0 %8715 }
 0xb31   :  { %4860 = vperm.xlu1 %8272, %v4818_v9  }
 0xb33   :  { %v8731_v6 = vpop.permute.xlu0 %8730 }
 0xb35   :  { %4870 = vperm.xlu1 %8272, %v4820_v4  }
 0xb36   :  { %5326 = vmatmul.mubr.bf16.gmra.mrb[240].mxu0 %v9187_v46  ;;  %v4501_v46 = vsel %vm71_vm1, 0.0, %v8698_v32 }
 0xb37   :  { %5333 = vmatprep.mubr.bf16.mxu0 %v9191_v51  ;;  %v4500_v51 = vsel %vm71_vm1, 0.0, %v8697_v35 }
 0xb38   :  { %v7008_v62 = vpack.c.bf16 %v4501_v46, %v4500_v51 }
 0xb39   :  { %4880 = vperm.xlu1 %8272, %v4822_v27   ;;  %v8713_v27 = vunpack.i.h.bf16 %v8711_v54 }
 0xb3d   :  { %4890 = vperm.xlu1 %8272, %v4824_v42  }
 0xb3e   :  { %5334 = vmatmul.mubr.bf16.gmra.mrb[244].mxu0 %v9193_v1 }
 0xb3f   :  { %v8661_v34 = vpop.permute.xlu1 %8660 }
 0xb40   :  { %v8663_v29 = vunpack.i.h.bf16 %v8661_v34  ;;  %v8662_v15 = vunpack.i.l.bf16 %v8661_v34 }
 0xb41   :  { %4900 = vperm.xlu1 %8272, %v4826_v48   ;;  %v8741_v48 = vpop.permute.xlu0 %8740 }
 0xb42   :  { %v4509_v38 = vsel %vm71_vm1, 0.0, %v8663_v29  ;;  %v4508_v10 = vsel %vm71_vm1, 0.0, %v8662_v15  ;;  %v4503_v15 = vsel %vm71_vm1, 0.0, %v8713_v27  ;;  %v8743_v61 = vunpack.i.h.bf16 %v8741_v48 }
 0xb43   :  { %v7028_v0 = vpack.c.bf16 %v4509_v38, %v4508_v10  ;;  %v8666_v11 = vpop.permute.xlu1 %8665  ;;  %v7013_v38 = vpack.c.bf16 %v4503_v15, %v4502_v50  ;;  %v8742_v14 = vunpack.i.l.bf16 %v8741_v48 }
 0xb44   :  { %v8668_v17 = vunpack.i.h.bf16 %v8666_v11  ;;  %v8667_v21 = vunpack.i.l.bf16 %v8666_v11  ;;  %v8717_v11 = vunpack.i.l.bf16 %v8716_v12 }
 0xb45   :  { %7767 = vmatprep.subr.msk.bf16.mxu1 %vm9566_vm8, %v7028_v0  ;;  %v8751_v10 = vpop.permute.xlu0 %8750  ;;  %v8718_v0 = vunpack.i.h.bf16 %v8716_v12 }
 0xb46   :  { %v4511_v49 = vsel %vm71_vm1, 0.0, %v8668_v17  ;;  %v4510_v30 = vsel %vm71_vm1, 0.0, %v8667_v21  ;;  %7768 = vmatpush3.bf16.msk.msra.mxu1 %vm9566_vm8, %v6988_v7  ;;  %v4504_v5 = vsel %vm71_vm1, 0.0, %v8717_v11  ;;  %v8753_v25 = vunpack.i.h.bf16 %v8751_v10 }
 0xb47   :  { %v7033_v13 = vpack.c.bf16 %v4511_v49, %v4510_v30  ;;  %v4505_v44 = vsel %vm71_vm1, 0.0, %v8718_v0  ;;  %v8733_v49 = vunpack.i.h.bf16 %v8731_v6  ;;  %v8732_v30 = vunpack.i.l.bf16 %v8731_v6  ;;  %v9158_v0 = vld [vmem:[%s12021_s12 + $0x64] ss:$24 sps:$4 sm:$0xff]  }
 0xb48   :  { %v7018_v45 = vpack.c.bf16 %v4505_v44, %v4504_v5  ;;  %v8752_v40 = vunpack.i.l.bf16 %v8751_v10 }
 0xb49   :  { %7769 = vmatprep.subr.msk.bf16.mxu1 %vm9566_vm8, %v7033_v13  ;;  %v8761_v63 = vpop.permute.xlu0 %8760 }
 0xb4a   :  { %7770 = vmatpush3.bf16.msk.msra.mxu1 %vm9566_vm8, %v6993_v28  ;;  %v4622_v46 = vsel %vm76_vm5, %v8752_v40, 0.0  ;;  %v8763_v51 = vunpack.i.h.bf16 %v8761_v63  ;;  %v8762_v27 = vunpack.i.l.bf16 %v8761_v63 }
 0xb4c   :  { %v4624_v15 = vsel %vm76_vm5, %v8762_v27, 0.0 }
 0xb4d   :  { %v8771_v19 = vpop.permute.xlu0 %8770 }
 0xb4e   :  { %v8773_v50 = vunpack.i.h.bf16 %v8771_v19 }
 0xb4f   :  { %v8681_v33 = vpop.permute.xlu1 %8680 }
 0xb50   :  { %v8683_v8 = vunpack.i.h.bf16 %v8681_v33  ;;  %v8682_v20 = vunpack.i.l.bf16 %v8681_v33  ;;  %v4627_v44 = vsel %vm76_vm5, %v8773_v50, 0.0 }
 0xb51   :  { %v8781_v6 = vpop.permute.xlu0 %8780 }
 0xb52   :  { %v4513_v16 = vsel %vm71_vm1, 0.0, %v8683_v8  ;;  %v4512_v58 = vsel %vm71_vm1, 0.0, %v8682_v20  ;;  %v4507_v8 = vsel %vm71_vm1, 0.0, %v8733_v49  ;;  %v4506_v20 = vsel %vm71_vm1, 0.0, %v8732_v30 }
 0xb53   :  { %v7038_v18 = vpack.c.bf16 %v4513_v16, %v4512_v58  ;;  %v8686_v59 = vpop.permute.xlu1 %8685  ;;  %v8783_v49 = vunpack.i.h.bf16 %v8781_v6  ;;  %v8782_v30 = vunpack.i.l.bf16 %v8781_v6 }
 0xb54   :  { %v8688_v55 = vunpack.i.h.bf16 %v8686_v59  ;;  %v8687_v39 = vunpack.i.l.bf16 %v8686_v59  ;;  %v7023_v59 = vpack.c.bf16 %v4507_v8, %v4506_v20 }
 0xb55   :  { %7771 = vmatprep.subr.msk.bf16.mxu1 %vm9566_vm8, %v7038_v18  ;;  %v4629_v20 = vsel %vm76_vm5, %v8783_v49, 0.0  ;;  %v9194_v49 = vld [vmem:[%s12021_s12 + $0x10] ss:$24 sps:$4 sm:$0xff]  }
 0xb56   :  { %v4515_v22 = vsel %vm71_vm1, 0.0, %v8688_v55  ;;  %v4514_v31 = vsel %vm71_vm1, 0.0, %v8687_v39  ;;  %7772 = vmatpush3.bf16.msk.msra.mxu1 %vm9566_vm8, %v6998_v26  ;;  %v4621_v55 = vsel %vm76_vm5, %v8743_v61, 0.0  ;;  %v4620_v39 = vsel %vm76_vm5, %v8742_v14, 0.0 }
 0xb57   :  { %v7043_v3 = vpack.c.bf16 %v4515_v22, %v4514_v31  ;;  %v9146_v22 = vld [vmem:[%s12021_s12] ss:$24 sps:$4 sm:$0xff]   ;;  %v7068_v35 = vpack.c.bf16 %v4621_v55, %v4620_v39  ;;  %v4628_v61 = vsel %vm76_vm5, %v8782_v30, 0.0  ;;  %v9197_v30 = vld [vmem:[%s12021_s12 + $0x44] ss:$24 sps:$4 sm:$0xff]  }
 0xb59   :  { %7773 = vmatprep.subr.msk.bf16.mxu1 %vm9566_vm8, %v7043_v3 }
 0xb5a   :  { %7774 = vmatpush3.bf16.msk.msra.mxu1 %vm9566_vm8, %v7003_v37  ;;  %v9152_v37 = vld [vmem:[%s12021_s12 + $0x34] ss:$24 sps:$4 sm:$0xff]  }
 0xb5f   :  { %v8701_v57 = vpop.permute.xlu1 %8700 }
 0xb60   :  { %v8703_v9 = vunpack.i.h.bf16 %v8701_v57  ;;  %v8702_v4 = vunpack.i.l.bf16 %v8701_v57 }
 0xb62   :  { %v4517_v42 = vsel %vm71_vm1, 0.0, %v8703_v9  ;;  %v4516_v1 = vsel %vm71_vm1, 0.0, %v8702_v4  ;;  %v4623_v4 = vsel %vm76_vm5, %v8753_v25, 0.0 }
 0xb63   :  { %v7048_v53 = vpack.c.bf16 %v4517_v42, %v4516_v1  ;;  %v8706_v41 = vpop.permute.xlu1 %8705 }
 0xb64   :  { %v8708_v34 = vunpack.i.h.bf16 %v8706_v41  ;;  %v8707_v29 = vunpack.i.l.bf16 %v8706_v41 }
 0xb65   :  { %7775 = vmatprep.subr.msk.bf16.mxu1 %vm9566_vm8, %v7048_v53 }
 0xb66   :  { %v4519_v24 = vsel %vm71_vm1, 0.0, %v8708_v34  ;;  %v4518_v36 = vsel %vm71_vm1, 0.0, %v8707_v29  ;;  %7776 = vmatpush3.bf16.msk.msra.mxu1 %vm9566_vm8, %v7008_v62  ;;  %v7073_v62 = vpack.c.bf16 %v4623_v4, %v4622_v46  ;;  %v4625_v29 = vsel %vm76_vm5, %v8763_v51, 0.0 }
 0xb67   :  { %v7053_v56 = vpack.c.bf16 %v4519_v24, %v4518_v36  ;;  %v8772_v24 = vunpack.i.l.bf16 %v8771_v19  ;;  %v9154_v36 = vld [vmem:[%s12021_s12 + $0x30] ss:$24 sps:$4 sm:$0xff]   ;;  %v7078_v63 = vpack.c.bf16 %v4625_v29, %v4624_v15 }
 0xb69   :  { %7777 = vmatprep.subr.msk.bf16.mxu1 %vm9566_vm8, %v7053_v56  ;;  %v8791_v56 = vpop.permute.xlu0 %8790  ;;  %v4626_v5 = vsel %vm76_vm5, %v8772_v24, 0.0 }
 0xb6a   :  { %7778 = vmatpush3.bf16.msk.msra.mxu1 %vm9566_vm8, %v7013_v38  ;;  %v8793_v14 = vunpack.i.h.bf16 %v8791_v56  ;;  %v8792_v19 = vunpack.i.l.bf16 %v8791_v56 }
 0xb6c   :  { %v4631_v25 = vsel %vm76_vm5, %v8793_v14, 0.0  ;;  %v4630_v40 = vsel %vm76_vm5, %v8792_v19, 0.0 }
 0xb6d   :  { %v7093_v6 = vpack.c.bf16 %v4631_v25, %v4630_v40  ;;  %v9214_v40 = vld [vmem:[%s12021_s12 + $0x130] ss:$24 sps:$4 sm:$0xff]  }
 0xb6f   :  { %v8721_v7 = vpop.permute.xlu1 %8720 }
 0xb70   :  { %v8723_v17 = vunpack.i.h.bf16 %v8721_v7  ;;  %v8722_v21 = vunpack.i.l.bf16 %v8721_v7 }
 0xb72   :  { %v4521_v13 = vsel %vm71_vm1, 0.0, %v8723_v17  ;;  %v4520_v28 = vsel %vm71_vm1, 0.0, %v8722_v21 }
 0xb73   :  { %v7058_v43 = vpack.c.bf16 %v4521_v13, %v4520_v28  ;;  %v8726_v60 = vpop.permute.xlu1 %8725 }
 0xb74   :  { %v8728_v2 = vunpack.i.h.bf16 %v8726_v60  ;;  %v8727_v33 = vunpack.i.l.bf16 %v8726_v60 }
 0xb75   :  { %7779 = vmatprep.subr.msk.bf16.mxu1 %vm9566_vm8, %v7058_v43 }
 0xb76   :  { %v4523_v47 = vsel %vm71_vm1, 0.0, %v8728_v2  ;;  %v4522_v16 = vsel %vm71_vm1, 0.0, %v8727_v33  ;;  %7780 = vmatpush3.bf16.msk.msra.mxu1 %vm9566_vm8, %v7018_v45  ;;  %v7083_v45 = vpack.c.bf16 %v4627_v44, %v4626_v5  ;;  %v8796_v2 = vpop.permute.xlu0 %8795  ;;  %v9190_v44 = vld [vmem:[%s12021_s12 + $0x150] ss:$24 sps:$4 sm:$0xff]   ;;  %v9196_v5 = vld [vmem:[%s12021_s12 + $0x14] ss:$24 sps:$4 sm:$0xff]  }
 0xb77   :  { %v7063_v58 = vpack.c.bf16 %v4523_v47, %v4522_v16  ;;  %v8736_v18 = vpop.permute.xlu1 %8735  ;;  %v9160_v47 = vld [vmem:[%s12021_s12 + $0x60] ss:$24 sps:$4 sm:$0xff]  }
 0xb78   :  { %v8738_v26 = vunpack.i.h.bf16 %v8736_v18  ;;  %v8737_v54 = vunpack.i.l.bf16 %v8736_v18  ;;  %v9164_v18 = vld [vmem:[%s12021_s12 + $0x94] ss:$24 sps:$4 sm:$0xff]  }
 0xb79   :  { %7781 = vmatprep.subr.msk.bf16.mxu1 %vm9566_vm8, %v7063_v58 }
 0xb7a   :  { %v4637_v31 = vsel %vm76_vm5, %v8738_v26, 0.0  ;;  %v4636_v3 = vsel %vm76_vm5, %v8737_v54, 0.0  ;;  %7782 = vmatpush3.bf16.msk.msra.mxu1 %vm9566_vm8, %v7023_v59  ;;  %v7088_v54 = vpack.c.bf16 %v4629_v20, %v4628_v61  ;;  %v9209_v20 = vld [vmem:[%s12021_s12 + $0x104] ss:$24 sps:$4 sm:$0xff]  }
 0xb7b   :  { %v7108_v12 = vpack.c.bf16 %v4637_v31, %v4636_v3  ;;  %v8746_v32 = vpop.permute.xlu1 %8745  ;;  %v8797_v31 = vunpack.i.l.bf16 %v8796_v2  ;;  %v8811_v3 = vpop.permute.xlu0 %8810 }
 0xb7c   :  { %v8748_v57 = vunpack.i.h.bf16 %v8746_v32  ;;  %v8747_v9 = vunpack.i.l.bf16 %v8746_v32  ;;  %v8813_v51 = vunpack.i.h.bf16 %v8811_v3  ;;  %v8812_v27 = vunpack.i.l.bf16 %v8811_v3 }
 0xb7d   :  { %5181 = vmatmul.mubr.bf16.vlgmr.msra.gmra.mrb[168].mxu1 %v9146_v22  ;;  %7895 = vmatprep.subr.msk.bf16.mxu1 %vm9608_vm10, %v7108_v12  ;;  %v8798_v22 = vunpack.i.h.bf16 %v8796_v2  ;;  %v4632_v46 = vsel %vm76_vm5, %v8797_v31, 0.0  ;;  %v9206_v2 = vld [vmem:[%s12021_s12 + $0xd4] ss:$24 sps:$4 sm:$0xff]   ;;  %v9215_v31 = vld [vmem:[%s12021_s12 + $0x164] ss:$24 sps:$4 sm:$0xff]  }
 0xb7e   :  { %v4639_v42 = vsel %vm76_vm5, %v8748_v57, 0.0  ;;  %v4638_v1 = vsel %vm76_vm5, %v8747_v9, 0.0  ;;  %7896 = vmatpush3.bf16.msk.msra.mxu1 %vm9608_vm10, %v7068_v35  ;;  %5188 = vmatprep.mubr.bf16.mxu1 %v9152_v37  ;;  %v4635_v50 = vsel %vm76_vm5, %v8813_v51, 0.0  ;;  %v4634_v24 = vsel %vm76_vm5, %v8812_v27, 0.0 }
 0xb7f   :  { %v7113_v53 = vpack.c.bf16 %v4639_v42, %v4638_v1  ;;  %v8756_v41 = vpop.permute.xlu1 %8755  ;;  %v4633_v4 = vsel %vm76_vm5, %v8798_v22, 0.0  ;;  %v9166_v42 = vld [vmem:[%s12021_s12 + $0x90] ss:$24 sps:$4 sm:$0xff]  }
 0xb80   :  { %v8758_v48 = vunpack.i.h.bf16 %v8756_v41  ;;  %v8757_v34 = vunpack.i.l.bf16 %v8756_v41  ;;  %v9170_v41 = vld [vmem:[%s12021_s12 + $0xc4] ss:$24 sps:$4 sm:$0xff]  }
 0xb81   :  { %7897 = vmatprep.subr.msk.bf16.mxu1 %vm9608_vm10, %v7113_v53 }
 0xb82   :  { %v4641_v38 = vsel %vm76_vm5, %v8758_v48, 0.0  ;;  %v4640_v10 = vsel %vm76_vm5, %v8757_v34, 0.0  ;;  %7898 = vmatpush3.bf16.msk.msra.mxu1 %vm9608_vm10, %v7073_v62  ;;  %v7098_v34 = vpack.c.bf16 %v4633_v4, %v4632_v46 }
 0xb83   :  { %v7118_v11 = vpack.c.bf16 %v4641_v38, %v4640_v10  ;;  %v8766_v7 = vpop.permute.xlu1 %8765  ;;  %v7103_v10 = vpack.c.bf16 %v4635_v50, %v4634_v24 }
 0xb84   :  { %v8768_v17 = vunpack.i.h.bf16 %v8766_v7  ;;  %v8767_v21 = vunpack.i.l.bf16 %v8766_v7  ;;  %v9178_v7 = vld [vmem:[%s12021_s12 + $0xf0] ss:$24 sps:$4 sm:$0xff]  }
 0xb85   :  { %5189 = vmatmul.mubr.bf16.gmra.mrb[172].mxu1 %v9154_v36  ;;  %7899 = vmatprep.subr.msk.bf16.mxu1 %vm9608_vm10, %v7118_v11  ;;  %v9176_v11 = vld [vmem:[%s12021_s12 + $0xf4] ss:$24 sps:$4 sm:$0xff]  }
 0xb86   :  { %v4643_v13 = vsel %vm76_vm5, %v8768_v17, 0.0  ;;  %v4642_v28 = vsel %vm76_vm5, %v8767_v21, 0.0  ;;  %7900 = vmatpush3.bf16.msk.msra.mxu1 %vm9608_vm10, %v7078_v63  ;;  %5196 = vmatprep.mubr.bf16.mxu1 %v9158_v0  ;;  %v9172_v0 = vld [vmem:[%s12021_s12 + $0xc0] ss:$24 sps:$4 sm:$0xff]   ;;  %v9182_v63 = vld [vmem:[%s12021_s12 + $0x124] ss:$24 sps:$4 sm:$0xff]  }
 0xb87   :  { %v7123_v43 = vpack.c.bf16 %v4643_v13, %v4642_v28  ;;  %v8776_v60 = vpop.permute.xlu1 %8775  ;;  %v9184_v17 = vld [vmem:[%s12021_s12 + $0x120] ss:$24 sps:$4 sm:$0xff]   ;;  %v9188_v21 = vld [vmem:[%s12021_s12 + $0x154] ss:$24 sps:$4 sm:$0xff]  }
 0xb88   :  { %v8778_v33 = vunpack.i.h.bf16 %v8776_v60  ;;  %v8777_v8 = vunpack.i.l.bf16 %v8776_v60  ;;  %v9199_v13 = vld [vmem:[%s12021_s12 + $0x40] ss:$24 sps:$4 sm:$0xff]   ;;  %v9200_v28 = vld [vmem:[%s12021_s12 + $0x74] ss:$24 sps:$4 sm:$0xff]   ;;  %v9203_v60 = vld [vmem:[%s12021_s12 + $0xa4] ss:$24 sps:$4 sm:$0xff]  }
 0xb89   :  { %7901 = vmatprep.subr.msk.bf16.mxu1 %vm9608_vm10, %v7123_v43  ;;  %v9202_v43 = vld [vmem:[%s12021_s12 + $0x70] ss:$24 sps:$4 sm:$0xff]  }
 0xb8a   :  { %v4645_v16 = vsel %vm76_vm5, %v8778_v33, 0.0  ;;  %v4644_v58 = vsel %vm76_vm5, %v8777_v8, 0.0  ;;  %7902 = vmatpush3.bf16.msk.msra.mxu1 %vm9608_vm10, %v7083_v45  ;;  %v9205_v45 = vld [vmem:[%s12021_s12 + $0xa0] ss:$24 sps:$4 sm:$0xff]   ;;  %v9208_v33 = vld [vmem:[%s12021_s12 + $0xd0] ss:$24 sps:$4 sm:$0xff]  }
 0xb8b   :  { %v7128_v59 = vpack.c.bf16 %v4645_v16, %v4644_v58  ;;  %v8786_v26 = vpop.permute.xlu1 %8785  ;;  %v9211_v58 = vld [vmem:[%s12021_s12 + $0x100] ss:$24 sps:$4 sm:$0xff]  }
 0xb8c   :  { %v8788_v55 = vunpack.i.h.bf16 %v8786_v26  ;;  %v8787_v39 = vunpack.i.l.bf16 %v8786_v26 }
 0xb8d   :  { %5197 = vmatmul.mubr.bf16.gmra.mrb[176].mxu1 %v9160_v47  ;;  %7903 = vmatprep.subr.msk.bf16.mxu1 %vm9608_vm10, %v7128_v59  ;;  %v9212_v59 = vld [vmem:[%s12021_s12 + $0x134] ss:$24 sps:$4 sm:$0xff]  }
 0xb8e   :  { %v4647_v37 = vsel %vm76_vm5, %v8788_v55, 0.0  ;;  %v4646_v12 = vsel %vm76_vm5, %v8787_v39, 0.0  ;;  %7904 = vmatpush3.bf16.msk.msra.mxu1 %vm9608_vm10, %v7088_v54  ;;  %5204 = vmatprep.mubr.bf16.mxu1 %v9164_v18 }
 0xb8f   :  { %v7133_v32 = vpack.c.bf16 %v4647_v37, %v4646_v12  ;;  %v8801_v35 = vpop.permute.xlu1 %8800 }
 0xb90   :  { %v8803_v57 = vunpack.i.h.bf16 %v8801_v35  ;;  %v8802_v9 = vunpack.i.l.bf16 %v8801_v35 }
 0xb91   :  { %7905 = vmatprep.subr.msk.bf16.mxu1 %vm9608_vm10, %v7133_v32 }
 0xb92   :  { %v4649_v1 = vsel %vm76_vm5, %v8803_v57, 0.0  ;;  %v4648_v53 = vsel %vm76_vm5, %v8802_v9, 0.0  ;;  %7906 = vmatpush3.bf16.msk.msra.mxu1 %vm9608_vm10, %v7093_v6  ;;  %v9217_v6 = vld [vmem:[%s12021_s12 + $0x160] ss:$24 sps:$4 sm:$0xff]  }
 0xb93   :  { %v7138_v62 = vpack.c.bf16 %v4649_v1, %v4648_v53  ;;  %v8806_v48 = vpop.permute.xlu1 %8805 }
 0xb94   :  { %v8808_v29 = vunpack.i.h.bf16 %v8806_v48  ;;  %v8807_v15 = vunpack.i.l.bf16 %v8806_v48 }
 0xb95   :  { %5205 = vmatmul.mubr.bf16.gmra.mrb[180].mxu1 %v9166_v42  ;;  %7907 = vmatprep.subr.msk.bf16.mxu1 %vm9608_vm10, %v7138_v62 }
 0xb96   :  { %v4651_v36 = vsel %vm76_vm5, %v8808_v29, 0.0  ;;  %v4650_v56 = vsel %vm76_vm5, %v8807_v15, 0.0  ;;  %7908 = vmatpush3.bf16.msk.msra.mxu1 %vm9608_vm10, %v7098_v34  ;;  %5212 = vmatprep.mubr.bf16.mxu1 %v9170_v41 }
 0xb97   :  { %v7143_v38 = vpack.c.bf16 %v4651_v36, %v4650_v56 }
 0xb99   :  { %7909 = vmatprep.subr.msk.bf16.mxu1 %vm9608_vm10, %v7143_v38 }
 0xb9a   :  { %7910 = vmatpush3.bf16.msk.msra.mxu1 %vm9608_vm10, %v7103_v10 }
 0xb9d   :  { %5213 = vmatmul.mubr.bf16.gmra.mrb[184].mxu1 %v9172_v0 }
 0xb9e   :  { %5220 = vmatprep.mubr.bf16.mxu1 %v9176_v11 }
 0xba5   :  { %5221 = vmatmul.mubr.bf16.gmra.mrb[188].mxu1 %v9178_v7 }
 0xba6   :  { %5228 = vmatprep.mubr.bf16.mxu1 %v9182_v63 }
 0xbad   :  { %5229 = vmatmul.mubr.bf16.gmra.mrb[192].mxu1 %v9184_v17 }
 0xbae   :  { %5236 = vmatprep.mubr.bf16.mxu1 %v9188_v21 }
 0xbb5   :  { %5237 = vmatmul.mubr.bf16.gmra.mrb[196].mxu1 %v9190_v44 }
 0xbb6   :  { %5374 = vmatprep.mubr.bf16.mxu1 %v9196_v5 }
 0xbbd   :  { %5375 = vmatmul.mubr.bf16.vlgmr.msra.gmra.mrb[200].mxu1 %v9194_v49 }
 0xbbe   :  { %5382 = vmatprep.mubr.bf16.mxu1 %v9197_v30 }
 0xbc5   :  { %5383 = vmatmul.mubr.bf16.gmra.mrb[204].mxu1 %v9199_v13 }
 0xbc6   :  { %5390 = vmatprep.mubr.bf16.mxu1 %v9200_v28 }
 0xbcd   :  { %5391 = vmatmul.mubr.bf16.gmra.mrb[208].mxu1 %v9202_v43 }
 0xbce   :  { %5398 = vmatprep.mubr.bf16.mxu1 %v9203_v60  ;;  %v4831_v60 = vpop.permute.xlu1 %4830 }
 0xbd5   :  { %5399 = vmatmul.mubr.bf16.gmra.mrb[212].mxu1 %v9205_v45 }
 0xbd6   :  { %5406 = vmatprep.mubr.bf16.mxu1 %v9206_v2 }
 0xbd9   :  { %v7847_v8 = vpop.f32.mrb[216].mxu0 }
 0xbda   :  { %v7848_v61 = vpop.f32.mrb[217].mxu0 }
 0xbdb   :  { %v11602_v14 = vadd.f32 %v7848_v61, %v7847_v8  ;;  %v7850_v19 = vpop.f32.mrb[218].mxu0  ;;  %v4836_v8 = vpop.permute.xlu0 %4835 }
 0xbdc   :  { %v7851_v47 = vpop.f32.mrb[219].mxu0 }
 0xbdd   :  { %5407 = vmatmul.mubr.bf16.gmra.mrb[216].mxu1 %v9208_v33  ;;  %v11604_v16 = vadd.f32 %v7851_v47, %v7850_v19 }
 0xbde   :  { %5414 = vmatprep.mubr.bf16.mxu1 %v9209_v20 }
 0xbe1   :  { %v7853_v18 = vpop.f32.mrb[220].mxu0 }
 0xbe2   :  { %v7854_v26 = vpop.f32.mrb[221].mxu0 }
 0xbe3   :  { %v11612_v54 = vadd.f32 %v7854_v26, %v7853_v18  ;;  %v7856_v55 = vpop.f32.mrb[222].mxu0  ;;  %v4841_v26 = vpop.permute.xlu1 %4840 }
 0xbe4   :  { %v7857_v39 = vpop.f32.mrb[223].mxu0 }
 0xbe5   :  { %5415 = vmatmul.mubr.bf16.gmra.mrb[220].mxu1 %v9211_v58  ;;  %v11614_v25 = vadd.f32 %v7857_v39, %v7856_v55 }
 0xbe6   :  { %5422 = vmatprep.mubr.bf16.mxu1 %v9212_v59 }
 0xbe9   :  { %v7859_v22 = vpop.f32.mrb[224].mxu0 }
 0xbea   :  { %v7860_v3 = vpop.f32.mrb[225].mxu0 }
 0xbeb   :  { %v11622_v37 = vadd.f32 %v7860_v3, %v7859_v22  ;;  %v7862_v12 = vpop.f32.mrb[226].mxu0  ;;  %v4846_v22 = vpop.permute.xlu0 %4845 }
 0xbec   :  { %v7863_v32 = vpop.f32.mrb[227].mxu0 }
 0xbed   :  { %5423 = vmatmul.mubr.bf16.gmra.mrb[224].mxu1 %v9214_v40  ;;  %v11624_v35 = vadd.f32 %v7863_v32, %v7862_v12 }
 0xbee   :  { %5430 = vmatprep.mubr.bf16.mxu1 %v9215_v31 }
 0xbf1   :  { %v7865_v57 = vpop.f32.mrb[228].mxu0 }
 0xbf2   :  { %v7866_v9 = vpop.f32.mrb[229].mxu0 }
 0xbf3   :  { %v11629_v4 = vadd.f32 %v7866_v9, %v7865_v57  ;;  %v7868_v46 = vpop.f32.mrb[230].mxu0  ;;  %v4851_v57 = vpop.permute.xlu1 %4850 }
 0xbf4   :  { %v7869_v51 = vpop.f32.mrb[231].mxu0 }
 0xbf5   :  { %5431 = vmatmul.mubr.bf16.gmra.mrb[228].mxu1 %v9217_v6  ;;  %v11631_v27 = vadd.f32 %v7869_v51, %v7868_v46 }
 0xbf9   :  { %v7871_v42 = vpop.f32.mrb[232].mxu0 }
 0xbfa   :  { %v7872_v1 = vpop.f32.mrb[233].mxu0 }
 0xbfb   :  { %v11633_v53 = vadd.f32 %v7872_v1, %v7871_v42  ;;  %v7874_v41 = vpop.f32.mrb[234].mxu0  ;;  %v4856_v42 = vpop.permute.xlu0 %4855 }
 0xbfc   :  { %v7875_v62 = vpop.f32.mrb[235].mxu0 }
 0xbfd   :  { %v11635_v48 = vadd.f32 %v7875_v62, %v7874_v41 }
 0xc01   :  { %v7877_v34 = vpop.f32.mrb[236].mxu0 }
 0xc02   :  { %v7878_v29 = vpop.f32.mrb[237].mxu0 }
 0xc03   :  { %v11637_v15 = vadd.f32 %v7878_v29, %v7877_v34  ;;  %v7880_v50 = vpop.f32.mrb[238].mxu0 }
 0xc04   :  { %v7881_v24 = vpop.f32.mrb[239].mxu0 }
 0xc05   :  { %v11639_v36 = vadd.f32 %v7881_v24, %v7880_v50  ;;  %v4861_v50 = vpop.permute.xlu1 %4860 }
 0xc09   :  { %v7883_v56 = vpop.f32.mrb[240].mxu0 }
 0xc0a   :  { %v7884_v38 = vpop.f32.mrb[241].mxu0 }
 0xc0b   :  { %v11641_v10 = vadd.f32 %v7884_v38, %v7883_v56  ;;  %v7886_v0 = vpop.f32.mrb[242].mxu0 }
 0xc0c   :  { %v7887_v11 = vpop.f32.mrb[243].mxu0 }
 0xc0d   :  { %v11643_v7 = vadd.f32 %v7887_v11, %v7886_v0  ;;  %v4866_v0 = vpop.permute.xlu0 %4865 }
 0xc11   :  { %v7889_v63 = vpop.f32.mrb[244].mxu0 }
 0xc12   :  { %v7890_v17 = vpop.f32.mrb[245].mxu0 }
 0xc13   :  { %v11645_v21 = vadd.f32 %v7890_v17, %v7889_v63  ;;  %v7892_v44 = vpop.f32.mrb[246].mxu0 }
 0xc14   :  { %v7893_v5 = vpop.f32.mrb[247].mxu0 }
 0xc15   :  { %v11647_v49 = vadd.f32 %v7893_v5, %v7892_v44 }
 0xc50   :  { %v7783_v30 = vpop.f32.mrb[168].mxu1 }
 0xc51   :  { %v7784_v13 = vpop.f32.mrb[169].mxu1 }
 0xc52   :  { %v7785_v28 = vadd.f32 %v7784_v13, %v7783_v30  ;;  %v7786_v43 = vpop.f32.mrb[170].mxu1  ;;  %v4871_v30 = vpop.permute.xlu1 %4870 }
 0xc53   :  { %v7787_v45 = vpop.f32.mrb[171].mxu1 }
 0xc54   :  { %v5183_v2 = vadd.f32 %v7785_v28, %v4831_v60  ;;  %v7788_v33 = vadd.f32 %v7787_v45, %v7786_v43  ;;  %v4876_v60 = vpop.permute.xlu0 %4875 }
 0xc56   :  { %v5186_v20 = vadd.f32 %v7788_v33, %v4836_v8  ;;  %v11650_v61 = vadd.f32 %v11602_v14, %v5183_v2 }
 0xc58   :  { %v11653_v19 = vadd.f32 %v11604_v16, %v5186_v20  ;;  %v7789_v47 = vpop.f32.mrb[172].mxu1 }
 0xc59   :  { %v7790_v58 = vpop.f32.mrb[173].mxu1 }
 0xc5a   :  { %v7791_v18 = vadd.f32 %v7790_v58, %v7789_v47  ;;  %v7792_v59 = vpop.f32.mrb[174].mxu1  ;;  %v4881_v47 = vpop.permute.xlu1 %4880 }
 0xc5b   :  { %v7793_v55 = vpop.f32.mrb[175].mxu1 }
 0xc5c   :  { %v5191_v39 = vadd.f32 %v7791_v18, %v4841_v26  ;;  %v7794_v40 = vadd.f32 %v7793_v55, %v7792_v59  ;;  %v4886_v26 = vpop.permute.xlu0 %4885 }
 0xc5e   :  { %v5194_v31 = vadd.f32 %v7794_v40, %v4846_v22  ;;  %v11656_v3 = vadd.f32 %v11612_v54, %v5191_v39 }
 0xc60   :  { %v11659_v12 = vadd.f32 %v11614_v25, %v5194_v31  ;;  %v7795_v14 = vpop.f32.mrb[176].mxu1 }
 0xc61   :  { %v7796_v32 = vpop.f32.mrb[177].mxu1 }
 0xc62   :  { %v7797_v16 = vadd.f32 %v7796_v32, %v7795_v14  ;;  %v7798_v6 = vpop.f32.mrb[178].mxu1  ;;  %v4891_v14 = vpop.permute.xlu1 %4890 }
 0xc63   :  { %v7799_v9 = vpop.f32.mrb[179].mxu1 }
 0xc64   :  { %v5199_v46 = vadd.f32 %v7797_v16, %v4851_v57  ;;  %v7800_v51 = vadd.f32 %v7799_v9, %v7798_v6  ;;  %v4896_v57 = vpop.permute.xlu0 %4895 }
 0xc66   :  { %v5202_v1 = vadd.f32 %v7800_v51, %v4856_v42  ;;  %v11662_v41 = vadd.f32 %v11622_v37, %v5199_v46 }
 0xc68   :  { %v11665_v62 = vadd.f32 %v11624_v35, %v5202_v1  ;;  %v7801_v54 = vpop.f32.mrb[180].mxu1 }
 0xc69   :  { %v7802_v34 = vpop.f32.mrb[181].mxu1 }
 0xc6a   :  { %v7803_v25 = vadd.f32 %v7802_v34, %v7801_v54  ;;  %v7804_v29 = vpop.f32.mrb[182].mxu1  ;;  %v4901_v54 = vpop.permute.xlu1 %4900 }
 0xc6b   :  { %v7805_v24 = vpop.f32.mrb[183].mxu1 }
 0xc6c   :  { %v5207_v56 = vadd.f32 %v7803_v25, %v4861_v50  ;;  %v7806_v38 = vadd.f32 %v7805_v24, %v7804_v29  ;;  %v4906_v50 = vpop.permute.xlu0 %4905 }
 0xc6e   :  { %v5210_v11 = vadd.f32 %v7806_v38, %v4866_v0  ;;  %v11668_v63 = vadd.f32 %v11629_v4, %v5207_v56 }
 0xc70   :  { %v11671_v17 = vadd.f32 %v11631_v27, %v5210_v11  ;;  %v7807_v37 = vpop.f32.mrb[184].mxu1 }
 0xc71   :  { %v7808_v44 = vpop.f32.mrb[185].mxu1 }
 0xc72   :  { %v7809_v35 = vadd.f32 %v7808_v44, %v7807_v37  ;;  %v7810_v5 = vpop.f32.mrb[186].mxu1 }
 0xc73   :  { %v7811_v13 = vpop.f32.mrb[187].mxu1 }
 0xc74   :  { %v5215_v28 = vadd.f32 %v7809_v35, %v4871_v30  ;;  %v7812_v43 = vadd.f32 %v7811_v13, %v7810_v5 }
 0xc76   :  { %v5218_v45 = vadd.f32 %v7812_v43, %v4876_v60  ;;  %v11674_v2 = vadd.f32 %v11633_v53, %v5215_v28 }
 0xc78   :  { %v11677_v33 = vadd.f32 %v11635_v48, %v5218_v45  ;;  %v7813_v4 = vpop.f32.mrb[188].mxu1 }
 0xc79   :  { %v7814_v8 = vpop.f32.mrb[189].mxu1 }
 0xc7a   :  { %v7815_v27 = vadd.f32 %v7814_v8, %v7813_v4  ;;  %v7816_v20 = vpop.f32.mrb[190].mxu1 }
 0xc7b   :  { %v7817_v58 = vpop.f32.mrb[191].mxu1 }
 0xc7c   :  { %v5223_v18 = vadd.f32 %v7815_v27, %v4881_v47  ;;  %v7818_v59 = vadd.f32 %v7817_v58, %v7816_v20 }
 0xc7e   :  { %v5226_v55 = vadd.f32 %v7818_v59, %v4886_v26  ;;  %v11680_v39 = vadd.f32 %v11637_v15, %v5223_v18 }
 0xc80   :  { %v11683_v40 = vadd.f32 %v11639_v36, %v5226_v55  ;;  %v7819_v53 = vpop.f32.mrb[192].mxu1 }
 0xc81   :  { %v7820_v22 = vpop.f32.mrb[193].mxu1 }
 0xc82   :  { %v7821_v48 = vadd.f32 %v7820_v22, %v7819_v53  ;;  %v7822_v31 = vpop.f32.mrb[194].mxu1 }
 0xc83   :  { %v7823_v32 = vpop.f32.mrb[195].mxu1 }
 0xc84   :  { %v5231_v16 = vadd.f32 %v7821_v48, %v4891_v14  ;;  %v7824_v6 = vadd.f32 %v7823_v32, %v7822_v31 }
 0xc86   :  { %v5234_v9 = vadd.f32 %v7824_v6, %v4896_v57  ;;  %v11686_v46 = vadd.f32 %v11641_v10, %v5231_v16 }
 0xc88   :  { %v11689_v51 = vadd.f32 %v11643_v7, %v5234_v9  ;;  %v7825_v15 = vpop.f32.mrb[196].mxu1 }
 0xc89   :  { %v7826_v42 = vpop.f32.mrb[197].mxu1 }
 0xc8a   :  { %v7827_v36 = vadd.f32 %v7826_v42, %v7825_v15  ;;  %v7828_v1 = vpop.f32.mrb[198].mxu1 }
 0xc8b   :  { %v7829_v34 = vpop.f32.mrb[199].mxu1 }
 0xc8c   :  { %v5239_v25 = vadd.f32 %v7827_v36, %v4901_v54  ;;  %v7830_v29 = vadd.f32 %v7829_v34, %v7828_v1 }
 0xc8e   :  { %v5242_v24 = vadd.f32 %v7830_v29, %v4906_v50  ;;  %v11692_v56 = vadd.f32 %v11645_v21, %v5239_v25 }
 0xc90   :  { %v11695_v38 = vadd.f32 %v11647_v49, %v5242_v24  ;;  %v7911_v10 = vpop.f32.mrb[200].mxu1 }
 0xc91   :  { %v7912_v0 = vpop.f32.mrb[201].mxu1 }
 0xc92   :  { %v7913_v7 = vadd.f32 %v7912_v0, %v7911_v10  ;;  %v7914_v11 = vpop.f32.mrb[202].mxu1 }
 0xc93   :  { %v7915_v37 = vpop.f32.mrb[203].mxu1 }
 0xc94   :  { %v5377_v44 = vadd.f32 %v7913_v7, %v11650_v61  ;;  %v7916_v35 = vadd.f32 %v7915_v37, %v7914_v11 }
 0xc96   :  { %v5380_v5 = vadd.f32 %v7916_v35, %v11653_v19  ;;  %v5439_v30 = vmax.f32 %v5377_v44, 0.0 }
 0xc98   :  { %v5440_v13 = vmax.f32 %v5380_v5, 0.0  ;;  %v7917_v28 = vpop.f32.mrb[204].mxu1 }
 0xc99   :  { %v7918_v43 = vpop.f32.mrb[205].mxu1 }
 0xc9a   :  { %v7919_v60 = vadd.f32 %v7918_v43, %v7917_v28  ;;  %v7920_v21 = vpop.f32.mrb[206].mxu1  ;;  %v11699_v45 = vpack.i.bf16 %v5440_v13, %v5439_v30  ;;  %v5671_v49 = vpack.c.bf16 %v5440_v13, %v5439_v30 }
 0xc9b   :  { %v7921_v4 = vpop.f32.mrb[207].mxu1 }
 0xc9c   :  { %v5385_v8 = vadd.f32 %v7919_v60, %v11656_v3  ;;  %v7922_v27 = vadd.f32 %v7921_v4, %v7920_v21  ;;  %8815 = vrot.lane.b32.xlu1 %v11699_v45, %s9254_s24  ;;  %7959 = vmatprep.subr.bf16.mxu0 %v5671_v49 }
 0xc9e   :  { %v5388_v61 = vadd.f32 %v7922_v27, %v11659_v12  ;;  %v5441_v19 = vmax.f32 %v5385_v8, 0.0 }
 0xca0   :  { %v5442_v20 = vmax.f32 %v5388_v61, 0.0  ;;  %v7923_v47 = vpop.f32.mrb[208].mxu1 }
 0xca1   :  { %v7924_v58 = vpop.f32.mrb[209].mxu1 }
 0xca2   :  { %v7925_v18 = vadd.f32 %v7924_v58, %v7923_v47  ;;  %v7926_v59 = vpop.f32.mrb[210].mxu1  ;;  %v11705_v26 = vpack.i.bf16 %v5442_v20, %v5441_v19  ;;  %v11707_v55 = vpack.c.bf16 %v5442_v20, %v5441_v19 }
 0xca3   :  { %v7927_v53 = vpop.f32.mrb[211].mxu1 }
 0xca4   :  { %v5393_v3 = vadd.f32 %v7925_v18, %v11662_v41  ;;  %v7928_v22 = vadd.f32 %v7927_v53, %v7926_v59  ;;  %8820 = vrot.lane.b32.xlu0 %v11705_v26, %s9254_s24 }
 0xca6   :  { %v5396_v48 = vadd.f32 %v7928_v22, %v11665_v62  ;;  %v5443_v12 = vmax.f32 %v5393_v3, 0.0 }
 0xca8   :  { %v5444_v31 = vmax.f32 %v5396_v48, 0.0  ;;  %v7929_v14 = vpop.f32.mrb[212].mxu1 }
 0xca9   :  { %v7930_v32 = vpop.f32.mrb[213].mxu1 }
 0xcaa   :  { %v7931_v16 = vadd.f32 %v7930_v32, %v7929_v14  ;;  %v7932_v6 = vpop.f32.mrb[214].mxu1  ;;  %v11713_v57 = vpack.i.bf16 %v5444_v31, %v5443_v12  ;;  %v11715_v9 = vpack.c.bf16 %v5444_v31, %v5443_v12 }
 0xcab   :  { %v7933_v15 = vpop.f32.mrb[215].mxu1 }
 0xcac   :  { %v5401_v42 = vadd.f32 %v7931_v16, %v11668_v63  ;;  %v7934_v41 = vadd.f32 %v7933_v15, %v7932_v6  ;;  %8825 = vrot.lane.b32.xlu1 %v11713_v57, %s9254_s24 }
 0xcae   :  { %v5404_v36 = vadd.f32 %v7934_v41, %v11671_v17  ;;  %v5445_v62 = vmax.f32 %v5401_v42, 0.0  ;;  %v5693_v41 = vld [vmem:[%s12023_s15 + $0x30] sm:$0xff] }
 0xcb0   :  { %v5446_v1 = vmax.f32 %v5404_v36, 0.0  ;;  %v7935_v54 = vpop.f32.mrb[216].mxu1  ;;  %v9230_v36 = vld [vmem:[%s12022_s14 + $0x8] ss:$12 sps:$4 sm:$0xff]  }
 0xcb1   :  { %v7936_v34 = vpop.f32.mrb[217].mxu1  ;;  %8212 = vmatprep.mubr.bf16.mxu1 %v9230_v36 }
 0xcb2   :  { %v7937_v25 = vadd.f32 %v7936_v34, %v7935_v54  ;;  %v7938_v29 = vpop.f32.mrb[218].mxu1  ;;  %v8829_v50 = vpack.i.bf16 %v5446_v1, %v5445_v62  ;;  %v11721_v24 = vpack.c.bf16 %v5446_v1, %v5445_v62  ;;  %v5692_v62 = vld [vmem:[%s12023_s15 + $0x28] sm:$0xff]  ;;  %v5695_v1 = vld [vmem:[%s12023_s15 + $0x40] sm:$0xff]  ;;  %v5694_v54 = vld [vmem:[%s12023_s15 + $0x38] sm:$0xff] }
 0xcb3   :  { %v7939_v10 = vpop.f32.mrb[219].mxu1  ;;  %v5697_v34 = vld [vmem:[%s12023_s15 + $0x50] sm:$0xff] }
 0xcb4   :  { %v5409_v0 = vadd.f32 %v7937_v25, %v11674_v2  ;;  %v7940_v7 = vadd.f32 %v7939_v10, %v7938_v29  ;;  %8830 = vrot.lane.b32.xlu0 %v8829_v50, %s9254_s24  ;;  %v5696_v25 = vld [vmem:[%s12023_s15 + $0x48] sm:$0xff]  ;;  %v5699_v29 = vld [vmem:[%s12023_s15 + $0x60] sm:$0xff]  ;;  %v5701_v10 = vld [vmem:[%s12023_s15 + $0x70] sm:$0xff] }
 0xcb6   :  { %v5412_v63 = vadd.f32 %v7940_v7, %v11677_v33  ;;  %v5447_v11 = vmax.f32 %v5409_v0, 0.0  ;;  %v5700_v0 = vld [vmem:[%s12023_s15 + $0x68] sm:$0xff]  ;;  %v6137_v7 = vld [vmem:[%s12024_s17] sm:$0xff] }
 0xcb8   :  { %v5448_v37 = vmax.f32 %v5412_v63, 0.0  ;;  %v7941_v17 = vpop.f32.mrb[220].mxu1  ;;  %v5702_v63 = vld [vmem:[%s12023_s15 + $0x78] sm:$0xff] }
 0xcb9   :  { %v7942_v44 = vpop.f32.mrb[221].mxu1 }
 0xcba   :  { %v7943_v35 = vadd.f32 %v7942_v44, %v7941_v17  ;;  %v7944_v5 = vpop.f32.mrb[222].mxu1  ;;  %v8834_v30 = vpack.i.bf16 %v5448_v37, %v5447_v11  ;;  %v11726_v13 = vpack.c.bf16 %v5448_v37, %v5447_v11  ;;  %v6139_v11 = vld [vmem:[%s12024_s17 + $0x10] sm:$0xff]  ;;  %v6138_v37 = vld [vmem:[%s12024_s17 + $0x8] sm:$0xff]  ;;  %v6141_v17 = vld [vmem:[%s12024_s17 + $0x20] sm:$0xff] }
 0xcbb   :  { %v7945_v28 = vpop.f32.mrb[223].mxu1  ;;  %v6140_v44 = vld [vmem:[%s12024_s17 + $0x18] sm:$0xff] }
 0xcbc   :  { %v5417_v43 = vadd.f32 %v7943_v35, %v11680_v39  ;;  %v7946_v60 = vadd.f32 %v7945_v28, %v7944_v5  ;;  %8835 = vrot.lane.b32.xlu1 %v8834_v30, %s9254_s24  ;;  %v6143_v35 = vld [vmem:[%s12024_s17 + $0x30] sm:$0xff]  ;;  %v6142_v5 = vld [vmem:[%s12024_s17 + $0x28] sm:$0xff] }
 0xcbe   :  { %v5420_v2 = vadd.f32 %v7946_v60, %v11683_v40  ;;  %v5449_v21 = vmax.f32 %v5417_v43, 0.0 }
 0xcc0   :  { %v5450_v49 = vmax.f32 %v5420_v2, 0.0  ;;  %v7947_v33 = vpop.f32.mrb[224].mxu1 }
 0xcc1   :  { %v7948_v4 = vpop.f32.mrb[225].mxu1 }
 0xcc2   :  { %v7949_v8 = vadd.f32 %v7948_v4, %v7947_v33  ;;  %v7950_v27 = vpop.f32.mrb[226].mxu1  ;;  %v8839_v61 = vpack.i.bf16 %v5450_v49, %v5449_v21  ;;  %v11731_v19 = vpack.c.bf16 %v5450_v49, %v5449_v21  ;;  %v6144_v49 = vld [vmem:[%s12024_s17 + $0x38] sm:$0xff] }
 0xcc3   :  { %v7951_v20 = vpop.f32.mrb[227].mxu1 }
 0xcc4   :  { %v5425_v47 = vadd.f32 %v7949_v8, %v11686_v46  ;;  %v7952_v58 = vadd.f32 %v7951_v20, %v7950_v27  ;;  %8840 = vrot.lane.b32.xlu0 %v8839_v61, %s9254_s24  ;;  %v9220_v46 = vld [vmem:[%s12022_s14 + $0x4] ss:$12 sps:$4 sm:$0xff]  }
 0xcc5   :  { %5943 = vmatprep.mubr.bf16.mxu0 %v9220_v46 }
 0xcc6   :  { %v5428_v39 = vadd.f32 %v7952_v58, %v11689_v51  ;;  %v5451_v18 = vmax.f32 %v5425_v47, 0.0 }
 0xcc8   :  { %v5452_v59 = vmax.f32 %v5428_v39, 0.0  ;;  %v7953_v40 = vpop.f32.mrb[228].mxu1 }
 0xcc9   :  { %v7954_v53 = vpop.f32.mrb[229].mxu1 }
 0xcca   :  { %v7955_v3 = vadd.f32 %v7954_v53, %v7953_v40  ;;  %v7956_v22 = vpop.f32.mrb[230].mxu1  ;;  %v8844_v48 = vpack.i.bf16 %v5452_v59, %v5451_v18  ;;  %v11736_v12 = vpack.c.bf16 %v5452_v59, %v5451_v18 }
 0xccb   :  { %v7957_v31 = vpop.f32.mrb[231].mxu1 }
 0xccc   :  { %v5433_v14 = vadd.f32 %v7955_v3, %v11692_v56  ;;  %v7958_v32 = vadd.f32 %v7957_v31, %v7956_v22  ;;  %8845 = vrot.lane.b32.xlu1 %v8844_v48, %s9254_s24  ;;  %v5687_v56 = vld [vmem:[%s12023_s15] sm:$0xff] }
 0xcce   :  { %v5436_v51 = vadd.f32 %v7958_v32, %v11695_v38  ;;  %v5453_v16 = vmax.f32 %v5433_v14, 0.0  ;;  %v5689_v38 = vld [vmem:[%s12023_s15 + $0x10] sm:$0xff] }
 0xcd0   :  { %v5454_v6 = vmax.f32 %v5436_v51, 0.0  ;;  %8855 = vrot.lane.b32.xlu1 %v11699_v45, %s9255_s26  ;;  %v5688_v45 = vld [vmem:[%s12023_s15 + $0x8] sm:$0xff] }
 0xcd2   :  { %v8849_v15 = vpack.i.bf16 %v5454_v6, %v5453_v16  ;;  %v11746_v42 = vpack.c.bf16 %v5454_v6, %v5453_v16 }
 0xcd4   :  { %8850 = vrot.lane.b32.xlu0 %v8849_v15, %s9254_s24  ;;  %8865 = vrot.lane.b32.xlu1 %v11713_v57, %s9255_s26  ;;  %v5690_v57 = vld [vmem:[%s12023_s15 + $0x18] sm:$0xff] }
 0xcd8   :  { %8860 = vrot.lane.b32.xlu0 %v11705_v26, %s9255_s26  ;;  %8875 = vrot.lane.b32.xlu1 %v8834_v30, %s9255_s26  ;;  %v5691_v26 = vld [vmem:[%s12023_s15 + $0x20] sm:$0xff] }
 0xcd9   :  { %v6287_v30 = vld [vmem:[%s12025_s19] sm:$0xff] }
 0xcdc   :  { %8870 = vrot.lane.b32.xlu0 %v8829_v50, %s9255_s26  ;;  %8885 = vrot.lane.b32.xlu1 %v8844_v48, %s9255_s26  ;;  %v5698_v50 = vld [vmem:[%s12023_s15 + $0x58] sm:$0xff] }
 0xce0   :  { %8880 = vrot.lane.b32.xlu0 %v8839_v61, %s9255_s26  ;;  %5705 = vperm.xlu1 %8272, %v5687_v56  }
 0xce4   :  { %8890 = vrot.lane.b32.xlu0 %v8849_v15, %s9255_s26  ;;  %5715 = vperm.xlu1 %8272, %v5689_v38  }
 0xce8   :  { %5710 = vperm.xlu0 %8273, %v5688_v45   ;;  %5725 = vperm.xlu1 %8272, %v5691_v26  }
 0xcec   :  { %5720 = vperm.xlu0 %8273, %v5690_v57   ;;  %5735 = vperm.xlu1 %8272, %v5693_v41  }
 0xcf0   :  { %5730 = vperm.xlu0 %8273, %v5692_v62   ;;  %5745 = vperm.xlu1 %8272, %v5695_v1  }
 0xcf4   :  { %5740 = vperm.xlu0 %8273, %v5694_v54   ;;  %5755 = vperm.xlu1 %8272, %v5697_v34  }
 0xcf8   :  { %5750 = vperm.xlu0 %8273, %v5696_v25   ;;  %5765 = vperm.xlu1 %8272, %v5699_v29  }
 0xcfc   :  { %5760 = vperm.xlu0 %8273, %v5698_v50   ;;  %5775 = vperm.xlu1 %8272, %v5701_v10  }
 0xd00   :  { %5770 = vperm.xlu0 %8273, %v5700_v0   ;;  %6147 = vperm.xlu1 %8272, %v6137_v7  }
 0xd04   :  { %5780 = vperm.xlu0 %8273, %v5702_v63   ;;  %6157 = vperm.xlu1 %8272, %v6139_v11  }
 0xd08   :  { %6152 = vperm.xlu0 %8273, %v6138_v37   ;;  %6167 = vperm.xlu1 %8272, %v6141_v17  }
 0xd0c   :  { %6162 = vperm.xlu0 %8273, %v6140_v44   ;;  %6177 = vperm.xlu1 %8272, %v6143_v35  }
 0xd0e   :  { %v8816_v28 = vpop.permute.xlu1 %8815 }
 0xd0f   :  { %v8818_v43 = vunpack.i.h.bf16 %v8816_v28  ;;  %v8817_v60 = vunpack.i.l.bf16 %v8816_v28  ;;  %v9221_v28 = vld [vmem:[%s12022_s14 + $0x1c] ss:$12 sps:$4 sm:$0xff]  }
 0xd10   :  { %6172 = vperm.xlu0 %8273, %v6142_v5   ;;  %6290 = vperm.xlu1 %8272, %v6287_v30   ;;  %v9218_v30 = vld [vmem:[%s12022_s14] ss:$12 sps:$4 sm:$0xff]  }
 0xd11   :  { %v5520_v2 = vsel %vm71_vm1, 0.0, %v8818_v43  ;;  %v5519_v21 = vsel %vm71_vm1, 0.0, %v8817_v60 }
 0xd12   :  { %v7172_v33 = vpack.c.bf16 %v5520_v2, %v5519_v21 }
 0xd14   :  { %6182 = vperm.xlu0 %8273, %v6144_v49   ;;  %7960 = vmatpush3.bf16.msk.msra.mxu0 %vm9566_vm8, %v7172_v33 }
 0xd15   :  { %7961 = vmatprep.subr.bf16.mxu0 %v11707_v55 }
 0xd16   :  { %v8821_v4 = vpop.permute.xlu0 %8820 }
 0xd17   :  { %v8823_v8 = vunpack.i.h.bf16 %v8821_v4  ;;  %v8822_v27 = vunpack.i.l.bf16 %v8821_v4 }
 0xd19   :  { %v5522_v61 = vsel %vm71_vm1, 0.0, %v8823_v8  ;;  %v5521_v20 = vsel %vm71_vm1, 0.0, %v8822_v27 }
 0xd1a   :  { %v7177_v47 = vpack.c.bf16 %v5522_v61, %v5521_v20 }
 0xd1c   :  { %7962 = vmatpush3.bf16.msk.msra.mxu0 %vm9566_vm8, %v7177_v47 }
 0xd1d   :  { %7963 = vmatprep.subr.bf16.mxu0 %v11715_v9 }
 0xd1e   :  { %v8826_v58 = vpop.permute.xlu1 %8825 }
 0xd1f   :  { %v8828_v39 = vunpack.i.h.bf16 %v8826_v58  ;;  %v8827_v18 = vunpack.i.l.bf16 %v8826_v58 }
 0xd21   :  { %v5524_v59 = vsel %vm71_vm1, 0.0, %v8828_v39  ;;  %v5523_v55 = vsel %vm71_vm1, 0.0, %v8827_v18  ;;  %v9223_v18 = vld [vmem:[%s12022_s14 + $0x18] ss:$12 sps:$4 sm:$0xff]  }
 0xd22   :  { %v7182_v40 = vpack.c.bf16 %v5524_v59, %v5523_v55  ;;  %v9226_v55 = vld [vmem:[%s12022_s14 + $0x34] ss:$12 sps:$4 sm:$0xff]  }
 0xd24   :  { %7964 = vmatpush3.bf16.msk.msra.mxu0 %vm9566_vm8, %v7182_v40 }
 0xd25   :  { %7965 = vmatprep.subr.bf16.mxu0 %v11721_v24 }
 0xd26   :  { %v8831_v53 = vpop.permute.xlu0 %8830 }
 0xd27   :  { %v8833_v3 = vunpack.i.h.bf16 %v8831_v53  ;;  %v8832_v22 = vunpack.i.l.bf16 %v8831_v53 }
 0xd29   :  { %v5526_v48 = vsel %vm71_vm1, 0.0, %v8833_v3  ;;  %v5525_v9 = vsel %vm71_vm1, 0.0, %v8832_v22 }
 0xd2a   :  { %v7187_v31 = vpack.c.bf16 %v5526_v48, %v5525_v9 }
 0xd2c   :  { %7966 = vmatpush3.bf16.msk.msra.mxu0 %vm9566_vm8, %v7187_v31 }
 0xd2d   :  { %7967 = vmatprep.subr.bf16.mxu0 %v11726_v13 }
 0xd2e   :  { %v8836_v14 = vpop.permute.xlu1 %8835 }
 0xd2f   :  { %v8838_v32 = vunpack.i.h.bf16 %v8836_v14  ;;  %v8837_v46 = vunpack.i.l.bf16 %v8836_v14 }
 0xd31   :  { %v5528_v51 = vsel %vm71_vm1, 0.0, %v8838_v32  ;;  %v5527_v24 = vsel %vm71_vm1, 0.0, %v8837_v46 }
 0xd32   :  { %v7192_v16 = vpack.c.bf16 %v5528_v51, %v5527_v24  ;;  %v9224_v24 = vld [vmem:[%s12022_s14 + $0x30] ss:$12 sps:$4 sm:$0xff]  }
 0xd34   :  { %7968 = vmatpush3.bf16.msk.msra.mxu0 %vm9566_vm8, %v7192_v16 }
 0xd35   :  { %7969 = vmatprep.subr.bf16.mxu0 %v11731_v19 }
 0xd36   :  { %v8841_v6 = vpop.permute.xlu0 %8840 }
 0xd37   :  { %v8843_v15 = vunpack.i.h.bf16 %v8841_v6  ;;  %v8842_v56 = vunpack.i.l.bf16 %v8841_v6  ;;  %v9229_v6 = vld [vmem:[%s12022_s14 + $0x4c] ss:$12 sps:$4 sm:$0xff]  }
 0xd39   :  { %v5530_v38 = vsel %vm71_vm1, 0.0, %v8843_v15  ;;  %v5529_v13 = vsel %vm71_vm1, 0.0, %v8842_v56 }
 0xd3a   :  { %v7197_v45 = vpack.c.bf16 %v5530_v38, %v5529_v13 }
 0xd3c   :  { %7970 = vmatpush3.bf16.msk.msra.mxu0 %vm9566_vm8, %v7197_v45 }
 0xd3d   :  { %7971 = vmatprep.subr.bf16.mxu0 %v11736_v12 }
 0xd3e   :  { %v8846_v26 = vpop.permute.xlu1 %8845 }
 0xd3f   :  { %v8848_v57 = vunpack.i.h.bf16 %v8846_v26  ;;  %v8847_v41 = vunpack.i.l.bf16 %v8846_v26 }
 0xd41   :  { %v5532_v36 = vsel %vm71_vm1, 0.0, %v8848_v57  ;;  %v5531_v19 = vsel %vm71_vm1, 0.0, %v8847_v41  ;;  %v9227_v41 = vld [vmem:[%s12022_s14 + $0x48] ss:$12 sps:$4 sm:$0xff]  }
 0xd42   :  { %v7202_v62 = vpack.c.bf16 %v5532_v36, %v5531_v19  ;;  %v8856_v1 = vpop.permute.xlu1 %8855  ;;  %v9234_v19 = vld [vmem:[%s12022_s14 + $0x64] ss:$12 sps:$4 sm:$0xff]  }
 0xd43   :  { %v8858_v54 = vunpack.i.h.bf16 %v8856_v1  ;;  %v8857_v34 = vunpack.i.l.bf16 %v8856_v1  ;;  %v9235_v1 = vld [vmem:[%s12022_s14 + $0x38] ss:$12 sps:$4 sm:$0xff]  }
 0xd44   :  { %7972 = vmatpush3.bf16.msk.msra.mxu0 %vm9566_vm8, %v7202_v62  ;;  %v9231_v62 = vld [vmem:[%s12022_s14 + $0x20] ss:$12 sps:$4 sm:$0xff]  }
 0xd45   :  { %v5584_v25 = vsel %vm76_vm5, %v8858_v54, 0.0  ;;  %v5583_v29 = vsel %vm76_vm5, %v8857_v34, 0.0  ;;  %7973 = vmatprep.subr.bf16.mxu0 %v11746_v42  ;;  %v9232_v54 = vld [vmem:[%s12022_s14 + $0x60] ss:$12 sps:$4 sm:$0xff]   ;;  %v9239_v34 = vld [vmem:[%s12022_s14 + $0x7c] ss:$12 sps:$4 sm:$0xff]  }
 0xd46   :  { %v7212_v12 = vpack.c.bf16 %v5584_v25, %v5583_v29  ;;  %v8851_v50 = vpop.permute.xlu0 %8850  ;;  %v8866_v10 = vpop.permute.xlu1 %8865  ;;  %v9240_v25 = vld [vmem:[%s12022_s14 + $0x68] ss:$12 sps:$4 sm:$0xff]   ;;  %v9237_v29 = vld [vmem:[%s12022_s14 + $0x78] ss:$12 sps:$4 sm:$0xff]  }
 0xd47   :  { %v8853_v0 = vunpack.i.h.bf16 %v8851_v50  ;;  %v8852_v7 = vunpack.i.l.bf16 %v8851_v50  ;;  %v8868_v37 = vunpack.i.h.bf16 %v8866_v10  ;;  %v8867_v17 = vunpack.i.l.bf16 %v8866_v10  ;;  %v9241_v50 = vld [vmem:[%s12022_s14 + $0x80] ss:$12 sps:$4 sm:$0xff]   ;;  %v9245_v10 = vld [vmem:[%s12022_s14 + $0x98] ss:$12 sps:$4 sm:$0xff]  }
 0xd48   :  { %8196 = vmatprep.subr.msk.bf16.mxu1 %vm9608_vm10, %v7212_v12 }
 0xd49   :  { %v5534_v63 = vsel %vm71_vm1, 0.0, %v8853_v0  ;;  %v5533_v11 = vsel %vm71_vm1, 0.0, %v8852_v7  ;;  %8197 = vmatpush3.bf16.msk.msra.mxu1 %vm9608_vm10, %v7212_v12  ;;  %v5588_v43 = vsel %vm76_vm5, %v8868_v37, 0.0  ;;  %v5587_v60 = vsel %vm76_vm5, %v8867_v17, 0.0  ;;  %v9244_v12 = vld [vmem:[%s12022_s14 + $0x94] ss:$12 sps:$4 sm:$0xff]  }
 0xd4a   :  { %v7207_v44 = vpack.c.bf16 %v5534_v63, %v5533_v11  ;;  %v8861_v35 = vpop.permute.xlu0 %8860  ;;  %v8876_v33 = vpop.permute.xlu1 %8875  ;;  %v7222_v52 = vpack.c.bf16 %v5588_v43, %v5587_v60  ;;  %v9242_v0 = vld [vmem:[%s12022_s14 + $0x90] ss:$12 sps:$4 sm:$0xff]   ;;  %v9249_v7 = vld [vmem:[%s12022_s14 + $0xac] ss:$12 sps:$4 sm:$0xff]   ;;  %v9247_v11 = vld [vmem:[%s12022_s14 + $0xa8] ss:$12 sps:$4 sm:$0xff]  }
 0xd4b   :  { %v8863_v42 = vunpack.i.h.bf16 %v8861_v35  ;;  %v8862_v5 = vunpack.i.l.bf16 %v8861_v35  ;;  %v8878_v61 = vunpack.i.h.bf16 %v8876_v33  ;;  %v8877_v20 = vunpack.i.l.bf16 %v8876_v33  ;;  %v9246_v63 = vld [vmem:[%s12022_s14 + $0xb0] ss:$12 sps:$4 sm:$0xff]   ;;  %v9250_v37 = vld [vmem:[%s12026_s16] sm:$0xff]  }
 0xd4c   :  { %7974 = vmatpush3.bf16.msk.msra.mxu0 %vm9566_vm8, %v7207_v44  ;;  %vm9260_vm1 = vmmov 0  }
 0xd4d   :  { %v5586_v2 = vsel %vm76_vm5, %v8863_v42, 0.0  ;;  %v5585_v21 = vsel %vm76_vm5, %v8862_v5, 0.0  ;;  %v5592_v40 = vsel %vm76_vm5, %v8878_v61, 0.0  ;;  %v5591_v53 = vsel %vm76_vm5, %v8877_v20, 0.0 }
 0xd4e   :  { %v7217_v49 = vpack.c.bf16 %v5586_v2, %v5585_v21  ;;  %v8871_v4 = vpop.permute.xlu0 %8870  ;;  %v8886_v48 = vpop.permute.xlu1 %8885  ;;  %v7232_v9 = vpack.c.bf16 %v5592_v40, %v5591_v53 }
 0xd4f   :  { %v8873_v8 = vunpack.i.h.bf16 %v8871_v4  ;;  %v8872_v27 = vunpack.i.l.bf16 %v8871_v4  ;;  %5944 = vmatmul.mubr.bf16.vlgmr.msra.gmra.mrb[248].mxu0 %v9218_v30  ;;  %v8888_v31 = vunpack.i.h.bf16 %v8886_v48  ;;  %v8887_v14 = vunpack.i.l.bf16 %v8886_v48 }
 0xd50   :  { %8198 = vmatprep.subr.msk.bf16.mxu1 %vm9608_vm10, %v7217_v49  ;;  %5951 = vmatprep.mubr.bf16.mxu0 %v9221_v28 }
 0xd51   :  { %v5590_v47 = vsel %vm76_vm5, %v8873_v8, 0.0  ;;  %v5589_v58 = vsel %vm76_vm5, %v8872_v27, 0.0  ;;  %8199 = vmatpush3.bf16.msk.msra.mxu1 %vm9608_vm10, %v7217_v49  ;;  %v5596_v15 = vsel %vm76_vm5, %v8888_v31, 0.0  ;;  %v5595_v56 = vsel %vm76_vm5, %v8887_v14, 0.0 }
 0xd52   :  { %v8881_v39 = vpop.permute.xlu0 %8880  ;;  %8200 = vmatprep.subr.msk.bf16.mxu1 %vm9608_vm10, %v7222_v52  ;;  %v7227_v59 = vpack.c.bf16 %v5590_v47, %v5589_v58  ;;  %v7242_v45 = vpack.c.bf16 %v5596_v15, %v5595_v56 }
 0xd53   :  { %v8883_v3 = vunpack.i.h.bf16 %v8881_v39  ;;  %v8882_v22 = vunpack.i.l.bf16 %v8881_v39 }
 0xd55   :  { %8201 = vmatpush3.bf16.msk.msra.mxu1 %vm9608_vm10, %v7222_v52  ;;  %v5594_v32 = vsel %vm76_vm5, %v8883_v3, 0.0  ;;  %v5593_v46 = vsel %vm76_vm5, %v8882_v22, 0.0 }
 0xd56   :  { %8202 = vmatprep.subr.msk.bf16.mxu1 %vm9608_vm10, %v7227_v59  ;;  %v8891_v51 = vpop.permute.xlu0 %8890  ;;  %v7237_v16 = vpack.c.bf16 %v5594_v32, %v5593_v46 }
 0xd57   :  { %5952 = vmatmul.mubr.bf16.gmra.mrb[252].mxu0 %v9223_v18  ;;  %v8893_v38 = vunpack.i.h.bf16 %v8891_v51  ;;  %v8892_v13 = vunpack.i.l.bf16 %v8891_v51 }
 0xd58   :  { %5959 = vmatprep.mubr.bf16.mxu0 %v9226_v55 }
 0xd59   :  { %8203 = vmatpush3.bf16.msk.msra.mxu1 %vm9608_vm10, %v7227_v59  ;;  %v5598_v26 = vsel %vm76_vm5, %v8893_v38, 0.0  ;;  %v5597_v57 = vsel %vm76_vm5, %v8892_v13, 0.0 }
 0xd5a   :  { %8204 = vmatprep.subr.msk.bf16.mxu1 %vm9608_vm10, %v7232_v9  ;;  %v7247_v36 = vpack.c.bf16 %v5598_v26, %v5597_v57 }
 0xd5d   :  { %8205 = vmatpush3.bf16.msk.msra.mxu1 %vm9608_vm10, %v7232_v9 }
 0xd5e   :  { %8206 = vmatprep.subr.msk.bf16.mxu1 %vm9608_vm10, %v7237_v16 }
 0xd5f   :  { %5960 = vmatmul.mubr.bf16.gmra.mrb[0].mxu0 %v9224_v24  ;;  %v5706_v33 = vpop.permute.xlu1 %5705 }
 0xd60   :  { %5967 = vmatprep.mubr.bf16.mxu0 %v9229_v6 }
 0xd61   :  { %8207 = vmatpush3.bf16.msk.msra.mxu1 %vm9608_vm10, %v7237_v16 }
 0xd62   :  { %8208 = vmatprep.subr.msk.bf16.mxu1 %vm9608_vm10, %v7242_v45 }
 0xd63   :  { %v5716_v20 = vpop.permute.xlu1 %5715 }
 0xd65   :  { %8209 = vmatpush3.bf16.msk.msra.mxu1 %vm9608_vm10, %v7242_v45 }
 0xd66   :  { %8210 = vmatprep.subr.msk.bf16.mxu1 %vm9608_vm10, %v7247_v36 }
 0xd67   :  { %5968 = vmatmul.mubr.bf16.gmra.mrb[4].mxu0 %v9227_v41  ;;  %v5711_v4 = vpop.permute.xlu0 %5710  ;;  %v5726_v59 = vpop.permute.xlu1 %5725 }
 0xd68   :  { %5975 = vmatprep.mubr.bf16.mxu0 %v9234_v19 }
 0xd69   :  { %8211 = vmatpush3.bf16.msk.msra.mxu1 %vm9608_vm10, %v7247_v36 }
 0xd6b   :  { %v5721_v39 = vpop.permute.xlu0 %5720  ;;  %v5736_v24 = vpop.permute.xlu1 %5735 }
 0xd6c   :  { %8213 = vmatmul.mubr.bf16.vlgmr.msra.gmra.mrb[232].mxu1 %v9231_v62 }
 0xd6d   :  { %8216 = vmatprep.mubr.bf16.mxu1 %v9235_v1 }
 0xd6f   :  { %5976 = vmatmul.mubr.bf16.gmra.mrb[8].mxu0 %v9232_v54  ;;  %v5731_v3 = vpop.permute.xlu0 %5730 }
 0xd70   :  { %5983 = vmatprep.mubr.bf16.mxu0 %v9239_v34 }
 0xd73   :  { %v5741_v45 = vpop.permute.xlu0 %5740 }
 0xd74   :  { %8217 = vmatmul.mubr.bf16.gmra.mrb[236].mxu1 %v9236_v23 }
 0xd75   :  { %8220 = vmatprep.mubr.bf16.mxu1 %v9240_v25 }
 0xd77   :  { %5984 = vmatmul.mubr.bf16.gmra.mrb[12].mxu0 %v9237_v29 }
 0xd78   :  { %5991 = vmatprep.mubr.bf16.mxu0 %v9244_v12  ;;  %v5746_v12 = vpop.permute.xlu1 %5745 }
 0xd7c   :  { %8221 = vmatmul.mubr.bf16.gmra.mrb[240].mxu1 %v9241_v50 }
 0xd7d   :  { %8224 = vmatprep.mubr.bf16.mxu1 %v9245_v10 }
 0xd7f   :  { %5992 = vmatmul.mubr.bf16.gmra.mrb[16].mxu0 %v9242_v0 }
 0xd80   :  { %5999 = vmatprep.mubr.bf16.mxu0 %v9249_v7 }
 0xd84   :  { %8225 = vmatmul.mubr.bf16.gmra.mrb[244].mxu1 %v9246_v63 }
 0xd85   :  { %8244 = vmatprep.mubr.bf16.mxu1 %v9250_v37  ;;  %v5751_v37 = vpop.permute.xlu0 %5750 }
 0xd87   :  { %6000 = vmatmul.mubr.bf16.gmra.mrb[20].mxu0 %v9247_v11 }
 0xe22   :  { %v7975_v17 = vpop.f32.mrb[248].mxu0 }
 0xe23   :  { %v7976_v44 = vpop.f32.mrb[249].mxu0 }
 0xe24   :  { %v7977_v35 = vadd.f32 %v7976_v44, %v7975_v17  ;;  %v7978_v42 = vpop.f32.mrb[250].mxu0 }
 0xe25   :  { %v7979_v5 = vpop.f32.mrb[251].mxu0 }
 0xe26   :  { %v7980_v30 = vadd.f32 %v7979_v5, %v7978_v42  ;;  %v5946_v14 = vadd.f32 %v7977_v35, %v5706_v33  ;;  %v5756_v33 = vpop.permute.xlu1 %5755 }
 0xe28   :  { %v5949_v15 = vadd.f32 %v7980_v30, %v5711_v4 }
 0xe2a   :  { %v7981_v28 = vpop.f32.mrb[252].mxu0 }
 0xe2b   :  { %v7982_v43 = vpop.f32.mrb[253].mxu0 }
 0xe2c   :  { %v7983_v60 = vadd.f32 %v7982_v43, %v7981_v28  ;;  %v7984_v2 = vpop.f32.mrb[254].mxu0 }
 0xe2d   :  { %v7985_v21 = vpop.f32.mrb[255].mxu0 }
 0xe2e   :  { %v7986_v49 = vadd.f32 %v7985_v21, %v7984_v2  ;;  %v5954_v9 = vadd.f32 %v7983_v60, %v5716_v20 }
 0xe30   :  { %v5957_v51 = vadd.f32 %v7986_v49, %v5721_v39 }
 0xe32   :  { %v7987_v8 = vpop.f32.mrb[0].mxu0 }
 0xe33   :  { %v7988_v27 = vpop.f32.mrb[1].mxu0 }
 0xe34   :  { %v7989_v52 = vadd.f32 %v7988_v27, %v7987_v8  ;;  %v7990_v61 = vpop.f32.mrb[2].mxu0 }
 0xe35   :  { %v7991_v47 = vpop.f32.mrb[3].mxu0 }
 0xe36   :  { %v7992_v58 = vadd.f32 %v7991_v47, %v7990_v61  ;;  %v5962_v0 = vadd.f32 %v7989_v52, %v5726_v59  ;;  %v5761_v47 = vpop.permute.xlu0 %5760 }
 0xe38   :  { %v5965_v35 = vadd.f32 %v7992_v58, %v5731_v3 }
 0xe3a   :  { %v7993_v18 = vpop.f32.mrb[4].mxu0 }
 0xe3b   :  { %v7994_v55 = vpop.f32.mrb[5].mxu0 }
 0xe3c   :  { %v7995_v40 = vadd.f32 %v7994_v55, %v7993_v18  ;;  %v7996_v53 = vpop.f32.mrb[6].mxu0 }
 0xe3d   :  { %v7997_v22 = vpop.f32.mrb[7].mxu0 }
 0xe3e   :  { %v7998_v48 = vadd.f32 %v7997_v22, %v7996_v53  ;;  %v5970_v29 = vadd.f32 %v7995_v40, %v5736_v24 }
 0xe3f   :  { %v8214_v31 = vpop.f32.mrb[232].mxu1 }
 0xe40   :  { %v6051_v32 = vadd.f32 %v8214_v31, %v5954_v9  ;;  %v6042_v46 = vpop.f32.mrb[233].mxu1  ;;  %v5973_v11 = vadd.f32 %v7998_v48, %v5741_v45 }
 0xe41   :  { %v6043_v16 = vadd.f32 %v6042_v46, %v5946_v14  ;;  %v8215_v6 = vpop.f32.mrb[234].mxu1 }
 0xe42   :  { %v6054_v56 = vadd.f32 %v8215_v6, %v5957_v51  ;;  %v7999_v38 = vpop.f32.mrb[8].mxu0  ;;  %v6045_v13 = vpop.f32.mrb[235].mxu1  ;;  %v6107_v41 = vmax.f32 %v6051_v32, 0.0 }
 0xe43   :  { %v6046_v26 = vadd.f32 %v6045_v13, %v5949_v15  ;;  %v8000_v57 = vpop.f32.mrb[9].mxu0  ;;  %v6105_v1 = vmax.f32 %v6043_v16, 0.0  ;;  %v5766_v6 = vpop.permute.xlu1 %5765 }
 0xe44   :  { %v6108_v36 = vmax.f32 %v6054_v56, 0.0  ;;  %v8001_v19 = vadd.f32 %v8000_v57, %v7999_v38  ;;  %v8002_v62 = vpop.f32.mrb[10].mxu0  ;;  %v5771_v57 = vpop.permute.xlu0 %5770 }
 0xe45   :  { %v6106_v54 = vmax.f32 %v6046_v26, 0.0  ;;  %v8003_v34 = vpop.f32.mrb[11].mxu0 }
 0xe46   :  { %v6130_v23 = vpack.c.bf16 %v6108_v36, %v6107_v41  ;;  %v8004_v25 = vadd.f32 %v8003_v34, %v8002_v62  ;;  %v5978_v18 = vadd.f32 %v8001_v19, %v5746_v12 }
 0xe47   :  { %v6129_v50 = vpack.c.bf16 %v6106_v54, %v6105_v1  ;;  %v8218_v10 = vpop.f32.mrb[236].mxu1 }
 0xe48   :  { %v6067_v7 = vadd.f32 %v8218_v10, %v5970_v29  ;;  %v6058_v63 = vpop.f32.mrb[237].mxu1  ;;  %v5981_v22 = vadd.f32 %v8004_v25, %v5751_v37  ;;  %v5776_v10 = vpop.permute.xlu1 %5775 }
 0xe49   :  { %v6059_v17 = vadd.f32 %v6058_v63, %v5962_v0  ;;  %v8219_v44 = vpop.f32.mrb[238].mxu1  ;;  %8228 = vmatprep.subr.bf16.mxu1 %v6129_v50 }
 0xe4a   :  { %v6070_v42 = vadd.f32 %v8219_v44, %v5973_v11  ;;  %v8005_v5 = vpop.f32.mrb[12].mxu0  ;;  %v6061_v30 = vpop.f32.mrb[239].mxu1  ;;  %8229 = vmatpush3.bf16.msra.mxu1 %v6129_v50  ;;  %v6111_v60 = vmax.f32 %v6067_v7, 0.0 }
 0xe4b   :  { %v6062_v28 = vadd.f32 %v6061_v30, %v5965_v35  ;;  %v8006_v43 = vpop.f32.mrb[13].mxu0  ;;  %8230 = vmatprep.subr.bf16.mxu1 %v6130_v23  ;;  %v6109_v4 = vmax.f32 %v6059_v17, 0.0  ;;  %v5781_v17 = vpop.permute.xlu0 %5780 }
 0xe4c   :  { %v6112_v2 = vmax.f32 %v6070_v42, 0.0  ;;  %v8007_v21 = vadd.f32 %v8006_v43, %v8005_v5  ;;  %v8008_v49 = vpop.f32.mrb[14].mxu0 }
 0xe4d   :  { %v6110_v8 = vmax.f32 %v6062_v28, 0.0  ;;  %v8009_v27 = vpop.f32.mrb[15].mxu0 }
 0xe4e   :  { %v6132_v52 = vpack.c.bf16 %v6112_v2, %v6111_v60  ;;  %v8010_v61 = vadd.f32 %v8009_v27, %v8008_v49  ;;  %8231 = vmatpush3.bf16.msra.mxu1 %v6130_v23  ;;  %v5986_v20 = vadd.f32 %v8007_v21, %v5756_v33  ;;  %v9251_v60 = vld [vmem:[%s12026_s16 + $0x8] sm:$0xff]   ;;  %v9252_v2 = vld [vmem:[%s12026_s16 + $0x10] sm:$0xff]   ;;  %v9253_v21 = vld [vmem:[%s12026_s16 + $0x18] sm:$0xff]   ;;  %v9259_v49 = vmov 0.0   ;;  %v6148_v33 = vpop.permute.xlu1 %6147 }
 0xe4f   :  { %v6131_v58 = vpack.c.bf16 %v6110_v8, %v6109_v4  ;;  %v8222_v39 = vpop.f32.mrb[240].mxu1  ;;  %v6153_v4 = vpop.permute.xlu0 %6152 }
 0xe50   :  { %v6083_v59 = vadd.f32 %v8222_v39, %v5986_v20  ;;  %v6074_v55 = vpop.f32.mrb[241].mxu1  ;;  %v5989_v40 = vadd.f32 %v8010_v61, %v5761_v47 }
 0xe51   :  { %v6075_v53 = vadd.f32 %v6074_v55, %v5978_v18  ;;  %v8223_v3 = vpop.f32.mrb[242].mxu1  ;;  %8232 = vmatprep.subr.bf16.mxu1 %v6131_v58 }
 0xe52   :  { %v6086_v48 = vadd.f32 %v8223_v3, %v5989_v40  ;;  %v8011_v9 = vpop.f32.mrb[16].mxu0  ;;  %v6077_v31 = vpop.f32.mrb[243].mxu1  ;;  %8233 = vmatpush3.bf16.msra.mxu1 %v6131_v58  ;;  %v6115_v46 = vmax.f32 %v6083_v59, 0.0 }
 0xe53   :  { %v6078_v14 = vadd.f32 %v6077_v31, %v5981_v22  ;;  %v8012_v32 = vpop.f32.mrb[17].mxu0  ;;  %8234 = vmatprep.subr.bf16.mxu1 %v6132_v52  ;;  %v6113_v15 = vmax.f32 %v6075_v53, 0.0  ;;  %v6158_v8 = vpop.permute.xlu1 %6157 }
 0xe54   :  { %v6116_v51 = vmax.f32 %v6086_v48, 0.0  ;;  %v8013_v24 = vadd.f32 %v8012_v32, %v8011_v9  ;;  %v8014_v16 = vpop.f32.mrb[18].mxu0  ;;  %v6163_v27 = vpop.permute.xlu0 %6162 }
 0xe55   :  { %v6114_v56 = vmax.f32 %v6078_v14, 0.0  ;;  %v8015_v38 = vpop.f32.mrb[19].mxu0 }
 0xe56   :  { %v6134_v13 = vpack.c.bf16 %v6116_v51, %v6115_v46  ;;  %v8016_v45 = vadd.f32 %v8015_v38, %v8014_v16  ;;  %8235 = vmatpush3.bf16.msra.mxu1 %v6132_v52  ;;  %v5994_v26 = vadd.f32 %v8013_v24, %v5766_v6 }
 0xe57   :  { %v6133_v41 = vpack.c.bf16 %v6114_v56, %v6113_v15  ;;  %v8226_v36 = vpop.f32.mrb[244].mxu1  ;;  %v6168_v47 = vpop.permute.xlu1 %6167 }
 0xe58   :  { %v6090_v19 = vpop.f32.mrb[245].mxu1  ;;  %v5997_v62 = vadd.f32 %v8016_v45, %v5771_v57  ;;  %v6173_v55 = vpop.permute.xlu0 %6172 }
 0xe59   :  { %v6091_v1 = vadd.f32 %v6090_v19, %v5994_v26  ;;  %v8227_v54 = vpop.f32.mrb[246].mxu1  ;;  %8236 = vmatprep.subr.bf16.mxu1 %v6133_v41  ;;  %v6282_v19 = vld [vmem:[%s12027_s18] sm:$0xf] }
 0xe5a   :  { %v8017_v34 = vpop.f32.mrb[20].mxu0  ;;  %v6093_v23 = vpop.f32.mrb[247].mxu1  ;;  %8237 = vmatpush3.bf16.msra.mxu1 %v6133_v41 }
 0xe5b   :  { %v6094_v25 = vadd.f32 %v6093_v23, %v5997_v62  ;;  %v8018_v29 = vpop.f32.mrb[21].mxu0  ;;  %8238 = vmatprep.subr.bf16.mxu1 %v6134_v13  ;;  %v6117_v0 = vmax.f32 %v6091_v1, 0.0  ;;  %v6178_v31 = vpop.permute.xlu1 %6177 }
 0xe5c   :  { %v8019_v12 = vadd.f32 %v8018_v29, %v8017_v34  ;;  %v8020_v50 = vpop.f32.mrb[22].mxu0  ;;  %v6183_v24 = vpop.permute.xlu0 %6182 }
 0xe5d   :  { %v6118_v7 = vmax.f32 %v6094_v25, 0.0  ;;  %v8021_v63 = vpop.f32.mrb[23].mxu0 }
 0xe5e   :  { %v6002_v11 = vadd.f32 %v8019_v12, %v5776_v10  ;;  %v8022_v37 = vadd.f32 %v8021_v63, %v8020_v50  ;;  %8239 = vmatpush3.bf16.msra.mxu1 %v6134_v13 }
 0xe5f   :  { %v6135_v44 = vpack.c.bf16 %v6118_v7, %v6117_v0  ;;  %v6291_v62 = vpop.permute.xlu1 %6290 }
 0xe60   :  { %v6099_v35 = vadd.f32 %v8226_v36, %v6002_v11  ;;  %v6005_v42 = vadd.f32 %v8022_v37, %v5781_v17 }
 0xe61   :  { %8240 = vmatprep.subr.bf16.mxu1 %v6135_v44 }
 0xe62   :  { %v6102_v5 = vadd.f32 %v8227_v54, %v6005_v42  ;;  %8241 = vmatpush3.bf16.msra.mxu1 %v6135_v44  ;;  %v6119_v30 = vmax.f32 %v6099_v35, 0.0 }
 0xe64   :  { %v6120_v28 = vmax.f32 %v6102_v5, 0.0 }
 0xe66   :  { %v6136_v43 = vpack.c.bf16 %v6120_v28, %v6119_v30 }
 0xe68   :  { %8242 = vmatprep.subr.bf16.mxu1 %v6136_v43 }
 0xe69   :  { %8243 = vmatpush3.bf16.msra.mxu1 %v6136_v43 }
 0xe6a   :  { %8252 = vmatprep.subr.bf16.mxu1 %v9259_v49 }
 0xe6c   :  { %8245 = vmatmul.mubr.bf16.vlgmr.msra.gmra.mrb[248].mxu1 %v9251_v60 }
 0xe6d   :  { %8248 = vmatprep.mubr.bf16.mxu1 %v9252_v2 }
 0xe74   :  { %8249 = vmatmul.mubr.bf16.gmra.mrb[252].mxu1 %v9253_v21 }
 0xe75   :  { %8260 = vmatprep.mubr.msk.bf16.mxu1 %vm9260_vm1, %v9259_v49 }
 0xf3f   :  { %v8246_v52 = vpop.f32.mrb[248].mxu1 }
 0xf40   :  { %v6252_v61 = vadd.f32 %v8246_v52, %v6158_v8  ;;  %v6243_v20 = vpop.f32.mrb[249].mxu1 }
 0xf41   :  { %v6244_v58 = vadd.f32 %v6243_v20, %v6148_v33  ;;  %v8247_v39 = vpop.f32.mrb[250].mxu1 }
 0xf42   :  { %v6255_v18 = vadd.f32 %v8247_v39, %v6163_v27  ;;  %v6246_v59 = vpop.f32.mrb[251].mxu1  ;;  %v6276_v53 = vmax.f32 %v6252_v61, 0.0 }
 0xf43   :  { %v6247_v40 = vadd.f32 %v6246_v59, %v6153_v4  ;;  %v6274_v22 = vmax.f32 %v6244_v58, 0.0 }
 0xf44   :  { %v6277_v3 = vmax.f32 %v6255_v18, 0.0 }
 0xf45   :  { %v6275_v48 = vmax.f32 %v6247_v40, 0.0 }
 0xf46   :  { %v6284_v9 = vpack.c.bf16 %v6277_v3, %v6276_v53 }
 0xf47   :  { %v6283_v14 = vpack.c.bf16 %v6275_v48, %v6274_v22  ;;  %v8250_v32 = vpop.f32.mrb[252].mxu1 }
 0xf48   :  { %v6268_v46 = vadd.f32 %v8250_v32, %v6178_v31  ;;  %v6259_v51 = vpop.f32.mrb[253].mxu1 }
 0xf49   :  { %v6260_v16 = vadd.f32 %v6259_v51, %v6168_v47  ;;  %v8251_v6 = vpop.f32.mrb[254].mxu1  ;;  %8253 = vmatpush3.bf16.msra.mxu1 %v6283_v14 }
 0xf4a   :  { %v6271_v15 = vadd.f32 %v8251_v6, %v6183_v24  ;;  %v6262_v56 = vpop.f32.mrb[255].mxu1  ;;  %8254 = vmatprep.subr.bf16.mxu1 %v9259_v49  ;;  %v6280_v13 = vmax.f32 %v6268_v46, 0.0 }
 0xf4b   :  { %v6263_v38 = vadd.f32 %v6262_v56, %v6173_v55  ;;  %v6278_v26 = vmax.f32 %v6260_v16, 0.0 }
 0xf4c   :  { %v6281_v45 = vmax.f32 %v6271_v15, 0.0 }
 0xf4d   :  { %v6279_v57 = vmax.f32 %v6263_v38, 0.0  ;;  %8255 = vmatpush3.bf16.msra.mxu1 %v6284_v9 }
 0xf4e   :  { %v6286_v41 = vpack.c.bf16 %v6281_v45, %v6280_v13  ;;  %8256 = vmatprep.subr.bf16.mxu1 %v9259_v49 }
 0xf4f   :  { %v6285_v36 = vpack.c.bf16 %v6279_v57, %v6278_v26 }
 0xf51   :  { %8257 = vmatpush3.bf16.msra.mxu1 %v6285_v36 }
 0xf52   :  { %8258 = vmatprep.subr.bf16.mxu1 %v9259_v49 }
 0xf55   :  { %8259 = vmatpush3.bf16.msra.mxu1 %v6286_v41 }
 0xf58   :  { %8261 = vmatmul.mubr.msk.bf16.vlgmr.msra.gmra.mrb[0].mxu1 %vm2182_vm11, %v6282_v19 }
0x102b   :  { %v6330_v1 = vpop.f32.mrb[0].mxu1 }
0x102c   :  { %v6331_v54 = vadd.f32 %v6330_v1, %v6291_v62  ;;  %v8262_v34 = vpop.f32.mrb[1].mxu1 }
0x102d   :  { %v6333_v23 = vpop.f32.mrb[2].mxu1 }
0x102e   :  { %6336 = vst [vmem:[%s12028_s20] sm:$0xff] %v6331_v54  ;;  %v8263_v25 = vpop.f32.mrb[3].mxu1 }

</bundles_post_ra>
